<compile_context>
chip_gen: v7x
topology: tpu7x:2x2x1
jax: 0.10.0
libtpu: 0.0.40
codegen_flags: <defaults>
</compile_context>

<pallas_src>
import functools

import jax
import jax.numpy as jnp
from jax.experimental import pallas as pl
from jax.experimental.pallas import tpu as pltpu


def _bp_fused_kernel(
    x_ref, w1_ref, b1_ref, w2_ref, b2_ref, w3_ref, b3_ref,   # inputs
    o_ref,                                                   # output
    h1_ref, acc_ref,                                         # scratch
):
    """grid = (H2 // tn2,) : stream fc2/fc3 weight chunks, keep h1 resident.

    Step j:
      j == 0      : h1 = relu(x @ W1 + b1)   (whole fc1, W1 fully resident)
      every j     : h2_j = relu(h1 @ W2[:, j] + b2[j])
                    acc += h2_j @ W3[j, :]
      j == last   : out = relu(acc + b3)
    """
    j = pl.program_id(0)

    @pl.when(j == 0)
    def _():
        h1 = jnp.dot(x_ref[...], w1_ref[...],
                     preferred_element_type=jnp.float32)
        h1 = jnp.maximum(h1 + b1_ref[...], 0.0)
        h1_ref[...] = h1.astype(h1_ref.dtype)          # keep bf16 for the MXU
        acc_ref[...] = jnp.zeros_like(acc_ref)

    # fc2 chunk (+bias, ReLU) -> contributes one K-chunk of fc3's reduction.
    h2 = jnp.dot(h1_ref[...], w2_ref[...],
                 preferred_element_type=jnp.float32)
    h2 = jnp.maximum(h2 + b2_ref[...], 0.0).astype(w3_ref.dtype)
    acc_ref[...] += jnp.dot(h2, w3_ref[...],
                            preferred_element_type=jnp.float32)

    @pl.when(j == pl.num_programs(0) - 1)
    def _():
        y = acc_ref[...] + b3_ref[...]
        o_ref[...] = jnp.maximum(y, 0.0).astype(o_ref.dtype)


def prepare_bp_params(params):
    """One-time prep: bf16 weights, (1, N) f32 biases.

    Hoists the per-call f32->bf16 casts (and any reshaping) out of the jitted
    forward so the kernel's own weight stream is the only HBM traffic per call.
    """
    (w1, b1), (w2, b2), (w3, b3) = params
    return (
        w1.astype(jnp.bfloat16), b1.reshape(1, -1).astype(jnp.float32),
        w2.astype(jnp.bfloat16), b2.reshape(1, -1).astype(jnp.float32),
        w3.astype(jnp.bfloat16), b3.reshape(1, -1).astype(jnp.float32),
    )


def bp_forward(x, w1, b1, w2, b2, w3, b3, *, tn2=1024):
    """Fused Bp forward: relu(fc3(relu(fc2(relu(fc1(x)))))), eval-mode dropout.

    Expects params already run through prepare_bp_params():
      x : (B, in_dim) f32
      w1: (in_dim, 1024) bf16, w2: (1024, 2048) bf16, w3: (2048, out_dim) bf16
      b1: (1, 1024) f32,  b2: (1, 2048) f32,  b3: (1, out_dim) f32
    (weights are pre-transposed vs PyTorch's (out, in) layout).
    """
    B, in_dim = x.shape
    H1 = w1.shape[1]
    H2 = w2.shape[1]
    out_dim = w3.shape[1]
    assert w1.shape[0] == in_dim and w2.shape[0] == H1 and w3.shape[0] == H2
    assert H2 % tn2 == 0
    # Casts belong in prepare_bp_params, not here (per-call HBM traffic).
    assert w1.dtype == jnp.bfloat16 and w2.dtype == jnp.bfloat16
    assert w3.dtype == jnp.bfloat16
    assert b1.shape == (1, H1) and b2.shape == (1, H2) and b3.shape == (1, out_dim)

    xb = x.astype(jnp.bfloat16)      # tiny (B, in_dim); fine to cast per call

    grid = (H2 // tn2,)

    out = pl.pallas_call(
        _bp_fused_kernel,
        out_shape=jax.ShapeDtypeStruct((B, out_dim), jnp.float32),
        grid_spec=pltpu.PrefetchScalarGridSpec(
            num_scalar_prefetch=0,
            grid=grid,
            in_specs=[
                pl.BlockSpec((B, in_dim), lambda j: (0, 0)),     # x   (resident)
                pl.BlockSpec((in_dim, H1), lambda j: (0, 0)),    # w1  (resident)
                pl.BlockSpec((1, H1), lambda j: (0, 0)),         # b1
                pl.BlockSpec((H1, tn2), lambda j: (0, j)),       # w2  (streamed)
                pl.BlockSpec((1, tn2), lambda j: (0, j)),        # b2  (streamed)
                pl.BlockSpec((tn2, out_dim), lambda j: (j, 0)),  # w3  (streamed,
                                                                 #  unpadded)
                pl.BlockSpec((1, out_dim), lambda j: (0, 0)),    # b3
            ],
            out_specs=pl.BlockSpec((B, out_dim), lambda j: (0, 0)),
            scratch_shapes=[
                pltpu.VMEM((B, H1), jnp.bfloat16),      # h1, resident across grid
                pltpu.VMEM((B, out_dim), jnp.float32),  # fc3 accumulator
            ],
        ),
        compiler_params=pltpu.CompilerParams(
            dimension_semantics=("arbitrary",),   # reduction axis for fc3 acc
        ),
    )(xb, w1, b1, w2, b2, w3, b3)

    return out


def init_bp_params(key, in_dim, out_dim):
    """Parameter init matching the Bp module's shapes.

    PyTorch Linear stores weight as (out, in); we store the transpose (in, out).
    Uniform(-1/sqrt(fan_in), 1/sqrt(fan_in)) like torch's default init.
    """
    dims = [(in_dim, 1024), (1024, 2048), (2048, out_dim)]
    params = []
    for (fan_in, fan_out) in dims:
        key, kw, kb = jax.random.split(key, 3)
        bound = 1.0 / jnp.sqrt(fan_in)
        w = jax.random.uniform(
            kw, (fan_in, fan_out), jnp.float32, minval=-bound, maxval=bound
        )
        b = jax.random.uniform(
            kb, (fan_out,), jnp.float32, minval=-bound, maxval=bound
        )
        params.append((w, b))
    return params


# tn2: sweep {512, 1024, 2048}; 1024 is the v6e sweet spot, 1024/2048 on v7x,
# 512/1024 on v5e.
bp_forward_jit = jax.jit(functools.partial(bp_forward, tn2=1024))


if __name__ == "__main__":
    key = jax.random.PRNGKey(0)
    kx, kp = jax.random.split(key)

    B, in_dim, out_dim = 8, 128, 16
    x = jax.random.normal(kx, (B, in_dim), jnp.float32)

    params = init_bp_params(kp, in_dim, out_dim)
    (w1, b1), (w2, b2), (w3, b3) = params

    # One-time prep (bf16 weights, (1, N) biases) -- outside the per-call path.
    w1b, b1r, w2b, b2r, w3b, b3r = jax.block_until_ready(
        prepare_bp_params(params)
    )

    y = bp_forward_jit(x, w1b, b1r, w2b, b2r, w3b, b3r)
    jax.block_until_ready(y)

    # Pure-JAX reference with the same bf16 weight / activation quantization
    # and f32 accumulation as the kernel.
    def ref(x):
        xb = x.astype(jnp.bfloat16)
        h1 = jnp.maximum(
            jnp.dot(xb, w1.astype(jnp.bfloat16),
                    preferred_element_type=jnp.float32) + b1, 0.0
        ).astype(jnp.bfloat16)
        h2 = jnp.maximum(
            jnp.dot(h1, w2.astype(jnp.bfloat16),
                    preferred_element_type=jnp.float32) + b2, 0.0
        ).astype(jnp.bfloat16)
        y = jnp.maximum(
            jnp.dot(h2, w3.astype(jnp.bfloat16),
                    preferred_element_type=jnp.float32) + b3, 0.0
        )
        return y

    y_ref = ref(x)
    assert y.shape == (B, out_dim)
    assert jnp.allclose(y, y_ref, atol=2e-2, rtol=2e-2), (
        float(jnp.max(jnp.abs(y - y_ref)))
    )

    print("KERNEL_OK")
</pallas_src>

<mosaic_0001>
module attributes {stable_mosaic.version = 11 : i64} {
  func.func @_bp_fused_kernel(%arg0: i32, %arg1: memref<8x128xbf16, #tpu.memory_space<vmem>>, %arg2: memref<128x1024xbf16, #tpu.memory_space<vmem>>, %arg3: memref<1x1024xf32, #tpu.memory_space<vmem>>, %arg4: memref<1024x1024xbf16, #tpu.memory_space<vmem>>, %arg5: memref<1x1024xf32, #tpu.memory_space<vmem>>, %arg6: memref<1024x16xbf16, #tpu.memory_space<vmem>>, %arg7: memref<1x16xf32, #tpu.memory_space<vmem>>, %arg8: memref<8x16xf32, #tpu.memory_space<vmem>>, %arg9: memref<8x1024xbf16, #tpu.memory_space<vmem>>, %arg10: memref<8x16xf32, #tpu.memory_space<vmem>>) attributes {dimension_semantics = [#tpu.dimension_semantics<arbitrary>], iteration_bounds = array<i64: 2>, scalar_prefetch = 0 : i64, scratch_operands = 2 : i64, tpu.core_type = #tpu.core_type<tc>, window_params = [{pipeline_mode = #tpu.pipeline_mode<synchronous>, transform_indices = @transform_0, window_bounds = array<i64: 8, 128>}, {pipeline_mode = #tpu.pipeline_mode<synchronous>, transform_indices = @transform_1, window_bounds = array<i64: 128, 1024>}, {pipeline_mode = #tpu.pipeline_mode<synchronous>, transform_indices = @transform_2, window_bounds = array<i64: 1, 1024>}, {transform_indices = @transform_3, window_bounds = array<i64: 1024, 1024>}, {transform_indices = @transform_4, window_bounds = array<i64: 1, 1024>}, {transform_indices = @transform_5, window_bounds = array<i64: 1024, 16>}, {pipeline_mode = #tpu.pipeline_mode<synchronous>, transform_indices = @transform_6, window_bounds = array<i64: 1, 16>}, {pipeline_mode = #tpu.pipeline_mode<synchronous>, transform_indices = @transform_7, window_bounds = array<i64: 8, 16>}]} {
    %c0_i32 = arith.constant 0 : i32
    %0 = arith.cmpi eq, %arg0, %c0_i32 : i32
    %1 = arith.extui %0 : i1 to i32
    %c0_i32_0 = arith.constant 0 : i32
    %2 = arith.cmpi ne, %1, %c0_i32_0 : i32
    scf.if %2 {
      %c0_15 = arith.constant 0 : index
      %c0_16 = arith.constant 0 : index
      %20 = vector.load %arg1[%c0_15, %c0_16] : memref<8x128xbf16, #tpu.memory_space<vmem>>, vector<8x128xbf16>
      %c0_17 = arith.constant 0 : index
      %c0_18 = arith.constant 0 : index
      %21 = vector.load %arg2[%c0_17, %c0_18] : memref<128x1024xbf16, #tpu.memory_space<vmem>>, vector<128x1024xbf16>
      %cst_19 = arith.constant dense<0.000000e+00> : vector<8x1024xf32>
      %22 = tpu.matmul %20, %21, %cst_19 {dimension_numbers = #tpu.dot_dimension_numbers<[1], [0], [0], [1], [0, 0, 1, 1], [], []>} : vector<8x128xbf16>, vector<128x1024xbf16>, vector<8x1024xf32> -> vector<8x1024xf32>
      %c0_20 = arith.constant 0 : index
      %c0_21 = arith.constant 0 : index
      %23 = vector.load %arg3[%c0_20, %c0_21] : memref<1x1024xf32, #tpu.memory_space<vmem>>, vector<1x1024xf32>
      %24 = vector.broadcast %23 : vector<1x1024xf32> to vector<8x1024xf32>
      %25 = arith.addf %22, %24 : vector<8x1024xf32>
      %cst_22 = arith.constant 0.000000e+00 : f32
      %26 = vector.broadcast %cst_22 : f32 to vector<8x1024xf32>
      %27 = arith.maximumf %25, %26 : vector<8x1024xf32>
      %28 = arith.truncf %27 : vector<8x1024xf32> to vector<8x1024xbf16>
      %c0_23 = arith.constant 0 : index
      %c0_24 = arith.constant 0 : index
      %29 = vector.load %arg9[%c0_23, %c0_24] : memref<8x1024xbf16, #tpu.memory_space<vmem>>, vector<8x1024xbf16>
      tpu.vector_store %arg9[%c0_23, %c0_24], %28 {strides = array<i32>} : memref<8x1024xbf16, #tpu.memory_space<vmem>>, vector<8x1024xbf16>,
      %cst_25 = arith.constant 0.000000e+00 : f32
      %30 = vector.broadcast %cst_25 : f32 to vector<8x16xf32>
      %c0_26 = arith.constant 0 : index
      %c0_27 = arith.constant 0 : index
      %31 = vector.load %arg10[%c0_26, %c0_27] : memref<8x16xf32, #tpu.memory_space<vmem>>, vector<8x16xf32>
      tpu.vector_store %arg10[%c0_26, %c0_27], %30 {strides = array<i32>} : memref<8x16xf32, #tpu.memory_space<vmem>>, vector<8x16xf32>,
    } else {
    }
    %c0 = arith.constant 0 : index
    %c0_1 = arith.constant 0 : index
    %3 = vector.load %arg9[%c0, %c0_1] : memref<8x1024xbf16, #tpu.memory_space<vmem>>, vector<8x1024xbf16>
    %c0_2 = arith.constant 0 : index
    %c0_3 = arith.constant 0 : index
    %4 = vector.load %arg4[%c0_2, %c0_3] : memref<1024x1024xbf16, #tpu.memory_space<vmem>>, vector<1024x1024xbf16>
    %cst = arith.constant dense<0.000000e+00> : vector<8x1024xf32>
    %5 = tpu.matmul %3, %4, %cst {dimension_numbers = #tpu.dot_dimension_numbers<[1], [0], [0], [1], [0, 0, 1, 1], [], []>} : vector<8x1024xbf16>, vector<1024x1024xbf16>, vector<8x1024xf32> -> vector<8x1024xf32>
    %c0_4 = arith.constant 0 : index
    %c0_5 = arith.constant 0 : index
    %6 = vector.load %arg5[%c0_4, %c0_5] : memref<1x1024xf32, #tpu.memory_space<vmem>>, vector<1x1024xf32>
    %7 = vector.broadcast %6 : vector<1x1024xf32> to vector<8x1024xf32>
    %8 = arith.addf %5, %7 : vector<8x1024xf32>
    %cst_6 = arith.constant 0.000000e+00 : f32
    %9 = vector.broadcast %cst_6 : f32 to vector<8x1024xf32>
    %10 = arith.maximumf %8, %9 : vector<8x1024xf32>
    %11 = arith.truncf %10 : vector<8x1024xf32> to vector<8x1024xbf16>
    %c0_7 = arith.constant 0 : index
    %c0_8 = arith.constant 0 : index
    %12 = vector.load %arg10[%c0_7, %c0_8] : memref<8x16xf32, #tpu.memory_space<vmem>>, vector<8x16xf32>
    %c0_9 = arith.constant 0 : index
    %c0_10 = arith.constant 0 : index
    %13 = vector.load %arg6[%c0_9, %c0_10] : memref<1024x16xbf16, #tpu.memory_space<vmem>>, vector<1024x16xbf16>
    %cst_11 = arith.constant dense<0.000000e+00> : vector<8x16xf32>
    %14 = tpu.matmul %11, %13, %cst_11 {dimension_numbers = #tpu.dot_dimension_numbers<[1], [0], [0], [1], [0, 0, 1, 1], [], []>} : vector<8x1024xbf16>, vector<1024x16xbf16>, vector<8x16xf32> -> vector<8x16xf32>
    %15 = arith.addf %12, %14 : vector<8x16xf32>
    %c0_12 = arith.constant 0 : index
    %c0_13 = arith.constant 0 : index
    %16 = vector.load %arg10[%c0_12, %c0_13] : memref<8x16xf32, #tpu.memory_space<vmem>>, vector<8x16xf32>
    tpu.vector_store %arg10[%c0_12, %c0_13], %15 {strides = array<i32>} : memref<8x16xf32, #tpu.memory_space<vmem>>, vector<8x16xf32>,
    %c1_i32 = arith.constant 1 : i32
    %17 = arith.cmpi eq, %arg0, %c1_i32 : i32
    %18 = arith.extui %17 : i1 to i32
    %c0_i32_14 = arith.constant 0 : i32
    %19 = arith.cmpi ne, %18, %c0_i32_14 : i32
    scf.if %19 {
      %c0_15 = arith.constant 0 : index
      %c0_16 = arith.constant 0 : index
      %20 = vector.load %arg10[%c0_15, %c0_16] : memref<8x16xf32, #tpu.memory_space<vmem>>, vector<8x16xf32>
      %c0_17 = arith.constant 0 : index
      %c0_18 = arith.constant 0 : index
      %21 = vector.load %arg7[%c0_17, %c0_18] : memref<1x16xf32, #tpu.memory_space<vmem>>, vector<1x16xf32>
      %22 = vector.broadcast %21 : vector<1x16xf32> to vector<8x16xf32>
      %23 = arith.addf %20, %22 : vector<8x16xf32>
      %cst_19 = arith.constant 0.000000e+00 : f32
      %24 = vector.broadcast %cst_19 : f32 to vector<8x16xf32>
      %25 = arith.maximumf %23, %24 : vector<8x16xf32>
      %c0_20 = arith.constant 0 : index
      %c0_21 = arith.constant 0 : index
      %26 = vector.load %arg8[%c0_20, %c0_21] : memref<8x16xf32, #tpu.memory_space<vmem>>, vector<8x16xf32>
      tpu.vector_store %arg8[%c0_20, %c0_21], %25 {strides = array<i32>} : memref<8x16xf32, #tpu.memory_space<vmem>>, vector<8x16xf32>,
    } else {
    }
    return
  }
  func.func @transform_0(%arg0: i32) -> (i32, i32) {
    %c0_i32 = arith.constant 0 : i32
    %c0_i32_0 = arith.constant 0 : i32
    %c0_i32_1 = arith.constant 0 : i32
    return %c0_i32, %c0_i32_0 : i32, i32
  }
  func.func @transform_1(%arg0: i32) -> (i32, i32) {
    %c0_i32 = arith.constant 0 : i32
    %c0_i32_0 = arith.constant 0 : i32
    %c0_i32_1 = arith.constant 0 : i32
    return %c0_i32, %c0_i32_0 : i32, i32
  }
  func.func @transform_2(%arg0: i32) -> (i32, i32) {
    %c0_i32 = arith.constant 0 : i32
    %c0_i32_0 = arith.constant 0 : i32
    %c0_i32_1 = arith.constant 0 : i32
    return %c0_i32, %c0_i32_0 : i32, i32
  }
  func.func @transform_3(%arg0: i32) -> (i32, i32) {
    %c0_i32 = arith.constant 0 : i32
    %c0_i32_0 = arith.constant 0 : i32
    return %c0_i32, %arg0 : i32, i32
  }
  func.func @transform_4(%arg0: i32) -> (i32, i32) {
    %c0_i32 = arith.constant 0 : i32
    %c0_i32_0 = arith.constant 0 : i32
    return %c0_i32, %arg0 : i32, i32
  }
  func.func @transform_5(%arg0: i32) -> (i32, i32) {
    %c0_i32 = arith.constant 0 : i32
    %c0_i32_0 = arith.constant 0 : i32
    return %arg0, %c0_i32 : i32, i32
  }
  func.func @transform_6(%arg0: i32) -> (i32, i32) {
    %c0_i32 = arith.constant 0 : i32
    %c0_i32_0 = arith.constant 0 : i32
    %c0_i32_1 = arith.constant 0 : i32
    return %c0_i32, %c0_i32_0 : i32, i32
  }
  func.func @transform_7(%arg0: i32) -> (i32, i32) {
    %c0_i32 = arith.constant 0 : i32
    %c0_i32_0 = arith.constant 0 : i32
    %c0_i32_1 = arith.constant 0 : i32
    return %c0_i32, %c0_i32_0 : i32, i32
  }
}

</mosaic_0001>

<bundles_post_ra>
// kernel: bp_forward.1
= control target key start
LH: loop header
LB: loop body
LE: loop exit
PB: predicated region body
PF: predicated region fallthrough
CT: control target
= control target key end

     0   :  { %s7880_s0 = inlined_call_operand.vmem [shape: bf16[8,128], index: 0, kind: input, shape index: {}]   ;;  %s7881_s1 = inlined_call_operand.hbm [shape: bf16[128,1024], index: 1, kind: input, shape index: {}]   ;;  %s7882_s2 = inlined_call_operand.hbm [shape: f32[1,1024], index: 2, kind: input, shape index: {}]   ;;  %s7883_s3 = inlined_call_operand.hbm [shape: bf16[1024,2048], index: 3, kind: input, shape index: {}]   ;;  %s7884_s4 = inlined_call_operand.hbm [shape: f32[1,2048], index: 4, kind: input, shape index: {}]   ;;  %s7885_s5 = inlined_call_operand.vmem [shape: bf16[2048,16], index: 5, kind: input, shape index: {}]   ;;  %s7886_s6 = inlined_call_operand.hbm [shape: f32[1,16], index: 6, kind: input, shape index: {}]   ;;  %s7887_s7 = inlined_call_operand.hbm [shape: f32[8,16], index: 7, kind: output, shape index: {}]  }
   0x1   :  { %7897 = sst [smem:[#allocation20_spill]] %s7881_s1 }
   0x2   :  { %7898 = sst [smem:[#allocation21_spill]] %s7882_s2 }
   0x3   :  { %12 = vsyncpa [#allocation5], 0 }
   0x4   :  { %13 = vsyncpa [#allocation8], 0 }
   0x5   :  { %14 = vsyncpa [#allocation6], 0  ;;  %s6910_s24 = smov 0   ;;  %s6912_s25 = smov 0  }
   0x6   :  { %s6914_s26 = smov 0   ;;  %s6916_s27 = smov 0  }
   0x7 LB: > { %s6929_s28 = sadd.s32 4294967295, %s6857_s27   ;;  %s6932_s29 = sadd.s32 1, %s6857_s27   ;;  %s6857_s27 = sphi %s6916_s27, %s7924_s27   ;;  %s6853_s26 = sphi %s6914_s26, %s7928_s26   ;;  %s6849_s25 = sphi %s6912_s25, %s7927_s25   ;;  %s6845_s24 = sphi %s6910_s24, %s7926_s24  }
   0x8   : > { %7899 = sst [smem:[#allocation18_spill]] %s6932_s29  ;;  %s87_s30 = ssub.s32 %s6857_s27, %s6932_s29 }
   0x9   : > { %s90_s8 = sadd.s32 1, %s6853_s26  ;;  %p88_p0 = scmp.eq.s32.totalorder %s87_s30, 0 }
   0xa   : > { %p97_p1 = scmp.ne.s32.totalorder %s6853_s26, %s6849_s25  ;;  %p98_p2 = scmp.eq.s32.totalorder %s6857_s27, 0 }
   0xb   : > { %p103_p3 = scmp.ne.s32.totalorder %s6849_s25, %s6845_s24  ;;  %p7888_p5 = scmp.eq.s32.totalorder %s6929_s28, 0 }
   0xc   : > { %s6942_s9 = scalar_select %p88_p0, %s6853_s26, %s90_s8  }
   0xd   : > { %p6944_p4 = por %p98_p2, %p97_p1  ;;  %p5650_p6 = scmp.ge.s32.totalorder %s6857_s27, 1 }
   0xe   : > { %7900 = sst [smem:[#allocation19_spill]] %s6942_s9  ;;  %p208_p7 = scmp.lt.s32.totalorder %s6857_s27, 3 }
   0xf   : > { %p6953_p8 = por %p7888_p5, %p103_p3  ;;  %s6859_s13 = smov [#allocation4]  }
  0x10   : > { %p6958_p10 = pnand %p5650_p6, %p208_p7  ;;  %s223_s14 = sshll.u32 %s6859_s13, 4  ;;  %s224_s14 = int_to_ptr.vmem [resolvable:$true] %s223_s14 }
  0x11   : > { %s7902_s11 = scalar_select %p6953_p8, 1, 0 }
  0x12   : > { %s7903_s12 = scalar_select %p6958_p10, 1, 0 }
  0x13   : > { %p6498_p11 = pneg %p6958_p10  ;;  %p6518_p13 = scmp.lt.s32.totalorder %s6857_s27, 2 }
  0x14   : > { %s7906_s1 = sld [smem:[#allocation20_spill]] }
  0x15   : > { %p6966_p12 = pnand %p6498_p11, %p7888_p5  ;;  %p6974_p0 = pnand %p6518_p13, %p6944_p4 }
  0x17   : > { %s7904_s15 = scalar_select %p6966_p12, 1, 0 }
  0x18   : > { %s7905_s17 = scalar_select %p6974_p0, 1, 0 }
  0x19   : > { %p6986_p2 = pneg %p6966_p12 }
  0x1a   : > { %s6637_s20 = scalar_lea.hbm %s7906_s1, 8192 }
  0x1b   : > { %p6638_p1 = scmp.ne.s32.totalorder %s7906_s1, %s6637_s20  ;;  %p6644_p6 = scmp.lt.u32.totalorder %s6637_s20, %s7906_s1 }
  0x1d   : > { %p6640_p3 = pnand %p6986_p2, %p6638_p1 }
  0x1f   : > { %p6641_p4 = pneg %p6640_p3 }
  0x21   : > { %p6646_p7 = pnand %p6644_p6, %p6641_p4 }
  0x23   : > { %6649 = shalt.err (!%p6646_p7)
}
  0x24   : > { %s6650_s8 = scalar_lea.vmem %s224_s14, 8192  ;;  %p6658_p5 = scmp.lt.s32.totalorder %s224_s14, %s224_s14 }
  0x25   : > { %p6651_p11 = scmp.ne.s32.totalorder %s224_s14, %s6650_s8  ;;  %p6659_p8 = scmp.lt.s32.totalorder %s6650_s8, %s6650_s8 }
  0x27   : > { %p6653_p13 = pnand %p6651_p11, %p6986_p2  ;;  %p6660_p10 = por %p6659_p8, %p6658_p5 }
  0x29   : > { %p6654_p9 = pneg %p6653_p13 }
  0x2b   : > { %p6661_p0 = pnand %p6660_p10, %p6654_p9 }
  0x2d   : > { %6664 = shalt.err (!%p6661_p0)
}
  0x2e   : > { %s6860_s10 = smov 512   ;;  %s6861_s13 = smov 32  }
  0x2f   : > { %6501 = dma.hbm_to_vmem [thread:$0]  (!%p6966_p12), %s7906_s1, 8192, %s224_s14, [#allocation5], %s6860_s10, %s6860_s10, %s6861_s13  }
  0x30   : > { %s6862_s20 = smov [#allocation7]   ;;  %s7908_s2 = sld [smem:[#allocation21_spill]] }
  0x31   : > { %s237_s21 = sshll.u32 %s6862_s20, 4  ;;  %s238_s21 = int_to_ptr.vmem [resolvable:$true] %s237_s21 }
  0x36   : > { %s6665_s30 = scalar_lea.hbm %s7908_s2, 128 }
  0x37   : > { %p6666_p5 = scmp.ne.s32.totalorder %s7908_s2, %s6665_s30  ;;  %p6672_p10 = scmp.lt.u32.totalorder %s6665_s30, %s7908_s2 }
  0x39   : > { %p6668_p8 = pnand %p6666_p5, %p6986_p2 }
  0x3b   : > { %p6669_p9 = pneg %p6668_p8 }
  0x3d   : > { %p6674_p0 = pnand %p6672_p10, %p6669_p9 }
  0x3f   : > { %6677 = shalt.err (!%p6674_p0)
}
  0x40   : > { %s6678_s14 = scalar_lea.vmem %s238_s21, 128  ;;  %p6686_p6 = scmp.lt.s32.totalorder %s238_s21, %s238_s21 }
  0x41   : > { %p6679_p1 = scmp.ne.s32.totalorder %s238_s21, %s6678_s14  ;;  %p6687_p7 = scmp.lt.s32.totalorder %s6678_s14, %s6678_s14 }
  0x43   : > { %p6681_p3 = pnand %p6679_p1, %p6986_p2  ;;  %p6688_p11 = por %p6687_p7, %p6686_p6 }
  0x45   : > { %p6682_p4 = pneg %p6681_p3 }
  0x47   : > { %p6689_p13 = pnand %p6688_p11, %p6682_p4 }
  0x49   : > { %6692 = shalt.err (!%p6689_p13)
}
  0x4a   : > { %6504 = dma.hbm_to_vmem [thread:$0]  (!%p6966_p12), %s7908_s2, 128, %s238_s21, [#allocation8]  }
  0x4b   : > { %s7894_s29 = sand.u32 1, %s6853_s26   ;;  %s6328_s9 = sshll.u32 %s6857_s27, 9 }
  0x4c   : > { %s5655_s19 = sshll.u32 %s7894_s29, 12  ;;  %s7030_s24 = scalar_lea.hbm %s7883_s3, %s6328_s9 }
  0x4d   : > { %s263_s30 = scalar_lea.vmem [#allocation9], %s5655_s19  ;;  %s6863_s14 = smov [#allocation11]  }
  0x4e   : > { %s270_s8 = sshll.u32 %s263_s30, 4  ;;  %s7034_s16 = sshll.u32 %s6863_s14, 4  ;;  %s7032_s8 = int_to_ptr.vmem [resolvable:$true] %s270_s8  ;;  %s249_s16 = int_to_ptr.vmem [resolvable:$true] %s7034_s16 }
  0x4f   : > { %s7909_s21 = sand.u32 1, %s6857_s27   ;;  %s6693_s29 = scalar_lea.hbm %s7030_s24, 65536 }
  0x50   : > { %s7038_s18 = scalar_lea.sflag [#allocation5], %s7909_s21  ;;  %p6694_p5 = scmp.ne.s32.totalorder %s7030_s24, %s6693_s29 }
  0x51   : > { %p7910_p8 = scmp.ne.s32.totalorder %s7905_s17, 0  ;;  %s6698_s19 = scalar_lea.hbm %s7883_s3, 131072 }
  0x52   : > { %p6699_p1 = scmp.lt.u32.totalorder %s7030_s24, %s7883_s3  ;;  %p6700_p3 = scmp.lt.u32.totalorder %s6698_s19, %s6693_s29 }
  0x53   : > { %p7896_p9 = pneg %p7910_p8  ;;  %p6702_p6 = scmp.lt.u32.totalorder %s6693_s29, %s7030_s24 }
  0x54   : > { %p6701_p4 = por %p6700_p3, %p6699_p1 }
  0x55   : > { %p6696_p10 = pnand %p7896_p9, %p6694_p5 }
  0x56   : > { %p6703_p7 = por %p6702_p6, %p6701_p4 }
  0x57   : > { %p6697_p0 = pneg %p6696_p10 }
  0x59   : > { %p6704_p11 = pnand %p6703_p7, %p6697_p0 }
  0x5b   : > { %6707 = shalt.err (!%p6704_p11)
}
  0x5c   : > { %s6708_s14 = scalar_lea.vmem %s7032_s8, 65536  ;;  %s6864_s21 = smov [#allocation9]  }
  0x5d   : > { %p6709_p13 = scmp.ne.s32.totalorder %s7032_s8, %s6708_s14  ;;  %s6713_s9 = sshll.u32 %s6864_s21, 4  ;;  %s6714_s9 = int_to_ptr.vmem [resolvable:$false] %s6713_s9 }
  0x5e   : > { %s6715_s20 = scalar_lea.vmem %s6714_s9, 131072  ;;  %p6716_p12 = scmp.lt.s32.totalorder %s7032_s8, %s6714_s9 }
  0x5f   : > { %p6711_p5 = pnand %p6709_p13, %p7896_p9  ;;  %p6717_p1 = scmp.lt.s32.totalorder %s6715_s20, %s6708_s14 }
  0x61   : > { %p6712_p10 = pneg %p6711_p5  ;;  %p6718_p3 = por %p6717_p1, %p6716_p12 }
  0x63   : > { %p6719_p4 = pnand %p6718_p3, %p6712_p10 }
  0x65   : > { %6722 = shalt.err (!%p6719_p4)
}
  0x66   : > { %s6865_s29 = smov 1024   ;;  %s7911_s19 = sand.u32 1, %s6853_s26  }
  0x67   : > { %6511 = dma.hbm_to_vmem [thread:$0]  (!%p7910_p8), %s7030_s24, 65536, %s7032_s8, %s7038_s18, %s6865_s29, %s6860_s10, %s6861_s13  }
  0x68   : > { %s5658_s22 = sshll.u32 %s7911_s19, 3  ;;  %s6723_s21 = scalar_lea.hbm %s7886_s6, 16 }
  0x69   : > { %p6724_p12 = scmp.ne.s32.totalorder %s7886_s6, %s6723_s21  ;;  %p6730_p7 = scmp.lt.u32.totalorder %s6723_s21, %s7886_s6 }
  0x6b   : > { %p6726_p0 = pnand %p6724_p12, %p6986_p2 }
  0x6d   : > { %p6727_p6 = pneg %p6726_p0 }
  0x6f   : > { %p6732_p11 = pnand %p6730_p7, %p6727_p6 }
  0x71   : > { %6735 = shalt.err (!%p6732_p11)
}
  0x72   : > { %s6736_s10 = scalar_lea.vmem %s249_s16, 16  ;;  %s6743_s13 = scalar_lea.vmem %s249_s16, 32 }
  0x73   : > { %p6737_p13 = scmp.ne.s32.totalorder %s249_s16, %s6736_s10  ;;  %p6744_p1 = scmp.lt.s32.totalorder %s249_s16, %s249_s16 }
  0x74   : > { %p6745_p3 = scmp.lt.s32.totalorder %s6743_s13, %s6736_s10 }
  0x75   : > { %p6739_p5 = pnand %p6737_p13, %p6986_p2 }
  0x76   : > { %p6746_p4 = por %p6745_p3, %p6744_p1 }
  0x77   : > { %p6740_p10 = pneg %p6739_p5 }
  0x79   : > { %p6747_p9 = pnand %p6746_p4, %p6740_p10 }
  0x7b   : > { %6750 = shalt.err (!%p6747_p9)
}
  0x7c   : > { %p7912_p12 = scmp.ne.s32.totalorder %s7904_s15, 0  ;;  %s6329_s1 = sshll.u32 %s6857_s27, 7 }
  0x7d   : > { %s7093_s23 = scalar_lea.hbm %s7884_s4, %s6329_s1  ;;  %s284_s19 = scalar_lea.vmem [#allocation10], %s5658_s22 }
  0x7e   : > { %6507 = dma.hbm_to_vmem [thread:$0]  (!%p7912_p12), %s7886_s6, 16, %s249_s16, [#allocation8]  }
  0x7f   : > { %s292_s30 = sshll.u32 %s284_s19, 4  ;;  %s6751_s15 = scalar_lea.hbm %s7093_s23, 128  ;;  %s293_s30 = int_to_ptr.vmem [resolvable:$true] %s292_s30 }
  0x80   : > { %p6752_p2 = scmp.ne.s32.totalorder %s7093_s23, %s6751_s15  ;;  %p7913_p9 = pneg %p7910_p8 }
  0x81   : > { %s6756_s14 = scalar_lea.hbm %s7884_s4, 256  ;;  %p6757_p7 = scmp.lt.u32.totalorder %s7093_s23, %s7884_s4 }
  0x82   : > { %p6754_p0 = pnand %p6752_p2, %p7913_p9  ;;  %p6758_p11 = scmp.lt.u32.totalorder %s6756_s14, %s6751_s15 }
  0x83   : > { %p6760_p5 = scmp.lt.u32.totalorder %s6751_s15, %s7093_s23 }
  0x84   : > { %p6755_p6 = pneg %p6754_p0  ;;  %p6759_p13 = por %p6758_p11, %p6757_p7 }
  0x86   : > { %p6761_p10 = por %p6760_p5, %p6759_p13 }
  0x88   : > { %p6762_p1 = pnand %p6761_p10, %p6755_p6 }
  0x8a   : > { %6765 = shalt.err (!%p6762_p1)
}
  0x8b   : > { %s6766_s22 = scalar_lea.vmem %s293_s30, 128  ;;  %p7914_p4 = pmov %p7913_p9 }
  0x8c   : > { %p6767_p3 = scmp.ne.s32.totalorder %s293_s30, %s6766_s22  ;;  %s6866_s20 = smov [#allocation10]  }
  0x8d   : > { %s6771_s10 = sshll.u32 %s6866_s20, 4  ;;  %s6772_s10 = int_to_ptr.vmem [resolvable:$false] %s6771_s10 }
  0x8e   : > { %p6769_p12 = pnand %p6767_p3, %p7914_p4  ;;  %s6773_s13 = scalar_lea.vmem %s6772_s10, 256 }
  0x8f   : > { %p6774_p9 = scmp.lt.s32.totalorder %s293_s30, %s6772_s10  ;;  %p6775_p0 = scmp.lt.s32.totalorder %s6773_s13, %s6766_s22 }
  0x90   : > { %p6770_p2 = pneg %p6769_p12 }
  0x91   : > { %p6776_p7 = por %p6775_p0, %p6774_p9 }
  0x93   : > { %p6777_p11 = pnand %p6776_p7, %p6770_p2 }
  0x95   : > { %6780 = shalt.err (!%p6777_p11)
}
  0x96   : > { %6514 = dma.hbm_to_vmem [thread:$0]  (!%p7910_p8), %s7093_s23, 128, %s293_s30, %s7038_s18  }
  0x97   : > { %p7915_p6 = scmp.ne.s32.totalorder %s7903_s12, 0 }
  0x98   : > { %p7916_p13 = scmp.eq.s32.totalorder (!%p7915_p6), %s6929_s28, 0 }
  0x99   : > { %310 = sbr.rel (%p7915_p6) target bundleno = 1457 (0x5b1), region = 48 }
  0xa0   : > { %6824 = dma.done.wait (%p7916_p13), [#allocation5], 8192   ;;  %p7917_p5 = pmov %p7916_p13 }
  0xa2   : > { %6826 = vsyncadd (%p7917_p5), [#allocation5], 4294959104  ;;  %p7918_p10 = pmov %p7917_p5 }
  0xa3   : > { %p7919_p1 = pmov %p7917_p5 }
  0xa4   : > { %6828 = dma.done.wait (%p7918_p10), [#allocation8], 128  }
  0xa5   : > { %6830 = vsyncadd (%p7919_p1), [#allocation8], 4294967168  ;;  %s320_s17 = sand.u32 1, %s6929_s28   ;;  %s322_s18 = sand.u32 1, %s6849_s25  }
  0xa6   : > { %s5664_s24 = sshll.u32 %s322_s18, 12  ;;  %s321_s12 = scalar_lea.sflag [#allocation5], %s320_s17 }
  0xa7   : > { %s7127_s8 = scalar_lea.vmem [#allocation9], %s5664_s24  ;;  %p7920_p8 = scmp.ne.s32.totalorder %s7902_s11, 0 }
  0xa9   : > { %6832 = dma.done.wait (%p7920_p8), %s321_s12, 65664  }
  0xaa   : > { %6834 = vsyncadd (%p7920_p8), %s321_s12, 4294901632  ;;  %s7133_s1 = sshll.u32 %s322_s18, 3  ;;  %p7921_p3 = pmov %p7919_p1 }
  0xab   : > { %s333_s2 = scalar_lea.vmem [#allocation10], %s7133_s1 }
  0xac   : > { %6836 = dma.done.wait (%p7921_p3), [#allocation8], 16   ;;  %p7922_p4 = pmov %p7919_p1 }
  0xad   : > { %s5667_s29 = sshll.u32 %s6929_s28, 7  ;;  %p7923_p2 = scmp.ne.s32.totalorder %s6929_s28, 0 }
  0xae   : > { %6838 = vsyncadd (%p7922_p4), [#allocation8], 4294967280  ;;  %p376_p12 = scmp.lt.s32.totalorder %s5667_s29, 255  ;;  %v387_v0 = vld [vmem:[#allocation4] sm:$0xff] (!%p7923_p2)  ;;  %v388_v2 = vld [vmem:[#allocation4 + $0x8] sm:$0xff] (!%p7923_p2)  ;;  %v6867_v8 = vmov (!%p7923_p2), 0  }
  0xaf   : > { %385 = sbr.rel (%p7923_p2) target bundleno = 462 (0x1ce), region = 72  ;;  %v391_v1 = vld [vmem:[#allocation4 + $0x20] sm:$0xff] (!%p7923_p2)  ;;  %v392_v4 = vld [vmem:[#allocation4 + $0x28] sm:$0xff] (!%p7923_p2)  ;;  %845 = vmatprep.mubr.bf16.mxu0 (!%p7923_p2), %v6867_v8  ;;  %886 = vmatprep.mubr.bf16.mxu1 (!%p7923_p2), %v6867_v8  ;;  %v389_v63 = vld [vmem:[#allocation4 + $0x10] sm:$0xff] (!%p7923_p2)  ;;  %vm1021_vm0 = vcmask (!%p7923_p2), 130048  }
  0xb0   : > { %s7930_s29 = smov (!%p376_p12, %s5667_s29), 255  ;;  %v5671_v3 = vcombine.high (!%p7923_p2), %v387_v0, %v391_v1  ;;  %v5670_v5 = vcombine.low (!%p7923_p2), %v387_v0, %v391_v1  ;;  %v395_v6 = vld [vmem:[#allocation4 + $0x40] sm:$0xff] (!%p7923_p2)  ;;  %v5673_v9 = vcombine.high (!%p7923_p2), %v388_v2, %v392_v4  ;;  %v5672_v10 = vcombine.low (!%p7923_p2), %v388_v2, %v392_v4  ;;  %v396_v12 = vld [vmem:[#allocation4 + $0x48] sm:$0xff] (!%p7923_p2)  ;;  %v393_v0 = vld [vmem:[#allocation4 + $0x30] sm:$0xff] (!%p7923_p2) }
  0xb1   : > { %s5668_s23 = sshll.u32 %s7930_s29, 2  ;;  %v399_v7 = vld [vmem:[#allocation4 + $0x60] sm:$0xff] (!%p7923_p2)  ;;  %v400_v13 = vld [vmem:[#allocation4 + $0x68] sm:$0xff] (!%p7923_p2)  ;;  %v390_v1 = vld [vmem:[#allocation4 + $0x18] sm:$0xff] (!%p7923_p2) }
  0xb2   : > { %s7144_s11 = scalar_lea.vmem %s7885_s5, %s5668_s23  ;;  %v5679_v11 = vcombine.high (!%p7923_p2), %v395_v6, %v399_v7  ;;  %v403_v14 = vld [vmem:[#allocation4 + $0x80] sm:$0xff] (!%p7923_p2)  ;;  %813 = vmatprep.subr.bf16.mxu0 (!%p7923_p2), %v5671_v3  ;;  %v5681_v15 = vcombine.high (!%p7923_p2), %v396_v12, %v400_v13  ;;  %v404_v17 = vld [vmem:[#allocation4 + $0x88] sm:$0xff] (!%p7923_p2)  ;;  %854 = vmatprep.subr.bf16.mxu1 (!%p7923_p2), %v5673_v9  ;;  %v5678_v19 = vcombine.low (!%p7923_p2), %v395_v6, %v399_v7  ;;  %v394_v2 = vld [vmem:[#allocation4 + $0x38] sm:$0xff] (!%p7923_p2) }
  0xb3   : > { %v407_v16 = vld [vmem:[#allocation4 + $0xa0] sm:$0xff] (!%p7923_p2)  ;;  %v408_v18 = vld [vmem:[#allocation4 + $0xa8] sm:$0xff] (!%p7923_p2)  ;;  %814 = vmatpush1.bf16.msra.mxu0 (!%p7923_p2), %v5670_v5  ;;  %855 = vmatpush1.bf16.msra.mxu1 (!%p7923_p2), %v5672_v10  ;;  %v5680_v20 = vcombine.low (!%p7923_p2), %v396_v12, %v400_v13  ;;  %v5675_v5 = vcombine.high (!%p7923_p2), %v389_v63, %v393_v0  ;;  %v5677_v6 = vcombine.high (!%p7923_p2), %v390_v1, %v394_v2  ;;  %v397_v7 = vld [vmem:[#allocation4 + $0x50] sm:$0xff] (!%p7923_p2) }
  0xb4   : > { %815 = vmatprep.subr.bf16.mxu0 (!%p7923_p2), %v5679_v11  ;;  %v5687_v21 = vcombine.high (!%p7923_p2), %v403_v14, %v407_v16  ;;  %856 = vmatprep.subr.bf16.mxu1 (!%p7923_p2), %v5681_v15  ;;  %v5689_v22 = vcombine.high (!%p7923_p2), %v404_v17, %v408_v18  ;;  %v411_v23 = vld [vmem:[#allocation4 + $0xc0] sm:$0xff] (!%p7923_p2)  ;;  %v412_v25 = vld [vmem:[#allocation4 + $0xc8] sm:$0xff] (!%p7923_p2)  ;;  %v5686_v27 = vcombine.low (!%p7923_p2), %v403_v14, %v407_v16  ;;  %v401_v9 = vld [vmem:[#allocation4 + $0x70] sm:$0xff] (!%p7923_p2) }
  0xb5   : > { %v415_v24 = vld [vmem:[#allocation4 + $0xe0] sm:$0xff] (!%p7923_p2)  ;;  %v416_v26 = vld [vmem:[#allocation4 + $0xe8] sm:$0xff] (!%p7923_p2)  ;;  %v5688_v28 = vcombine.low (!%p7923_p2), %v404_v17, %v408_v18  ;;  %v398_v10 = vld [vmem:[#allocation4 + $0x58] sm:$0xff] (!%p7923_p2)  ;;  %v5674_v13 = vcombine.low (!%p7923_p2), %v389_v63, %v393_v0  ;;  %v5676_v14 = vcombine.low (!%p7923_p2), %v390_v1, %v394_v2  ;;  %v5683_v15 = vcombine.high (!%p7923_p2), %v397_v7, %v401_v9 }
  0xb6   : > { %v5695_v29 = vcombine.high %v411_v23, %v415_v24  ;;  %v5697_v30 = vcombine.high %v412_v25, %v416_v26  ;;  %v419_v31 = vld [vmem:[#allocation4 + $0x100] sm:$0xff]  ;;  %v420_v33 = vld [vmem:[#allocation4 + $0x108] sm:$0xff]  ;;  %v5694_v35 = vcombine.low %v411_v23, %v415_v24  ;;  %v5696_v36 = vcombine.low %v412_v25, %v416_v26  ;;  %v402_v11 = vld [vmem:[#allocation4 + $0x78] sm:$0xff] }
  0xb7   : > { %816 = vmatpush1.bf16.msra.mxu0 %v5678_v19  ;;  %857 = vmatpush1.bf16.msra.mxu1 %v5680_v20  ;;  %v423_v32 = vld [vmem:[#allocation4 + $0x120] sm:$0xff]  ;;  %v424_v34 = vld [vmem:[#allocation4 + $0x128] sm:$0xff]  ;;  %v7153_v12 = vld [vmem:[%s7880_s0] sm:$0xf]  ;;  %v5685_v16 = vcombine.high %v398_v10, %v402_v11  ;;  %v6868_v2 = vmov 0.0  }
  0xb8   : > { %817 = vmatprep.subr.bf16.mxu0 %v5687_v21  ;;  %858 = vmatprep.subr.bf16.mxu1 %v5689_v22  ;;  %v5703_v37 = vcombine.high %v419_v31, %v423_v32  ;;  %v5705_v38 = vcombine.high %v420_v33, %v424_v34  ;;  %v427_v39 = vld [vmem:[#allocation4 + $0x140] sm:$0xff]  ;;  %v428_v41 = vld [vmem:[#allocation4 + $0x148] sm:$0xff]  ;;  %v5702_v43 = vcombine.low %v419_v31, %v423_v32  ;;  %v405_v17 = vld [vmem:[#allocation4 + $0x90] sm:$0xff] }
  0xb9   : > { %v431_v40 = vld [vmem:[#allocation4 + $0x160] sm:$0xff]  ;;  %v432_v42 = vld [vmem:[#allocation4 + $0x168] sm:$0xff]  ;;  %v5704_v44 = vcombine.low %v420_v33, %v424_v34  ;;  %v409_v18 = vld [vmem:[#allocation4 + $0xb0] sm:$0xff]  ;;  %v5682_v21 = vcombine.low %v397_v7, %v401_v9  ;;  %v5684_v22 = vcombine.low %v398_v10, %v402_v11  ;;  %1022 = vst.msk [vmem:[#allocation3] sm:$0xff] %vm1021_vm0, %v6868_v2 }
  0xba   : > { %v5711_v45 = vcombine.high %v427_v39, %v431_v40  ;;  %v5713_v46 = vcombine.high %v428_v41, %v432_v42  ;;  %v435_v47 = vld [vmem:[#allocation4 + $0x180] sm:$0xff]  ;;  %v436_v49 = vld [vmem:[#allocation4 + $0x188] sm:$0xff]  ;;  %v5710_v51 = vcombine.low %v427_v39, %v431_v40  ;;  %v5712_v52 = vcombine.low %v428_v41, %v432_v42  ;;  %v406_v19 = vld [vmem:[#allocation4 + $0x98] sm:$0xff] }
  0xbb   : > { %818 = vmatpush1.bf16.msra.mxu0 %v5686_v27  ;;  %859 = vmatpush1.bf16.msra.mxu1 %v5688_v28  ;;  %v439_v48 = vld [vmem:[#allocation4 + $0x1a0] sm:$0xff]  ;;  %v440_v50 = vld [vmem:[#allocation4 + $0x1a8] sm:$0xff]  ;;  %v410_v20 = vld [vmem:[#allocation4 + $0xb8] sm:$0xff]  ;;  %v5691_v23 = vcombine.high %v405_v17, %v409_v18 }
  0xbc   : > { %819 = vmatprep.subr.bf16.mxu0 %v5695_v29  ;;  %860 = vmatprep.subr.bf16.mxu1 %v5697_v30  ;;  %v5719_v53 = vcombine.high %v435_v47, %v439_v48  ;;  %v5721_v54 = vcombine.high %v436_v49, %v440_v50  ;;  %v443_v55 = vld [vmem:[#allocation4 + $0x1c0] sm:$0xff]  ;;  %v444_v57 = vld [vmem:[#allocation4 + $0x1c8] sm:$0xff]  ;;  %v5718_v59 = vcombine.low %v435_v47, %v439_v48  ;;  %v413_v25 = vld [vmem:[#allocation4 + $0xd0] sm:$0xff] }
  0xbd   : > { %v447_v56 = vld [vmem:[#allocation4 + $0x1e0] sm:$0xff]  ;;  %v448_v58 = vld [vmem:[#allocation4 + $0x1e8] sm:$0xff]  ;;  %v5720_v60 = vcombine.low %v436_v49, %v440_v50  ;;  %v5693_v24 = vcombine.high %v406_v19, %v410_v20  ;;  %v417_v26 = vld [vmem:[#allocation4 + $0xf0] sm:$0xff]  ;;  %v5690_v29 = vcombine.low %v405_v17, %v409_v18  ;;  %v5692_v30 = vcombine.low %v406_v19, %v410_v20 }
  0xbe   : > { %v5727_v61 = vcombine.high %v443_v55, %v447_v56  ;;  %v5729_v62 = vcombine.high %v444_v57, %v448_v58  ;;  %v5726_v3 = vcombine.low %v443_v55, %v447_v56  ;;  %v5728_v4 = vcombine.low %v444_v57, %v448_v58  ;;  %v414_v27 = vld [vmem:[#allocation4 + $0xd8] sm:$0xff]  ;;  %v421_v33 = vld [vmem:[#allocation4 + $0x110] sm:$0xff] }
  0xbf   : > { %820 = vmatpush1.bf16.msra.mxu0 %v5694_v35  ;;  %861 = vmatpush1.bf16.msra.mxu1 %v5696_v36  ;;  %v418_v28 = vld [vmem:[#allocation4 + $0xf8] sm:$0xff]  ;;  %v5699_v31 = vcombine.high %v413_v25, %v417_v26  ;;  %v425_v34 = vld [vmem:[#allocation4 + $0x130] sm:$0xff] }
  0xc0   : > { %821 = vmatprep.subr.bf16.mxu0 %v5703_v37  ;;  %862 = vmatprep.subr.bf16.mxu1 %v5705_v38  ;;  %v5701_v32 = vcombine.high %v414_v27, %v418_v28  ;;  %v422_v35 = vld [vmem:[#allocation4 + $0x118] sm:$0xff]  ;;  %v5698_v37 = vcombine.low %v413_v25, %v417_v26  ;;  %v5700_v38 = vcombine.low %v414_v27, %v418_v28  ;;  %v429_v40 = vld [vmem:[#allocation4 + $0x150] sm:$0xff] }
  0xc1   : > { %v426_v36 = vld [vmem:[#allocation4 + $0x138] sm:$0xff]  ;;  %v5707_v39 = vcombine.high %v421_v33, %v425_v34  ;;  %v433_v41 = vld [vmem:[#allocation4 + $0x170] sm:$0xff] }
  0xc2   : > { %v430_v42 = vld [vmem:[#allocation4 + $0x158] sm:$0xff]  ;;  %v437_v48 = vld [vmem:[#allocation4 + $0x190] sm:$0xff] }
  0xc3   : > { %822 = vmatpush1.bf16.msra.mxu0 %v5702_v43  ;;  %863 = vmatpush1.bf16.msra.mxu1 %v5704_v44  ;;  %v434_v43 = vld [vmem:[#allocation4 + $0x178] sm:$0xff]  ;;  %v5706_v44 = vcombine.low %v421_v33, %v425_v34  ;;  %v441_v49 = vld [vmem:[#allocation4 + $0x1b0] sm:$0xff] }
  0xc4   : > { %823 = vmatprep.subr.bf16.mxu0 %v5711_v45  ;;  %864 = vmatprep.subr.bf16.mxu1 %v5713_v46  ;;  %v5708_v45 = vcombine.low %v422_v35, %v426_v36  ;;  %v5715_v46 = vcombine.high %v429_v40, %v433_v41  ;;  %v5717_v47 = vcombine.high %v430_v42, %v434_v43  ;;  %v438_v50 = vld [vmem:[#allocation4 + $0x198] sm:$0xff]  ;;  %v445_v56 = vld [vmem:[#allocation4 + $0x1d0] sm:$0xff] }
  0xc5   : > { %v449_v57 = vld [vmem:[#allocation4 + $0x1f0] sm:$0xff]  ;;  %v446_v58 = vld [vmem:[#allocation4 + $0x1d8] sm:$0xff] }
  0xc6   : > { %v5730_v0 = vcombine.low %v445_v56, %v449_v57 }
  0xc7   : > { %824 = vmatpush1.bf16.msra.mxu0 %v5710_v51  ;;  %865 = vmatpush1.bf16.msra.mxu1 %v5712_v52  ;;  %v442_v51 = vld [vmem:[#allocation4 + $0x1b8] sm:$0xff]  ;;  %v5714_v52 = vcombine.low %v429_v40, %v433_v41 }
  0xc8   : > { %825 = vmatprep.subr.bf16.mxu0 %v5719_v53  ;;  %866 = vmatprep.subr.bf16.mxu1 %v5721_v54  ;;  %v5716_v53 = vcombine.low %v430_v42, %v434_v43  ;;  %v5723_v54 = vcombine.high %v437_v48, %v441_v49  ;;  %v5725_v55 = vcombine.high %v438_v50, %v442_v51 }
  0xcb   : > { %826 = vmatpush1.bf16.msra.mxu0 %v5718_v59  ;;  %867 = vmatpush1.bf16.msra.mxu1 %v5720_v60  ;;  %v450_v59 = vld [vmem:[#allocation4 + $0x1f8] sm:$0xff]  ;;  %v5722_v60 = vcombine.low %v437_v48, %v441_v49 }
  0xcc   : > { %827 = vmatprep.subr.bf16.mxu0 %v5727_v61  ;;  %868 = vmatprep.subr.bf16.mxu1 %v5729_v62  ;;  %v5724_v61 = vcombine.low %v438_v50, %v442_v51  ;;  %v5731_v62 = vcombine.high %v445_v56, %v449_v57  ;;  %v5733_v63 = vcombine.high %v446_v58, %v450_v59 }
  0xcd   : > { %v5732_v1 = vcombine.low %v446_v58, %v450_v59 }
  0xcf   : > { %828 = vmatpush1.bf16.msra.mxu0 %v5726_v3  ;;  %869 = vmatpush1.bf16.msra.mxu1 %v5728_v4  ;;  %v453_v3 = vlaneseq }
  0xd0   : > { %895 = vmatprep.subr.bf16.mxu0 %v5675_v5  ;;  %936 = vmatprep.subr.bf16.mxu1 %v5677_v6  ;;  %v451_v6 = vld [vmem:[#allocation7] sm:$0xff] }
  0xd1   : > { %v454_v4 = vshrl.u32 %v453_v3, 7 }
  0xd2   : > { %846 = vmatmul.mubr.bf16.vlgmr.msra.gmra.mrb[0].mxu0 %v7153_v12  ;;  %887 = vmatmul.mubr.bf16.vlgmr.msra.gmra.mrb[0].mxu1 %v7153_v12 }
  0xd3   : > { %896 = vmatpush1.bf16.msra.mxu0 %v5674_v13  ;;  %937 = vmatpush1.bf16.msra.mxu1 %v5676_v14  ;;  %v455_v5 = vsub.s32 0, %v454_v4  ;;  %v463_v7 = vsub.s32 2, %v454_v4  ;;  %v459_v9 = vsub.s32 1, %v454_v4  ;;  %v467_v10 = vsub.s32 3, %v454_v4 }
  0xd4   : > { %897 = vmatprep.subr.bf16.mxu0 %v5683_v15  ;;  %938 = vmatprep.subr.bf16.mxu1 %v5685_v16  ;;  %v471_v33 = vsub.s32 4, %v454_v4  ;;  %v479_v34 = vsub.s32 6, %v454_v4 }
  0xd5   : > { %927 = vmatprep.mubr.bf16.mxu0 %v6867_v8  ;;  %968 = vmatprep.mubr.bf16.mxu1 %v6867_v8  ;;  %v5709_v8 = vcombine.high %v422_v35, %v426_v36  ;;  %v456_v11 = vrot.slane %v451_v6, %v455_v5  ;;  %v464_v13 = vrot.slane %v451_v6, %v463_v7  ;;  %v475_v35 = vsub.s32 5, %v454_v4 }
  0xd6   : > { %v460_v14 = vrot.slane %v451_v6, %v459_v9  ;;  %v468_v15 = vrot.slane %v451_v6, %v467_v10  ;;  %v483_v36 = vsub.s32 7, %v454_v4 }
  0xd7   : > { %898 = vmatpush1.bf16.msra.mxu0 %v5682_v21  ;;  %939 = vmatpush1.bf16.msra.mxu1 %v5684_v22 }
  0xd8   : > { %899 = vmatprep.subr.bf16.mxu0 %v5691_v23  ;;  %940 = vmatprep.subr.bf16.mxu1 %v5693_v24 }
  0xdb   : > { %900 = vmatpush1.bf16.msra.mxu0 %v5690_v29  ;;  %941 = vmatpush1.bf16.msra.mxu1 %v5692_v30 }
  0xdc   : > { %901 = vmatprep.subr.bf16.mxu0 %v5699_v31  ;;  %942 = vmatprep.subr.bf16.mxu1 %v5701_v32 }
  0xdf   : > { %902 = vmatpush1.bf16.msra.mxu0 %v5698_v37  ;;  %943 = vmatpush1.bf16.msra.mxu1 %v5700_v38  ;;  %v472_v37 = vrot.slane %v451_v6, %v471_v33  ;;  %v480_v38 = vrot.slane %v451_v6, %v479_v34 }
  0xe0   : > { %903 = vmatprep.subr.bf16.mxu0 %v5707_v39  ;;  %944 = vmatprep.subr.bf16.mxu1 %v5709_v8  ;;  %v476_v39 = vrot.slane %v451_v6, %v475_v35  ;;  %v484_v8 = vrot.slane %v451_v6, %v483_v36 }
  0xe3   : > { %904 = vmatpush1.bf16.msra.mxu0 %v5706_v44  ;;  %945 = vmatpush1.bf16.msra.mxu1 %v5708_v45 }
  0xe4   : > { %905 = vmatprep.subr.bf16.mxu0 %v5715_v46  ;;  %946 = vmatprep.subr.bf16.mxu1 %v5717_v47 }
  0xe7   : > { %906 = vmatpush1.bf16.msra.mxu0 %v5714_v52  ;;  %947 = vmatpush1.bf16.msra.mxu1 %v5716_v53 }
  0xe8   : > { %907 = vmatprep.subr.bf16.mxu0 %v5723_v54  ;;  %948 = vmatprep.subr.bf16.mxu1 %v5725_v55 }
  0xeb   : > { %908 = vmatpush1.bf16.msra.mxu0 %v5722_v60  ;;  %949 = vmatpush1.bf16.msra.mxu1 %v5724_v61 }
  0xec   : > { %909 = vmatprep.subr.bf16.mxu0 %v5731_v62  ;;  %950 = vmatprep.subr.bf16.mxu1 %v5733_v63 }
  0xef   : > { %910 = vmatpush1.bf16.msra.mxu0 %v5730_v0  ;;  %951 = vmatpush1.bf16.msra.mxu1 %v5732_v1 }
  0xf2   : > { %928 = vmatmul.mubr.bf16.vlgmr.msra.gmra.mrb[4].mxu0 %v7153_v12  ;;  %969 = vmatmul.mubr.bf16.vlgmr.msra.gmra.mrb[4].mxu1 %v7153_v12 }
 0x1a5   : > { %v847_v16 = vpop.f32.mrb[0].mxu0  ;;  %v888_v18 = vpop.f32.mrb[0].mxu1 }
 0x1a6   : > { %v848_v17 = vadd.f32 %v847_v16, %v456_v11  ;;  %v849_v19 = vpop.f32.mrb[1].mxu0  ;;  %v889_v20 = vadd.f32 %v888_v18, %v464_v13  ;;  %v890_v21 = vpop.f32.mrb[1].mxu1 }
 0x1a7   : > { %v850_v12 = vadd.f32 %v849_v19, %v460_v14  ;;  %v851_v22 = vpop.f32.mrb[2].mxu0  ;;  %v891_v24 = vadd.f32 %v890_v21, %v468_v15  ;;  %v892_v25 = vpop.f32.mrb[2].mxu1 }
 0x1a8   : > { %v977_v23 = vmax.f32 %v848_v17, 0.0  ;;  %v852_v26 = vpop.f32.mrb[3].mxu0  ;;  %v979_v27 = vmax.f32 %v889_v20, 0.0  ;;  %v893_v29 = vpop.f32.mrb[3].mxu1 }
 0x1a9   : > { %v978_v28 = vmax.f32 %v850_v12, 0.0  ;;  %v980_v30 = vmax.f32 %v891_v24, 0.0 }
 0x1ab   : > { %v6330_v31 = vpack.c.bf16 %v978_v28, %v977_v23  ;;  %v6331_v32 = vpack.c.bf16 %v980_v30, %v979_v27 }
 0x1ad   : > { %1017 = vst [vmem:[#allocation2] sm:$0xff] %v6330_v31  ;;  %1018 = vst [vmem:[#allocation2 + $0x8] sm:$0xff] %v6331_v32 }
 0x1c5   : > { %v929_v40 = vpop.f32.mrb[4].mxu0  ;;  %v970_v42 = vpop.f32.mrb[4].mxu1 }
 0x1c6   : > { %v930_v41 = vadd.f32 %v929_v40, %v472_v37  ;;  %v931_v43 = vpop.f32.mrb[5].mxu0  ;;  %v971_v44 = vadd.f32 %v970_v42, %v480_v38  ;;  %v972_v46 = vpop.f32.mrb[5].mxu1 }
 0x1c7   : > { %v932_v45 = vadd.f32 %v931_v43, %v476_v39  ;;  %v933_v47 = vpop.f32.mrb[6].mxu0  ;;  %v973_v49 = vadd.f32 %v972_v46, %v484_v8  ;;  %v974_v50 = vpop.f32.mrb[6].mxu1 }
 0x1c8   : > { %v981_v48 = vmax.f32 %v930_v41, 0.0  ;;  %v934_v51 = vpop.f32.mrb[7].mxu0  ;;  %v983_v52 = vmax.f32 %v971_v44, 0.0  ;;  %v975_v54 = vpop.f32.mrb[7].mxu1 }
 0x1c9   : > { %v982_v53 = vmax.f32 %v932_v45, 0.0  ;;  %v984_v55 = vmax.f32 %v973_v49, 0.0 }
 0x1cb   : > { %v6332_v56 = vpack.c.bf16 %v982_v53, %v981_v48  ;;  %v6333_v57 = vpack.c.bf16 %v984_v55, %v983_v52 }
 0x1cd   : > { %1019 = vst [vmem:[#allocation2 + $0x10] sm:$0xff] %v6332_v56  ;;  %1020 = vst [vmem:[#allocation2 + $0x18] sm:$0xff] %v6333_v57 }
 0x1ce PF: > { %v1027_v58 = vld [vmem:[%s7127_s8] sm:$0xff]  ;;  %v1028_v60 = vld [vmem:[%s7127_s8 + $0x8] sm:$0xff]  ;;  %v7189_v47 = vld [vmem:[#allocation2] sm:$0xff]  ;;  %vm5515_vm1 = vcmask 130048   ;;  %p6322_p9 = scmp.ne.s32.totalorder %s6929_s28, 1 }
 0x1cf   : > { %v1031_v59 = vld [vmem:[%s7127_s8 + $0x20] sm:$0xff]  ;;  %v1032_v62 = vld [vmem:[%s7127_s8 + $0x28] sm:$0xff]  ;;  %v7195_v51 = vcombine.high %v7189_v47, %v7189_v47 }
 0x1d0   : > { %v5747_v61 = vcombine.high %v1027_v58, %v1031_v59  ;;  %v5746_v63 = vcombine.low %v1027_v58, %v1031_v59  ;;  %v1035_v0 = vld [vmem:[%s7127_s8 + $0x40] sm:$0xff]  ;;  %v5749_v2 = vcombine.high %v1028_v60, %v1032_v62  ;;  %v5748_v3 = vcombine.low %v1028_v60, %v1032_v62  ;;  %v1036_v5 = vld [vmem:[%s7127_s8 + $0x48] sm:$0xff] }
 0x1d1   : > { %v1039_v1 = vld [vmem:[%s7127_s8 + $0x60] sm:$0xff]  ;;  %v1040_v6 = vld [vmem:[%s7127_s8 + $0x68] sm:$0xff]  ;;  %4201 = vmatprep.mubr.bf16.mxu0 %v7195_v51  ;;  %4365 = vmatprep.mubr.bf16.mxu1 %v7195_v51 }
 0x1d2   : > { %v5755_v4 = vcombine.high %v1035_v0, %v1039_v1  ;;  %v1043_v7 = vld [vmem:[%s7127_s8 + $0x80] sm:$0xff]  ;;  %4169 = vmatprep.subr.bf16.mxu0 %v5747_v61  ;;  %v5757_v9 = vcombine.high %v1036_v5, %v1040_v6  ;;  %v1044_v11 = vld [vmem:[%s7127_s8 + $0x88] sm:$0xff]  ;;  %4333 = vmatprep.subr.bf16.mxu1 %v5749_v2  ;;  %v5754_v14 = vcombine.low %v1035_v0, %v1039_v1 }
 0x1d3   : > { %v1047_v10 = vld [vmem:[%s7127_s8 + $0xa0] sm:$0xff]  ;;  %v1048_v13 = vld [vmem:[%s7127_s8 + $0xa8] sm:$0xff]  ;;  %4170 = vmatpush1.bf16.msra.mxu0 %v5746_v63  ;;  %4334 = vmatpush1.bf16.msra.mxu1 %v5748_v3  ;;  %v5756_v15 = vcombine.low %v1036_v5, %v1040_v6 }
 0x1d4   : > { %4171 = vmatprep.subr.bf16.mxu0 %v5755_v4  ;;  %v5763_v16 = vcombine.high %v1043_v7, %v1047_v10  ;;  %4335 = vmatprep.subr.bf16.mxu1 %v5757_v9  ;;  %v5765_v17 = vcombine.high %v1044_v11, %v1048_v13  ;;  %v1051_v18 = vld [vmem:[%s7127_s8 + $0xc0] sm:$0xff]  ;;  %v1052_v20 = vld [vmem:[%s7127_s8 + $0xc8] sm:$0xff]  ;;  %v5762_v21 = vcombine.low %v1043_v7, %v1047_v10 }
 0x1d5   : > { %v1055_v19 = vld [vmem:[%s7127_s8 + $0xe0] sm:$0xff]  ;;  %v1056_v12 = vld [vmem:[%s7127_s8 + $0xe8] sm:$0xff]  ;;  %v5764_v22 = vcombine.low %v1044_v11, %v1048_v13 }
 0x1d6   : > { %v5771_v23 = vcombine.high %v1051_v18, %v1055_v19  ;;  %v5773_v24 = vcombine.high %v1052_v20, %v1056_v12  ;;  %v1059_v25 = vld [vmem:[%s7127_s8 + $0x100] sm:$0xff]  ;;  %v1060_v27 = vld [vmem:[%s7127_s8 + $0x108] sm:$0xff]  ;;  %v5770_v29 = vcombine.low %v1051_v18, %v1055_v19  ;;  %v5772_v30 = vcombine.low %v1052_v20, %v1056_v12 }
 0x1d7   : > { %4172 = vmatpush1.bf16.msra.mxu0 %v5754_v14  ;;  %4336 = vmatpush1.bf16.msra.mxu1 %v5756_v15  ;;  %v1063_v26 = vld [vmem:[%s7127_s8 + $0x120] sm:$0xff]  ;;  %v1064_v28 = vld [vmem:[%s7127_s8 + $0x128] sm:$0xff] }
 0x1d8   : > { %4173 = vmatprep.subr.bf16.mxu0 %v5763_v16  ;;  %4337 = vmatprep.subr.bf16.mxu1 %v5765_v17  ;;  %v5779_v31 = vcombine.high %v1059_v25, %v1063_v26  ;;  %v5781_v32 = vcombine.high %v1060_v27, %v1064_v28  ;;  %v1067_v33 = vld [vmem:[%s7127_s8 + $0x140] sm:$0xff]  ;;  %v1068_v35 = vld [vmem:[%s7127_s8 + $0x148] sm:$0xff]  ;;  %v5778_v37 = vcombine.low %v1059_v25, %v1063_v26 }
 0x1d9   : > { %v1071_v34 = vld [vmem:[%s7127_s8 + $0x160] sm:$0xff]  ;;  %v1072_v36 = vld [vmem:[%s7127_s8 + $0x168] sm:$0xff]  ;;  %v5780_v38 = vcombine.low %v1060_v27, %v1064_v28 }
 0x1da   : > { %v5787_v39 = vcombine.high %v1067_v33, %v1071_v34  ;;  %v5789_v8 = vcombine.high %v1068_v35, %v1072_v36  ;;  %v1075_v40 = vld [vmem:[%s7127_s8 + $0x180] sm:$0xff]  ;;  %v1076_v42 = vld [vmem:[%s7127_s8 + $0x188] sm:$0xff]  ;;  %v5786_v44 = vcombine.low %v1067_v33, %v1071_v34  ;;  %v5788_v45 = vcombine.low %v1068_v35, %v1072_v36 }
 0x1db   : > { %4174 = vmatpush1.bf16.msra.mxu0 %v5762_v21  ;;  %4338 = vmatpush1.bf16.msra.mxu1 %v5764_v22  ;;  %v1079_v41 = vld [vmem:[%s7127_s8 + $0x1a0] sm:$0xff]  ;;  %v1080_v43 = vld [vmem:[%s7127_s8 + $0x1a8] sm:$0xff] }
 0x1dc   : > { %4175 = vmatprep.subr.bf16.mxu0 %v5771_v23  ;;  %4339 = vmatprep.subr.bf16.mxu1 %v5773_v24  ;;  %v5795_v46 = vcombine.high %v1075_v40, %v1079_v41  ;;  %v5797_v48 = vcombine.high %v1076_v42, %v1080_v43  ;;  %v1083_v49 = vld [vmem:[%s7127_s8 + $0x1c0] sm:$0xff]  ;;  %v1084_v52 = vld [vmem:[%s7127_s8 + $0x1c8] sm:$0xff]  ;;  %v5794_v54 = vcombine.low %v1075_v40, %v1079_v41 }
 0x1dd   : > { %v1087_v50 = vld [vmem:[%s7127_s8 + $0x1e0] sm:$0xff]  ;;  %v1088_v53 = vld [vmem:[%s7127_s8 + $0x1e8] sm:$0xff]  ;;  %v5796_v55 = vcombine.low %v1076_v42, %v1080_v43 }
 0x1de   : > { %v5803_v56 = vcombine.high %v1083_v49, %v1087_v50  ;;  %v5805_v57 = vcombine.high %v1084_v52, %v1088_v53  ;;  %v1091_v58 = vld [vmem:[%s7127_s8 + $0x200] sm:$0xff]  ;;  %v1092_v60 = vld [vmem:[%s7127_s8 + $0x208] sm:$0xff]  ;;  %v5802_v62 = vcombine.low %v1083_v49, %v1087_v50  ;;  %v5804_v63 = vcombine.low %v1084_v52, %v1088_v53 }
 0x1df   : > { %4176 = vmatpush1.bf16.msra.mxu0 %v5770_v29  ;;  %4340 = vmatpush1.bf16.msra.mxu1 %v5772_v30  ;;  %v1095_v59 = vld [vmem:[%s7127_s8 + $0x220] sm:$0xff]  ;;  %v1096_v61 = vld [vmem:[%s7127_s8 + $0x228] sm:$0xff] }
 0x1e0   : > { %4177 = vmatprep.subr.bf16.mxu0 %v5779_v31  ;;  %4341 = vmatprep.subr.bf16.mxu1 %v5781_v32  ;;  %v5811_v0 = vcombine.high %v1091_v58, %v1095_v59  ;;  %v5813_v1 = vcombine.high %v1092_v60, %v1096_v61  ;;  %v1099_v2 = vld [vmem:[%s7127_s8 + $0x240] sm:$0xff]  ;;  %v1100_v4 = vld [vmem:[%s7127_s8 + $0x248] sm:$0xff]  ;;  %v5810_v6 = vcombine.low %v1091_v58, %v1095_v59 }
 0x1e1   : > { %v1103_v3 = vld [vmem:[%s7127_s8 + $0x260] sm:$0xff]  ;;  %v1104_v5 = vld [vmem:[%s7127_s8 + $0x268] sm:$0xff]  ;;  %v5812_v7 = vcombine.low %v1092_v60, %v1096_v61 }
 0x1e2   : > { %v5819_v9 = vcombine.high %v1099_v2, %v1103_v3  ;;  %v5821_v10 = vcombine.high %v1100_v4, %v1104_v5  ;;  %v1107_v11 = vld [vmem:[%s7127_s8 + $0x280] sm:$0xff]  ;;  %v1108_v14 = vld [vmem:[%s7127_s8 + $0x288] sm:$0xff]  ;;  %v5818_v16 = vcombine.low %v1099_v2, %v1103_v3  ;;  %v5820_v17 = vcombine.low %v1100_v4, %v1104_v5 }
 0x1e3   : > { %4178 = vmatpush1.bf16.msra.mxu0 %v5778_v37  ;;  %4342 = vmatpush1.bf16.msra.mxu1 %v5780_v38  ;;  %v1111_v13 = vld [vmem:[%s7127_s8 + $0x2a0] sm:$0xff]  ;;  %v1112_v15 = vld [vmem:[%s7127_s8 + $0x2a8] sm:$0xff] }
 0x1e4   : > { %4179 = vmatprep.subr.bf16.mxu0 %v5787_v39  ;;  %4343 = vmatprep.subr.bf16.mxu1 %v5789_v8  ;;  %v5827_v18 = vcombine.high %v1107_v11, %v1111_v13  ;;  %v5829_v19 = vcombine.high %v1108_v14, %v1112_v15  ;;  %v1115_v20 = vld [vmem:[%s7127_s8 + $0x2c0] sm:$0xff]  ;;  %v1116_v21 = vld [vmem:[%s7127_s8 + $0x2c8] sm:$0xff]  ;;  %v5826_v23 = vcombine.low %v1107_v11, %v1111_v13 }
 0x1e5   : > { %v1119_v12 = vld [vmem:[%s7127_s8 + $0x2e0] sm:$0xff]  ;;  %v1120_v22 = vld [vmem:[%s7127_s8 + $0x2e8] sm:$0xff]  ;;  %v5828_v24 = vcombine.low %v1108_v14, %v1112_v15 }
 0x1e6   : > { %v5835_v25 = vcombine.high %v1115_v20, %v1119_v12  ;;  %v5837_v26 = vcombine.high %v1116_v21, %v1120_v22  ;;  %v1123_v27 = vld [vmem:[%s7127_s8 + $0x300] sm:$0xff]  ;;  %v1124_v29 = vld [vmem:[%s7127_s8 + $0x308] sm:$0xff]  ;;  %v5834_v31 = vcombine.low %v1115_v20, %v1119_v12  ;;  %v5836_v32 = vcombine.low %v1116_v21, %v1120_v22 }
 0x1e7   : > { %4180 = vmatpush1.bf16.msra.mxu0 %v5786_v44  ;;  %4344 = vmatpush1.bf16.msra.mxu1 %v5788_v45  ;;  %v1127_v28 = vld [vmem:[%s7127_s8 + $0x320] sm:$0xff]  ;;  %v1128_v30 = vld [vmem:[%s7127_s8 + $0x328] sm:$0xff] }
 0x1e8   : > { %4181 = vmatprep.subr.bf16.mxu0 %v5795_v46  ;;  %4345 = vmatprep.subr.bf16.mxu1 %v5797_v48  ;;  %v5843_v33 = vcombine.high %v1123_v27, %v1127_v28  ;;  %v5845_v34 = vcombine.high %v1124_v29, %v1128_v30  ;;  %v1131_v35 = vld [vmem:[%s7127_s8 + $0x340] sm:$0xff]  ;;  %v1132_v37 = vld [vmem:[%s7127_s8 + $0x348] sm:$0xff]  ;;  %v5842_v39 = vcombine.low %v1123_v27, %v1127_v28 }
 0x1e9   : > { %v1135_v36 = vld [vmem:[%s7127_s8 + $0x360] sm:$0xff]  ;;  %v1136_v38 = vld [vmem:[%s7127_s8 + $0x368] sm:$0xff]  ;;  %v5844_v8 = vcombine.low %v1124_v29, %v1128_v30 }
 0x1ea   : > { %v5851_v40 = vcombine.high %v1131_v35, %v1135_v36  ;;  %v5853_v41 = vcombine.high %v1132_v37, %v1136_v38  ;;  %v1139_v42 = vld [vmem:[%s7127_s8 + $0x380] sm:$0xff]  ;;  %v1140_v44 = vld [vmem:[%s7127_s8 + $0x388] sm:$0xff]  ;;  %v5850_v46 = vcombine.low %v1131_v35, %v1135_v36  ;;  %v5852_v48 = vcombine.low %v1132_v37, %v1136_v38 }
 0x1eb   : > { %4182 = vmatpush1.bf16.msra.mxu0 %v5794_v54  ;;  %4346 = vmatpush1.bf16.msra.mxu1 %v5796_v55  ;;  %v1143_v43 = vld [vmem:[%s7127_s8 + $0x3a0] sm:$0xff]  ;;  %v1144_v45 = vld [vmem:[%s7127_s8 + $0x3a8] sm:$0xff] }
 0x1ec   : > { %4183 = vmatprep.subr.bf16.mxu0 %v5803_v56  ;;  %4347 = vmatprep.subr.bf16.mxu1 %v5805_v57  ;;  %v5859_v49 = vcombine.high %v1139_v42, %v1143_v43  ;;  %v5861_v50 = vcombine.high %v1140_v44, %v1144_v45  ;;  %v1147_v52 = vld [vmem:[%s7127_s8 + $0x3c0] sm:$0xff]  ;;  %v1148_v54 = vld [vmem:[%s7127_s8 + $0x3c8] sm:$0xff]  ;;  %v5858_v56 = vcombine.low %v1139_v42, %v1143_v43 }
 0x1ed   : > { %v1151_v53 = vld [vmem:[%s7127_s8 + $0x3e0] sm:$0xff]  ;;  %v1152_v55 = vld [vmem:[%s7127_s8 + $0x3e8] sm:$0xff]  ;;  %v5860_v57 = vcombine.low %v1140_v44, %v1144_v45 }
 0x1ee   : > { %v5867_v58 = vcombine.high %v1147_v52, %v1151_v53  ;;  %v5869_v59 = vcombine.high %v1148_v54, %v1152_v55  ;;  %v1155_v60 = vld [vmem:[%s7127_s8 + $0x400] sm:$0xff] }
 0x1ef   : > { %4184 = vmatpush1.bf16.msra.mxu0 %v5802_v62  ;;  %4348 = vmatpush1.bf16.msra.mxu1 %v5804_v63  ;;  %v1159_v61 = vld [vmem:[%s7127_s8 + $0x420] sm:$0xff]  ;;  %v1156_v62 = vld [vmem:[%s7127_s8 + $0x408] sm:$0xff] }
 0x1f0   : > { %4185 = vmatprep.subr.bf16.mxu0 %v5811_v0  ;;  %4349 = vmatprep.subr.bf16.mxu1 %v5813_v1  ;;  %v1160_v63 = vld [vmem:[%s7127_s8 + $0x428] sm:$0xff]  ;;  %v5866_v0 = vcombine.low %v1147_v52, %v1151_v53  ;;  %v5868_v1 = vcombine.low %v1148_v54, %v1152_v55  ;;  %v5875_v2 = vcombine.high %v1155_v60, %v1159_v61  ;;  %v1163_v4 = vld [vmem:[%s7127_s8 + $0x440] sm:$0xff] }
 0x1f1   : > { %v5877_v3 = vcombine.high %v1156_v62, %v1160_v63  ;;  %v1167_v5 = vld [vmem:[%s7127_s8 + $0x460] sm:$0xff]  ;;  %v5874_v11 = vcombine.low %v1155_v60, %v1159_v61  ;;  %v5876_v13 = vcombine.low %v1156_v62, %v1160_v63 }
 0x1f2   : > { %v5883_v14 = vcombine.high %v1163_v4, %v1167_v5  ;;  %v1171_v15 = vld [vmem:[%s7127_s8 + $0x480] sm:$0xff]  ;;  %v5882_v20 = vcombine.low %v1163_v4, %v1167_v5 }
 0x1f3   : > { %4186 = vmatpush1.bf16.msra.mxu0 %v5810_v6  ;;  %4350 = vmatpush1.bf16.msra.mxu1 %v5812_v7  ;;  %v7241_v6 = vcombine.low %v7189_v47, %v7189_v47  ;;  %v1164_v7 = vld [vmem:[%s7127_s8 + $0x448] sm:$0xff]  ;;  %v1179_v22 = vld [vmem:[%s7127_s8 + $0x4c0] sm:$0xff] }
 0x1f4   : > { %4187 = vmatprep.subr.bf16.mxu0 %v5819_v9  ;;  %4351 = vmatprep.subr.bf16.mxu1 %v5821_v10  ;;  %v1168_v9 = vld [vmem:[%s7127_s8 + $0x468] sm:$0xff]  ;;  %v7245_v10 = vld [vmem:[#allocation2 + $0x8] sm:$0xff]  ;;  %v1187_v30 = vld [vmem:[%s7127_s8 + $0x500] sm:$0xff] }
 0x1f5   : > { %v1176_v47 = vld [vmem:[%s7127_s8 + $0x4a8] sm:$0xff]  ;;  %v5884_v12 = vcombine.low %v1164_v7, %v1168_v9  ;;  %v1195_v38 = vld [vmem:[%s7127_s8 + $0x540] sm:$0xff] }
 0x1f6   : > { %v1203_v45 = vld [vmem:[%s7127_s8 + $0x580] sm:$0xff] }
 0x1f7   : > { %4188 = vmatpush1.bf16.msra.mxu0 %v5818_v16  ;;  %4352 = vmatpush1.bf16.msra.mxu1 %v5820_v17  ;;  %v1175_v16 = vld [vmem:[%s7127_s8 + $0x4a0] sm:$0xff]  ;;  %v5885_v17 = vcombine.high %v1164_v7, %v1168_v9 }
 0x1f8   : > { %4189 = vmatprep.subr.bf16.mxu0 %v5827_v18  ;;  %4353 = vmatprep.subr.bf16.mxu1 %v5829_v19  ;;  %v1172_v18 = vld [vmem:[%s7127_s8 + $0x488] sm:$0xff]  ;;  %v7253_v19 = vcombine.high %v7245_v10, %v7245_v10  ;;  %v5891_v21 = vcombine.high %v1171_v15, %v1175_v16  ;;  %v5890_v27 = vcombine.low %v1171_v15, %v1175_v16  ;;  %v1211_v55 = vld [vmem:[%s7127_s8 + $0x5c0] sm:$0xff] }
 0x1f9   : > { %v5892_v28 = vcombine.low %v1172_v18, %v1176_v47  ;;  %v1219_v63 = vld [vmem:[%s7127_s8 + $0x600] sm:$0xff]  ;;  %v1232_v15 = vld [vmem:[%s7127_s8 + $0x668] sm:$0xff] }
 0x1fa   : > { %v1227_v9 = vld [vmem:[%s7127_s8 + $0x640] sm:$0xff] }
 0x1fb   : > { %4190 = vmatpush1.bf16.msra.mxu0 %v5826_v23  ;;  %4354 = vmatpush1.bf16.msra.mxu1 %v5828_v24  ;;  %v1183_v23 = vld [vmem:[%s7127_s8 + $0x4e0] sm:$0xff]  ;;  %v1180_v24 = vld [vmem:[%s7127_s8 + $0x4c8] sm:$0xff] }
 0x1fc   : > { %4191 = vmatprep.subr.bf16.mxu0 %v5835_v25  ;;  %4355 = vmatprep.subr.bf16.mxu1 %v5837_v26  ;;  %v5893_v25 = vcombine.high %v1172_v18, %v1176_v47  ;;  %v1184_v26 = vld [vmem:[%s7127_s8 + $0x4e8] sm:$0xff]  ;;  %v5899_v29 = vcombine.high %v1179_v22, %v1183_v23  ;;  %v5898_v35 = vcombine.low %v1179_v22, %v1183_v23  ;;  %v1235_v47 = vld [vmem:[%s7127_s8 + $0x680] sm:$0xff] }
 0x1fd   : > { %v5900_v36 = vcombine.low %v1180_v24, %v1184_v26  ;;  %v1240_v22 = vld [vmem:[%s7127_s8 + $0x6a8] sm:$0xff] }
 0x1ff   : > { %4192 = vmatpush1.bf16.msra.mxu0 %v5834_v31  ;;  %4356 = vmatpush1.bf16.msra.mxu1 %v5836_v32  ;;  %v1191_v31 = vld [vmem:[%s7127_s8 + $0x520] sm:$0xff]  ;;  %v1188_v32 = vld [vmem:[%s7127_s8 + $0x508] sm:$0xff] }
 0x200   : > { %4193 = vmatprep.subr.bf16.mxu0 %v5843_v33  ;;  %4357 = vmatprep.subr.bf16.mxu1 %v5845_v34  ;;  %v5901_v33 = vcombine.high %v1180_v24, %v1184_v26  ;;  %v1192_v34 = vld [vmem:[%s7127_s8 + $0x528] sm:$0xff]  ;;  %v5907_v37 = vcombine.high %v1187_v30, %v1191_v31  ;;  %v5906_v42 = vcombine.low %v1187_v30, %v1191_v31  ;;  %v1243_v26 = vld [vmem:[%s7127_s8 + $0x6c0] sm:$0xff] }
 0x201   : > { %v5908_v43 = vcombine.low %v1188_v32, %v1192_v34  ;;  %v1248_v30 = vld [vmem:[%s7127_s8 + $0x6e8] sm:$0xff] }
 0x203   : > { %4194 = vmatpush1.bf16.msra.mxu0 %v5842_v39  ;;  %4358 = vmatpush1.bf16.msra.mxu1 %v5844_v8  ;;  %v1199_v39 = vld [vmem:[%s7127_s8 + $0x560] sm:$0xff]  ;;  %v1196_v8 = vld [vmem:[%s7127_s8 + $0x548] sm:$0xff] }
 0x204   : > { %4195 = vmatprep.subr.bf16.mxu0 %v5851_v40  ;;  %4359 = vmatprep.subr.bf16.mxu1 %v5853_v41  ;;  %v5909_v40 = vcombine.high %v1188_v32, %v1192_v34  ;;  %v1200_v41 = vld [vmem:[%s7127_s8 + $0x568] sm:$0xff]  ;;  %v5915_v44 = vcombine.high %v1195_v38, %v1199_v39  ;;  %v5914_v52 = vcombine.low %v1195_v38, %v1199_v39  ;;  %v1251_v34 = vld [vmem:[%s7127_s8 + $0x700] sm:$0xff] }
 0x205   : > { %v5916_v53 = vcombine.low %v1196_v8, %v1200_v41  ;;  %v1256_v38 = vld [vmem:[%s7127_s8 + $0x728] sm:$0xff] }
 0x207   : > { %4196 = vmatpush1.bf16.msra.mxu0 %v5850_v46  ;;  %4360 = vmatpush1.bf16.msra.mxu1 %v5852_v48  ;;  %v1207_v46 = vld [vmem:[%s7127_s8 + $0x5a0] sm:$0xff]  ;;  %v1204_v48 = vld [vmem:[%s7127_s8 + $0x588] sm:$0xff] }
 0x208   : > { %4197 = vmatprep.subr.bf16.mxu0 %v5859_v49  ;;  %4361 = vmatprep.subr.bf16.mxu1 %v5861_v50  ;;  %v5917_v49 = vcombine.high %v1196_v8, %v1200_v41  ;;  %v1208_v50 = vld [vmem:[%s7127_s8 + $0x5a8] sm:$0xff]  ;;  %v5923_v54 = vcombine.high %v1203_v45, %v1207_v46  ;;  %v5922_v60 = vcombine.low %v1203_v45, %v1207_v46  ;;  %v1259_v41 = vld [vmem:[%s7127_s8 + $0x740] sm:$0xff] }
 0x209   : > { %v5924_v61 = vcombine.low %v1204_v48, %v1208_v50  ;;  %v1264_v45 = vld [vmem:[%s7127_s8 + $0x768] sm:$0xff] }
 0x20b   : > { %4198 = vmatpush1.bf16.msra.mxu0 %v5858_v56  ;;  %4362 = vmatpush1.bf16.msra.mxu1 %v5860_v57  ;;  %v1215_v56 = vld [vmem:[%s7127_s8 + $0x5e0] sm:$0xff]  ;;  %v1212_v57 = vld [vmem:[%s7127_s8 + $0x5c8] sm:$0xff] }
 0x20c   : > { %4199 = vmatprep.subr.bf16.mxu0 %v5867_v58  ;;  %4363 = vmatprep.subr.bf16.mxu1 %v5869_v59  ;;  %v5925_v58 = vcombine.high %v1204_v48, %v1208_v50  ;;  %v1216_v59 = vld [vmem:[%s7127_s8 + $0x5e8] sm:$0xff]  ;;  %v5931_v62 = vcombine.high %v1211_v55, %v1215_v56  ;;  %v5930_v4 = vcombine.low %v1211_v55, %v1215_v56  ;;  %v1267_v50 = vld [vmem:[%s7127_s8 + $0x780] sm:$0xff] }
 0x20d   : > { %v5932_v5 = vcombine.low %v1212_v57, %v1216_v59  ;;  %v1272_v55 = vld [vmem:[%s7127_s8 + $0x7a8] sm:$0xff] }
 0x20f   : > { %4200 = vmatpush1.bf16.msra.mxu0 %v5866_v0  ;;  %4364 = vmatpush1.bf16.msra.mxu1 %v5868_v1  ;;  %v1223_v0 = vld [vmem:[%s7127_s8 + $0x620] sm:$0xff]  ;;  %v1220_v1 = vld [vmem:[%s7127_s8 + $0x608] sm:$0xff] }
 0x210   : > { %4210 = vmatprep.subr.bf16.mxu0 %v5875_v2  ;;  %4374 = vmatprep.subr.bf16.mxu1 %v5877_v3  ;;  %v5933_v2 = vcombine.high %v1212_v57, %v1216_v59  ;;  %v1224_v3 = vld [vmem:[%s7127_s8 + $0x628] sm:$0xff]  ;;  %v5939_v7 = vcombine.high %v1219_v63, %v1223_v0  ;;  %v5938_v16 = vcombine.low %v1219_v63, %v1223_v0  ;;  %v1275_v59 = vld [vmem:[%s7127_s8 + $0x7c0] sm:$0xff] }
 0x211   : > { %v1280_v63 = vld [vmem:[%s7127_s8 + $0x7e8] sm:$0xff] }
 0x212   : > { %4202 = vmatmul.mubr.bf16.vlgmr.msra.gmra.mrb[0].mxu0 %v7241_v6  ;;  %4366 = vmatmul.mubr.bf16.vlgmr.msra.gmra.mrb[0].mxu1 %v7241_v6 }
 0x213   : > { %4211 = vmatpush1.bf16.msra.mxu0 %v5874_v11  ;;  %4375 = vmatpush1.bf16.msra.mxu1 %v5876_v13  ;;  %v1231_v11 = vld [vmem:[%s7127_s8 + $0x660] sm:$0xff]  ;;  %v1228_v13 = vld [vmem:[%s7127_s8 + $0x648] sm:$0xff] }
 0x214   : > { %4212 = vmatprep.subr.bf16.mxu0 %v5883_v14  ;;  %4376 = vmatprep.subr.bf16.mxu1 %v5885_v17  ;;  %v5941_v14 = vcombine.high %v1220_v1, %v1224_v3  ;;  %v5940_v17 = vcombine.low %v1220_v1, %v1224_v3  ;;  %v5947_v18 = vcombine.high %v1227_v9, %v1231_v11  ;;  %v1283_v3 = vld [vmem:[%s7127_s8 + $0x800] sm:$0xff] }
 0x215   : > { %4242 = vmatprep.mubr.bf16.mxu0 %v7253_v19  ;;  %4406 = vmatprep.mubr.bf16.mxu1 %v7253_v19  ;;  %v5946_v23 = vcombine.low %v1227_v9, %v1231_v11  ;;  %v5948_v24 = vcombine.low %v1228_v13, %v1232_v15  ;;  %v1288_v9 = vld [vmem:[%s7127_s8 + $0x828] sm:$0xff] }
 0x217   : > { %4213 = vmatpush1.bf16.msra.mxu0 %v5882_v20  ;;  %4377 = vmatpush1.bf16.msra.mxu1 %v5884_v12  ;;  %v1239_v20 = vld [vmem:[%s7127_s8 + $0x6a0] sm:$0xff]  ;;  %v1236_v12 = vld [vmem:[%s7127_s8 + $0x688] sm:$0xff] }
 0x218   : > { %4214 = vmatprep.subr.bf16.mxu0 %v5891_v21  ;;  %4378 = vmatprep.subr.bf16.mxu1 %v5893_v25  ;;  %v5949_v21 = vcombine.high %v1228_v13, %v1232_v15  ;;  %v5955_v25 = vcombine.high %v1235_v47, %v1239_v20  ;;  %v5954_v31 = vcombine.low %v1235_v47, %v1239_v20  ;;  %v1291_v13 = vld [vmem:[%s7127_s8 + $0x840] sm:$0xff] }
 0x219   : > { %v5956_v32 = vcombine.low %v1236_v12, %v1240_v22  ;;  %v7319_v20 = vld [vmem:[#allocation2 + $0x10] sm:$0xff] }
 0x21b   : > { %4215 = vmatpush1.bf16.msra.mxu0 %v5890_v27  ;;  %4379 = vmatpush1.bf16.msra.mxu1 %v5892_v28  ;;  %v1247_v27 = vld [vmem:[%s7127_s8 + $0x6e0] sm:$0xff]  ;;  %v1244_v28 = vld [vmem:[%s7127_s8 + $0x6c8] sm:$0xff] }
 0x21c   : > { %4216 = vmatprep.subr.bf16.mxu0 %v5899_v29  ;;  %4380 = vmatprep.subr.bf16.mxu1 %v5901_v33  ;;  %v5957_v29 = vcombine.high %v1236_v12, %v1240_v22  ;;  %v5963_v33 = vcombine.high %v1243_v26, %v1247_v27  ;;  %v5962_v39 = vcombine.low %v1243_v26, %v1247_v27  ;;  %v1303_v26 = vld [vmem:[%s7127_s8 + $0x8a0] sm:$0xff] }
 0x21d   : > { %v5964_v8 = vcombine.low %v1244_v28, %v1248_v30  ;;  %v7323_v12 = vcombine.low %v7245_v10, %v7245_v10  ;;  %v7329_v27 = vcombine.high %v7319_v20, %v7319_v20  ;;  %v1300_v10 = vld [vmem:[%s7127_s8 + $0x888] sm:$0xff] }
 0x21f   : > { %4217 = vmatpush1.bf16.msra.mxu0 %v5898_v35  ;;  %4381 = vmatpush1.bf16.msra.mxu1 %v5900_v36  ;;  %v1255_v35 = vld [vmem:[%s7127_s8 + $0x720] sm:$0xff]  ;;  %v1252_v36 = vld [vmem:[%s7127_s8 + $0x708] sm:$0xff] }
 0x220   : > { %4218 = vmatprep.subr.bf16.mxu0 %v5907_v37  ;;  %4382 = vmatprep.subr.bf16.mxu1 %v5909_v40  ;;  %v5965_v37 = vcombine.high %v1244_v28, %v1248_v30  ;;  %v5971_v40 = vcombine.high %v1251_v34, %v1255_v35  ;;  %v5970_v46 = vcombine.low %v1251_v34, %v1255_v35  ;;  %v1304_v28 = vld [vmem:[%s7127_s8 + $0x8a8] sm:$0xff]  ;;  %v1311_v34 = vld [vmem:[%s7127_s8 + $0x8e0] sm:$0xff] }
 0x221   : > { %v5972_v48 = vcombine.low %v1252_v36, %v1256_v38  ;;  %v1308_v35 = vld [vmem:[%s7127_s8 + $0x8c8] sm:$0xff] }
 0x223   : > { %4219 = vmatpush1.bf16.msra.mxu0 %v5906_v42  ;;  %4383 = vmatpush1.bf16.msra.mxu1 %v5908_v43  ;;  %v1263_v42 = vld [vmem:[%s7127_s8 + $0x760] sm:$0xff]  ;;  %v1260_v43 = vld [vmem:[%s7127_s8 + $0x748] sm:$0xff] }
 0x224   : > { %4220 = vmatprep.subr.bf16.mxu0 %v5915_v44  ;;  %4384 = vmatprep.subr.bf16.mxu1 %v5917_v49  ;;  %v5973_v44 = vcombine.high %v1252_v36, %v1256_v38  ;;  %v5979_v49 = vcombine.high %v1259_v41, %v1263_v42  ;;  %v5978_v56 = vcombine.low %v1259_v41, %v1263_v42  ;;  %v1312_v36 = vld [vmem:[%s7127_s8 + $0x8e8] sm:$0xff]  ;;  %v1319_v41 = vld [vmem:[%s7127_s8 + $0x920] sm:$0xff] }
 0x225   : > { %v5980_v57 = vcombine.low %v1260_v43, %v1264_v45  ;;  %v6020_v38 = vcombine.low %v1300_v10, %v1304_v28  ;;  %v1316_v42 = vld [vmem:[%s7127_s8 + $0x908] sm:$0xff] }
 0x227   : > { %4221 = vmatpush1.bf16.msra.mxu0 %v5914_v52  ;;  %4385 = vmatpush1.bf16.msra.mxu1 %v5916_v53  ;;  %v1271_v52 = vld [vmem:[%s7127_s8 + $0x7a0] sm:$0xff]  ;;  %v1268_v53 = vld [vmem:[%s7127_s8 + $0x788] sm:$0xff] }
 0x228   : > { %4222 = vmatprep.subr.bf16.mxu0 %v5923_v54  ;;  %4386 = vmatprep.subr.bf16.mxu1 %v5925_v58  ;;  %v5981_v54 = vcombine.high %v1260_v43, %v1264_v45  ;;  %v5987_v58 = vcombine.high %v1267_v50, %v1271_v52  ;;  %v5986_v0 = vcombine.low %v1267_v50, %v1271_v52  ;;  %v1320_v43 = vld [vmem:[%s7127_s8 + $0x928] sm:$0xff]  ;;  %v1327_v50 = vld [vmem:[%s7127_s8 + $0x960] sm:$0xff] }
 0x229   : > { %v5988_v1 = vcombine.low %v1268_v53, %v1272_v55  ;;  %v6028_v45 = vcombine.low %v1308_v35, %v1312_v36  ;;  %v1324_v52 = vld [vmem:[%s7127_s8 + $0x948] sm:$0xff] }
 0x22b   : > { %4223 = vmatpush1.bf16.msra.mxu0 %v5922_v60  ;;  %4387 = vmatpush1.bf16.msra.mxu1 %v5924_v61  ;;  %v1279_v60 = vld [vmem:[%s7127_s8 + $0x7e0] sm:$0xff]  ;;  %v1276_v61 = vld [vmem:[%s7127_s8 + $0x7c8] sm:$0xff] }
 0x22c   : > { %4224 = vmatprep.subr.bf16.mxu0 %v5931_v62  ;;  %4388 = vmatprep.subr.bf16.mxu1 %v5933_v2  ;;  %v5989_v62 = vcombine.high %v1268_v53, %v1272_v55  ;;  %v5995_v2 = vcombine.high %v1275_v59, %v1279_v60  ;;  %v5994_v11 = vcombine.low %v1275_v59, %v1279_v60  ;;  %v1328_v53 = vld [vmem:[%s7127_s8 + $0x968] sm:$0xff]  ;;  %v1335_v59 = vld [vmem:[%s7127_s8 + $0x9a0] sm:$0xff] }
 0x22d   : > { %v6036_v55 = vcombine.low %v1316_v42, %v1320_v43  ;;  %v1332_v60 = vld [vmem:[%s7127_s8 + $0x988] sm:$0xff] }
 0x22f   : > { %4225 = vmatpush1.bf16.msra.mxu0 %v5930_v4  ;;  %4389 = vmatpush1.bf16.msra.mxu1 %v5932_v5  ;;  %v1287_v4 = vld [vmem:[%s7127_s8 + $0x820] sm:$0xff]  ;;  %v1284_v5 = vld [vmem:[%s7127_s8 + $0x808] sm:$0xff] }
 0x230   : > { %4226 = vmatprep.subr.bf16.mxu0 %v5939_v7  ;;  %4390 = vmatprep.subr.bf16.mxu1 %v5941_v14  ;;  %v5997_v7 = vcombine.high %v1276_v61, %v1280_v63  ;;  %v5996_v14 = vcombine.low %v1276_v61, %v1280_v63  ;;  %v6003_v15 = vcombine.high %v1283_v3, %v1287_v4  ;;  %v1336_v61 = vld [vmem:[%s7127_s8 + $0x9a8] sm:$0xff] }
 0x231   : > { %v6005_v47 = vcombine.high %v1284_v5, %v1288_v9  ;;  %v6004_v22 = vcombine.low %v1284_v5, %v1288_v9  ;;  %v6044_v63 = vcombine.low %v1324_v52, %v1328_v53  ;;  %v1344_v5 = vld [vmem:[%s7127_s8 + $0x9e8] sm:$0xff]  ;;  %v6052_v9 = vcombine.low %v1332_v60, %v1336_v61 }
 0x233   : > { %4227 = vmatpush1.bf16.msra.mxu0 %v5938_v16  ;;  %4391 = vmatpush1.bf16.msra.mxu1 %v5940_v17  ;;  %v1295_v16 = vld [vmem:[%s7127_s8 + $0x860] sm:$0xff]  ;;  %v1292_v17 = vld [vmem:[%s7127_s8 + $0x848] sm:$0xff] }
 0x234   : > { %4228 = vmatprep.subr.bf16.mxu0 %v5947_v18  ;;  %4392 = vmatprep.subr.bf16.mxu1 %v5949_v21  ;;  %v1296_v18 = vld [vmem:[%s7127_s8 + $0x868] sm:$0xff]  ;;  %v6002_v21 = vcombine.low %v1283_v3, %v1287_v4  ;;  %v1343_v3 = vld [vmem:[%s7127_s8 + $0x9e0] sm:$0xff] }
 0x235   : > { %v6012_v30 = vcombine.low %v1292_v17, %v1296_v18  ;;  %v1340_v4 = vld [vmem:[%s7127_s8 + $0x9c8] sm:$0xff] }
 0x237   : > { %4229 = vmatpush1.bf16.msra.mxu0 %v5946_v23  ;;  %4393 = vmatpush1.bf16.msra.mxu1 %v5948_v24  ;;  %v6011_v23 = vcombine.high %v1291_v13, %v1295_v16  ;;  %v6013_v24 = vcombine.high %v1292_v17, %v1296_v18  ;;  %v1352_v17 = vld [vmem:[%s7127_s8 + $0xa28] sm:$0xff] }
 0x238   : > { %4230 = vmatprep.subr.bf16.mxu0 %v5955_v25  ;;  %4394 = vmatprep.subr.bf16.mxu1 %v5957_v29  ;;  %v1299_v25 = vld [vmem:[%s7127_s8 + $0x880] sm:$0xff]  ;;  %v6010_v29 = vcombine.low %v1291_v13, %v1295_v16  ;;  %v6061_v13 = vcombine.high %v1340_v4, %v1344_v5  ;;  %v1348_v16 = vld [vmem:[%s7127_s8 + $0xa08] sm:$0xff] }
 0x23b   : > { %4231 = vmatpush1.bf16.msra.mxu0 %v5954_v31  ;;  %4395 = vmatpush1.bf16.msra.mxu1 %v5956_v32  ;;  %v6019_v31 = vcombine.high %v1299_v25, %v1303_v26  ;;  %v6021_v32 = vcombine.high %v1300_v10, %v1304_v28  ;;  %v6068_v28 = vcombine.low %v1348_v16, %v1352_v17 }
 0x23c   : > { %4232 = vmatprep.subr.bf16.mxu0 %v5963_v33  ;;  %4396 = vmatprep.subr.bf16.mxu1 %v5965_v37  ;;  %v1307_v33 = vld [vmem:[%s7127_s8 + $0x8c0] sm:$0xff]  ;;  %v6018_v37 = vcombine.low %v1299_v25, %v1303_v26  ;;  %v1356_v25 = vld [vmem:[%s7127_s8 + $0xa48] sm:$0xff] }
 0x23d   : > { %v1360_v26 = vld [vmem:[%s7127_s8 + $0xa68] sm:$0xff] }
 0x23f   : > { %4233 = vmatpush1.bf16.msra.mxu0 %v5962_v39  ;;  %4397 = vmatpush1.bf16.msra.mxu1 %v5964_v8  ;;  %v6027_v39 = vcombine.high %v1307_v33, %v1311_v34  ;;  %v6029_v8 = vcombine.high %v1308_v35, %v1312_v36  ;;  %v6076_v36 = vcombine.low %v1356_v25, %v1360_v26 }
 0x240   : > { %4234 = vmatprep.subr.bf16.mxu0 %v5971_v40  ;;  %4398 = vmatprep.subr.bf16.mxu1 %v5973_v44  ;;  %v1315_v40 = vld [vmem:[%s7127_s8 + $0x900] sm:$0xff]  ;;  %v6026_v44 = vcombine.low %v1307_v33, %v1311_v34  ;;  %v1364_v33 = vld [vmem:[%s7127_s8 + $0xa88] sm:$0xff] }
 0x241   : > { %v1368_v34 = vld [vmem:[%s7127_s8 + $0xaa8] sm:$0xff] }
 0x243   : > { %4235 = vmatpush1.bf16.msra.mxu0 %v5970_v46  ;;  %4399 = vmatpush1.bf16.msra.mxu1 %v5972_v48  ;;  %v6035_v46 = vcombine.high %v1315_v40, %v1319_v41  ;;  %v6037_v48 = vcombine.high %v1316_v42, %v1320_v43  ;;  %v6084_v43 = vcombine.low %v1364_v33, %v1368_v34 }
 0x244   : > { %4236 = vmatprep.subr.bf16.mxu0 %v5979_v49  ;;  %4400 = vmatprep.subr.bf16.mxu1 %v5981_v54  ;;  %v1323_v49 = vld [vmem:[%s7127_s8 + $0x940] sm:$0xff]  ;;  %v6034_v54 = vcombine.low %v1315_v40, %v1319_v41  ;;  %v1372_v40 = vld [vmem:[%s7127_s8 + $0xac8] sm:$0xff] }
 0x245   : > { %v1376_v41 = vld [vmem:[%s7127_s8 + $0xae8] sm:$0xff] }
 0x247   : > { %4237 = vmatpush1.bf16.msra.mxu0 %v5978_v56  ;;  %4401 = vmatpush1.bf16.msra.mxu1 %v5980_v57  ;;  %v6043_v56 = vcombine.high %v1323_v49, %v1327_v50  ;;  %v6045_v57 = vcombine.high %v1324_v52, %v1328_v53  ;;  %v6092_v53 = vcombine.low %v1372_v40, %v1376_v41 }
 0x248   : > { %4238 = vmatprep.subr.bf16.mxu0 %v5987_v58  ;;  %4402 = vmatprep.subr.bf16.mxu1 %v5989_v62  ;;  %v1331_v58 = vld [vmem:[%s7127_s8 + $0x980] sm:$0xff]  ;;  %v6042_v62 = vcombine.low %v1323_v49, %v1327_v50  ;;  %v1380_v49 = vld [vmem:[%s7127_s8 + $0xb08] sm:$0xff] }
 0x249   : > { %v1384_v50 = vld [vmem:[%s7127_s8 + $0xb28] sm:$0xff] }
 0x24b   : > { %4239 = vmatpush1.bf16.msra.mxu0 %v5986_v0  ;;  %4403 = vmatpush1.bf16.msra.mxu1 %v5988_v1  ;;  %v6051_v0 = vcombine.high %v1331_v58, %v1335_v59  ;;  %v6053_v1 = vcombine.high %v1332_v60, %v1336_v61  ;;  %v6100_v61 = vcombine.low %v1380_v49, %v1384_v50 }
 0x24c   : > { %4240 = vmatprep.subr.bf16.mxu0 %v5995_v2  ;;  %4404 = vmatprep.subr.bf16.mxu1 %v5997_v7  ;;  %v1339_v2 = vld [vmem:[%s7127_s8 + $0x9c0] sm:$0xff]  ;;  %v6050_v7 = vcombine.low %v1331_v58, %v1335_v59  ;;  %v1388_v58 = vld [vmem:[%s7127_s8 + $0xb48] sm:$0xff] }
 0x24d   : > { %v6058_v18 = vcombine.low %v1339_v2, %v1343_v3  ;;  %v1392_v59 = vld [vmem:[%s7127_s8 + $0xb68] sm:$0xff] }
 0x24f   : > { %4241 = vmatpush1.bf16.msra.mxu0 %v5994_v11  ;;  %4405 = vmatpush1.bf16.msra.mxu1 %v5996_v14  ;;  %v6059_v11 = vcombine.high %v1339_v2, %v1343_v3  ;;  %v1347_v14 = vld [vmem:[%s7127_s8 + $0xa00] sm:$0xff]  ;;  %v1396_v2 = vld [vmem:[%s7127_s8 + $0xb88] sm:$0xff] }
 0x250   : > { %4251 = vmatprep.subr.bf16.mxu0 %v6003_v15  ;;  %4415 = vmatprep.subr.bf16.mxu1 %v6005_v47  ;;  %v1351_v15 = vld [vmem:[%s7127_s8 + $0xa20] sm:$0xff]  ;;  %v6060_v47 = vcombine.low %v1340_v4, %v1344_v5  ;;  %v1400_v3 = vld [vmem:[%s7127_s8 + $0xba8] sm:$0xff]  ;;  %v6108_v5 = vcombine.low %v1388_v58, %v1392_v59 }
 0x251   : > { %v6066_v10 = vcombine.low %v1347_v14, %v1351_v15 }
 0x252   : > { %4243 = vmatmul.mubr.bf16.vlgmr.msra.gmra.mrb[0].mxu0 %v7323_v12  ;;  %4407 = vmatmul.mubr.bf16.vlgmr.msra.gmra.mrb[0].mxu1 %v7323_v12 }
 0x253   : > { %4252 = vmatpush1.bf16.msra.mxu0 %v6002_v21  ;;  %4416 = vmatpush1.bf16.msra.mxu1 %v6004_v22  ;;  %v6067_v21 = vcombine.high %v1347_v14, %v1351_v15  ;;  %v6069_v22 = vcombine.high %v1348_v16, %v1352_v17  ;;  %v1404_v14 = vld [vmem:[%s7127_s8 + $0xbc8] sm:$0xff]  ;;  %v6116_v17 = vcombine.low %v1396_v2, %v1400_v3 }
 0x254   : > { %4253 = vmatprep.subr.bf16.mxu0 %v6011_v23  ;;  %4417 = vmatprep.subr.bf16.mxu1 %v6013_v24  ;;  %v1355_v23 = vld [vmem:[%s7127_s8 + $0xa40] sm:$0xff]  ;;  %v1408_v15 = vld [vmem:[%s7127_s8 + $0xbe8] sm:$0xff] }
 0x255   : > { %4283 = vmatprep.mubr.bf16.mxu0 %v7329_v27  ;;  %4447 = vmatprep.mubr.bf16.mxu1 %v7329_v27  ;;  %v1359_v24 = vld [vmem:[%s7127_s8 + $0xa60] sm:$0xff] }
 0x256   : > { %v6074_v35 = vcombine.low %v1355_v23, %v1359_v24 }
 0x257   : > { %4254 = vmatpush1.bf16.msra.mxu0 %v6010_v29  ;;  %4418 = vmatpush1.bf16.msra.mxu1 %v6012_v30  ;;  %v6075_v29 = vcombine.high %v1355_v23, %v1359_v24  ;;  %v6077_v30 = vcombine.high %v1356_v25, %v1360_v26  ;;  %v1412_v23 = vld [vmem:[%s7127_s8 + $0xc08] sm:$0xff]  ;;  %v6124_v26 = vcombine.low %v1404_v14, %v1408_v15 }
 0x258   : > { %4255 = vmatprep.subr.bf16.mxu0 %v6019_v31  ;;  %4419 = vmatprep.subr.bf16.mxu1 %v6021_v32  ;;  %v1363_v31 = vld [vmem:[%s7127_s8 + $0xa80] sm:$0xff]  ;;  %v1416_v24 = vld [vmem:[%s7127_s8 + $0xc28] sm:$0xff] }
 0x259   : > { %v1367_v32 = vld [vmem:[%s7127_s8 + $0xaa0] sm:$0xff] }
 0x25a   : > { %v6082_v42 = vcombine.low %v1363_v31, %v1367_v32 }
 0x25b   : > { %4256 = vmatpush1.bf16.msra.mxu0 %v6018_v37  ;;  %4420 = vmatpush1.bf16.msra.mxu1 %v6020_v38  ;;  %v6083_v37 = vcombine.high %v1363_v31, %v1367_v32  ;;  %v6085_v38 = vcombine.high %v1364_v33, %v1368_v34  ;;  %v7397_v31 = vcombine.low %v7319_v20, %v7319_v20  ;;  %v1420_v32 = vld [vmem:[%s7127_s8 + $0xc48] sm:$0xff] }
 0x25c   : > { %4257 = vmatprep.subr.bf16.mxu0 %v6027_v39  ;;  %4421 = vmatprep.subr.bf16.mxu1 %v6029_v8  ;;  %v1371_v39 = vld [vmem:[%s7127_s8 + $0xac0] sm:$0xff]  ;;  %v1424_v33 = vld [vmem:[%s7127_s8 + $0xc68] sm:$0xff] }
 0x25d   : > { %v1375_v8 = vld [vmem:[%s7127_s8 + $0xae0] sm:$0xff]  ;;  %v7401_v34 = vld [vmem:[#allocation2 + $0x18] sm:$0xff] }
 0x25e   : > { %v6090_v52 = vcombine.low %v1371_v39, %v1375_v8  ;;  %v7407_v20 = vcombine.high %v7401_v34, %v7401_v34 }
 0x25f   : > { %4258 = vmatpush1.bf16.msra.mxu0 %v6026_v44  ;;  %4422 = vmatpush1.bf16.msra.mxu1 %v6028_v45  ;;  %v6091_v44 = vcombine.high %v1371_v39, %v1375_v8  ;;  %v6093_v45 = vcombine.high %v1372_v40, %v1376_v41  ;;  %v1427_v39 = vld [vmem:[%s7127_s8 + $0xc80] sm:$0xff]  ;;  %v1428_v40 = vld [vmem:[%s7127_s8 + $0xc88] sm:$0xff] }
 0x260   : > { %4259 = vmatprep.subr.bf16.mxu0 %v6035_v46  ;;  %4423 = vmatprep.subr.bf16.mxu1 %v6037_v48  ;;  %v1379_v46 = vld [vmem:[%s7127_s8 + $0xb00] sm:$0xff]  ;;  %v1432_v41 = vld [vmem:[%s7127_s8 + $0xca8] sm:$0xff] }
 0x261   : > { %v1383_v48 = vld [vmem:[%s7127_s8 + $0xb20] sm:$0xff] }
 0x262   : > { %v6098_v60 = vcombine.low %v1379_v46, %v1383_v48  ;;  %v1431_v8 = vld [vmem:[%s7127_s8 + $0xca0] sm:$0xff] }
 0x263   : > { %4260 = vmatpush1.bf16.msra.mxu0 %v6034_v54  ;;  %4424 = vmatpush1.bf16.msra.mxu1 %v6036_v55  ;;  %v6099_v54 = vcombine.high %v1379_v46, %v1383_v48  ;;  %v6101_v55 = vcombine.high %v1380_v49, %v1384_v50  ;;  %v1435_v46 = vld [vmem:[%s7127_s8 + $0xcc0] sm:$0xff]  ;;  %v1436_v49 = vld [vmem:[%s7127_s8 + $0xcc8] sm:$0xff] }
 0x264   : > { %4261 = vmatprep.subr.bf16.mxu0 %v6043_v56  ;;  %4425 = vmatprep.subr.bf16.mxu1 %v6045_v57  ;;  %v1387_v56 = vld [vmem:[%s7127_s8 + $0xb40] sm:$0xff]  ;;  %v1440_v50 = vld [vmem:[%s7127_s8 + $0xce8] sm:$0xff] }
 0x265   : > { %v1391_v57 = vld [vmem:[%s7127_s8 + $0xb60] sm:$0xff] }
 0x266   : > { %v6106_v4 = vcombine.low %v1387_v56, %v1391_v57  ;;  %v1439_v48 = vld [vmem:[%s7127_s8 + $0xce0] sm:$0xff] }
 0x267   : > { %4262 = vmatpush1.bf16.msra.mxu0 %v6042_v62  ;;  %4426 = vmatpush1.bf16.msra.mxu1 %v6044_v63  ;;  %v6107_v62 = vcombine.high %v1387_v56, %v1391_v57  ;;  %v6109_v63 = vcombine.high %v1388_v58, %v1392_v59  ;;  %v1443_v56 = vld [vmem:[%s7127_s8 + $0xd00] sm:$0xff]  ;;  %v1444_v58 = vld [vmem:[%s7127_s8 + $0xd08] sm:$0xff] }
 0x268   : > { %4263 = vmatprep.subr.bf16.mxu0 %v6051_v0  ;;  %4427 = vmatprep.subr.bf16.mxu1 %v6053_v1  ;;  %v1395_v0 = vld [vmem:[%s7127_s8 + $0xb80] sm:$0xff]  ;;  %v1448_v59 = vld [vmem:[%s7127_s8 + $0xd28] sm:$0xff] }
 0x269   : > { %v1399_v1 = vld [vmem:[%s7127_s8 + $0xba0] sm:$0xff] }
 0x26a   : > { %v6114_v16 = vcombine.low %v1395_v0, %v1399_v1  ;;  %v1447_v57 = vld [vmem:[%s7127_s8 + $0xd20] sm:$0xff] }
 0x26b   : > { %4264 = vmatpush1.bf16.msra.mxu0 %v6050_v7  ;;  %4428 = vmatpush1.bf16.msra.mxu1 %v6052_v9  ;;  %v6115_v7 = vcombine.high %v1395_v0, %v1399_v1  ;;  %v6117_v9 = vcombine.high %v1396_v2, %v1400_v3  ;;  %v1451_v0 = vld [vmem:[%s7127_s8 + $0xd40] sm:$0xff]  ;;  %v1452_v2 = vld [vmem:[%s7127_s8 + $0xd48] sm:$0xff] }
 0x26c   : > { %4265 = vmatprep.subr.bf16.mxu0 %v6059_v11  ;;  %4429 = vmatprep.subr.bf16.mxu1 %v6061_v13  ;;  %v1403_v11 = vld [vmem:[%s7127_s8 + $0xbc0] sm:$0xff]  ;;  %v1456_v3 = vld [vmem:[%s7127_s8 + $0xd68] sm:$0xff] }
 0x26d   : > { %v1407_v13 = vld [vmem:[%s7127_s8 + $0xbe0] sm:$0xff] }
 0x26e   : > { %v6122_v25 = vcombine.low %v1403_v11, %v1407_v13  ;;  %v1455_v1 = vld [vmem:[%s7127_s8 + $0xd60] sm:$0xff] }
 0x26f   : > { %4266 = vmatpush1.bf16.msra.mxu0 %v6058_v18  ;;  %4430 = vmatpush1.bf16.msra.mxu1 %v6060_v47  ;;  %v6123_v18 = vcombine.high %v1403_v11, %v1407_v13  ;;  %v6125_v47 = vcombine.high %v1404_v14, %v1408_v15  ;;  %v1459_v11 = vld [vmem:[%s7127_s8 + $0xd80] sm:$0xff]  ;;  %v1460_v14 = vld [vmem:[%s7127_s8 + $0xd88] sm:$0xff] }
 0x270   : > { %4267 = vmatprep.subr.bf16.mxu0 %v6067_v21  ;;  %4431 = vmatprep.subr.bf16.mxu1 %v6069_v22  ;;  %v1411_v21 = vld [vmem:[%s7127_s8 + $0xc00] sm:$0xff]  ;;  %v1464_v15 = vld [vmem:[%s7127_s8 + $0xda8] sm:$0xff] }
 0x271   : > { %v1415_v22 = vld [vmem:[%s7127_s8 + $0xc20] sm:$0xff] }
 0x272   : > { %v1463_v13 = vld [vmem:[%s7127_s8 + $0xda0] sm:$0xff] }
 0x273   : > { %4268 = vmatpush1.bf16.msra.mxu0 %v6066_v10  ;;  %4432 = vmatpush1.bf16.msra.mxu1 %v6068_v28  ;;  %v6131_v10 = vcombine.high %v1411_v21, %v1415_v22  ;;  %v6133_v28 = vcombine.high %v1412_v23, %v1416_v24 }
 0x274   : > { %4269 = vmatprep.subr.bf16.mxu0 %v6075_v29  ;;  %4433 = vmatprep.subr.bf16.mxu1 %v6077_v30  ;;  %v1419_v29 = vld [vmem:[%s7127_s8 + $0xc40] sm:$0xff] }
 0x275   : > { %v1423_v30 = vld [vmem:[%s7127_s8 + $0xc60] sm:$0xff] }
 0x277   : > { %4270 = vmatpush1.bf16.msra.mxu0 %v6074_v35  ;;  %4434 = vmatpush1.bf16.msra.mxu1 %v6076_v36  ;;  %v6130_v35 = vcombine.low %v1411_v21, %v1415_v22  ;;  %v6132_v36 = vcombine.low %v1412_v23, %v1416_v24  ;;  %v1467_v21 = vld [vmem:[%s7127_s8 + $0xdc0] sm:$0xff]  ;;  %v1468_v23 = vld [vmem:[%s7127_s8 + $0xdc8] sm:$0xff] }
 0x278   : > { %4271 = vmatprep.subr.bf16.mxu0 %v6083_v37  ;;  %4435 = vmatprep.subr.bf16.mxu1 %v6085_v38  ;;  %v6139_v37 = vcombine.high %v1419_v29, %v1423_v30  ;;  %v6141_v38 = vcombine.high %v1420_v32, %v1424_v33  ;;  %v1471_v22 = vld [vmem:[%s7127_s8 + $0xde0] sm:$0xff]  ;;  %v1472_v24 = vld [vmem:[%s7127_s8 + $0xde8] sm:$0xff] }
 0x27b   : > { %4272 = vmatpush1.bf16.msra.mxu0 %v6082_v42  ;;  %4436 = vmatpush1.bf16.msra.mxu1 %v6084_v43  ;;  %v6138_v42 = vcombine.low %v1419_v29, %v1423_v30  ;;  %v6140_v43 = vcombine.low %v1420_v32, %v1424_v33  ;;  %v1475_v29 = vld [vmem:[%s7127_s8 + $0xe00] sm:$0xff]  ;;  %v1476_v32 = vld [vmem:[%s7127_s8 + $0xe08] sm:$0xff] }
 0x27c   : > { %4273 = vmatprep.subr.bf16.mxu0 %v6091_v44  ;;  %4437 = vmatprep.subr.bf16.mxu1 %v6093_v45  ;;  %v6147_v44 = vcombine.high %v1427_v39, %v1431_v8  ;;  %v6149_v45 = vcombine.high %v1428_v40, %v1432_v41  ;;  %v1479_v30 = vld [vmem:[%s7127_s8 + $0xe20] sm:$0xff]  ;;  %v1480_v33 = vld [vmem:[%s7127_s8 + $0xe28] sm:$0xff] }
 0x27f   : > { %4274 = vmatpush1.bf16.msra.mxu0 %v6090_v52  ;;  %4438 = vmatpush1.bf16.msra.mxu1 %v6092_v53  ;;  %v6146_v52 = vcombine.low %v1427_v39, %v1431_v8  ;;  %v6148_v53 = vcombine.low %v1428_v40, %v1432_v41  ;;  %v1483_v39 = vld [vmem:[%s7127_s8 + $0xe40] sm:$0xff]  ;;  %v1484_v40 = vld [vmem:[%s7127_s8 + $0xe48] sm:$0xff] }
 0x280   : > { %4275 = vmatprep.subr.bf16.mxu0 %v6099_v54  ;;  %4439 = vmatprep.subr.bf16.mxu1 %v6101_v55  ;;  %v6155_v54 = vcombine.high %v1435_v46, %v1439_v48  ;;  %v6157_v55 = vcombine.high %v1436_v49, %v1440_v50  ;;  %v1487_v8 = vld [vmem:[%s7127_s8 + $0xe60] sm:$0xff]  ;;  %v1488_v41 = vld [vmem:[%s7127_s8 + $0xe68] sm:$0xff] }
 0x283   : > { %4276 = vmatpush1.bf16.msra.mxu0 %v6098_v60  ;;  %4440 = vmatpush1.bf16.msra.mxu1 %v6100_v61  ;;  %v6154_v60 = vcombine.low %v1435_v46, %v1439_v48  ;;  %v6156_v61 = vcombine.low %v1436_v49, %v1440_v50  ;;  %v1491_v46 = vld [vmem:[%s7127_s8 + $0xe80] sm:$0xff]  ;;  %v1492_v49 = vld [vmem:[%s7127_s8 + $0xe88] sm:$0xff] }
 0x284   : > { %4277 = vmatprep.subr.bf16.mxu0 %v6107_v62  ;;  %4441 = vmatprep.subr.bf16.mxu1 %v6109_v63  ;;  %v6163_v62 = vcombine.high %v1443_v56, %v1447_v57  ;;  %v6165_v63 = vcombine.high %v1444_v58, %v1448_v59  ;;  %v1495_v48 = vld [vmem:[%s7127_s8 + $0xea0] sm:$0xff]  ;;  %v1496_v50 = vld [vmem:[%s7127_s8 + $0xea8] sm:$0xff] }
 0x287   : > { %4278 = vmatpush1.bf16.msra.mxu0 %v6106_v4  ;;  %4442 = vmatpush1.bf16.msra.mxu1 %v6108_v5  ;;  %v6162_v4 = vcombine.low %v1443_v56, %v1447_v57  ;;  %v6164_v5 = vcombine.low %v1444_v58, %v1448_v59  ;;  %v1499_v56 = vld [vmem:[%s7127_s8 + $0xec0] sm:$0xff]  ;;  %v1500_v58 = vld [vmem:[%s7127_s8 + $0xec8] sm:$0xff] }
 0x288   : > { %4279 = vmatprep.subr.bf16.mxu0 %v6115_v7  ;;  %4443 = vmatprep.subr.bf16.mxu1 %v6117_v9  ;;  %v6171_v7 = vcombine.high %v1451_v0, %v1455_v1  ;;  %v6173_v9 = vcombine.high %v1452_v2, %v1456_v3  ;;  %v1503_v57 = vld [vmem:[%s7127_s8 + $0xee0] sm:$0xff]  ;;  %v1504_v59 = vld [vmem:[%s7127_s8 + $0xee8] sm:$0xff] }
 0x28b   : > { %4280 = vmatpush1.bf16.msra.mxu0 %v6114_v16  ;;  %4444 = vmatpush1.bf16.msra.mxu1 %v6116_v17  ;;  %v6170_v16 = vcombine.low %v1451_v0, %v1455_v1  ;;  %v6172_v17 = vcombine.low %v1452_v2, %v1456_v3  ;;  %v1507_v0 = vld [vmem:[%s7127_s8 + $0xf00] sm:$0xff]  ;;  %v1508_v2 = vld [vmem:[%s7127_s8 + $0xf08] sm:$0xff] }
 0x28c   : > { %4281 = vmatprep.subr.bf16.mxu0 %v6123_v18  ;;  %4445 = vmatprep.subr.bf16.mxu1 %v6125_v47  ;;  %v6179_v18 = vcombine.high %v1459_v11, %v1463_v13  ;;  %v6181_v47 = vcombine.high %v1460_v14, %v1464_v15  ;;  %v1511_v1 = vld [vmem:[%s7127_s8 + $0xf20] sm:$0xff]  ;;  %v1512_v3 = vld [vmem:[%s7127_s8 + $0xf28] sm:$0xff] }
 0x28f   : > { %4282 = vmatpush1.bf16.msra.mxu0 %v6122_v25  ;;  %4446 = vmatpush1.bf16.msra.mxu1 %v6124_v26  ;;  %v6178_v25 = vcombine.low %v1459_v11, %v1463_v13  ;;  %v6180_v26 = vcombine.low %v1460_v14, %v1464_v15  ;;  %v1515_v11 = vld [vmem:[%s7127_s8 + $0xf40] sm:$0xff]  ;;  %v1516_v14 = vld [vmem:[%s7127_s8 + $0xf48] sm:$0xff] }
 0x290   : > { %4292 = vmatprep.subr.bf16.mxu0 %v6131_v10  ;;  %4456 = vmatprep.subr.bf16.mxu1 %v6133_v28  ;;  %v6187_v10 = vcombine.high %v1467_v21, %v1471_v22  ;;  %v6189_v28 = vcombine.high %v1468_v23, %v1472_v24  ;;  %v1519_v13 = vld [vmem:[%s7127_s8 + $0xf60] sm:$0xff]  ;;  %v1520_v15 = vld [vmem:[%s7127_s8 + $0xf68] sm:$0xff] }
 0x292   : > { %4284 = vmatmul.mubr.bf16.vlgmr.msra.gmra.mrb[0].mxu0 %v7397_v31  ;;  %4448 = vmatmul.mubr.bf16.vlgmr.msra.gmra.mrb[0].mxu1 %v7397_v31 }
 0x293   : > { %4293 = vmatpush1.bf16.msra.mxu0 %v6130_v35  ;;  %4457 = vmatpush1.bf16.msra.mxu1 %v6132_v36  ;;  %v6186_v35 = vcombine.low %v1467_v21, %v1471_v22  ;;  %v6188_v36 = vcombine.low %v1468_v23, %v1472_v24  ;;  %v1523_v21 = vld [vmem:[%s7127_s8 + $0xf80] sm:$0xff]  ;;  %v1524_v23 = vld [vmem:[%s7127_s8 + $0xf88] sm:$0xff] }
 0x294   : > { %4294 = vmatprep.subr.bf16.mxu0 %v6139_v37  ;;  %4458 = vmatprep.subr.bf16.mxu1 %v6141_v38  ;;  %v6195_v37 = vcombine.high %v1475_v29, %v1479_v30  ;;  %v6197_v38 = vcombine.high %v1476_v32, %v1480_v33  ;;  %v1527_v22 = vld [vmem:[%s7127_s8 + $0xfa0] sm:$0xff]  ;;  %v1528_v24 = vld [vmem:[%s7127_s8 + $0xfa8] sm:$0xff] }
 0x295   : > { %4324 = vmatprep.mubr.bf16.mxu0 %v7407_v20  ;;  %4488 = vmatprep.mubr.bf16.mxu1 %v7407_v20 }
 0x297   : > { %4295 = vmatpush1.bf16.msra.mxu0 %v6138_v42  ;;  %4459 = vmatpush1.bf16.msra.mxu1 %v6140_v43  ;;  %v6194_v42 = vcombine.low %v1475_v29, %v1479_v30  ;;  %v6196_v43 = vcombine.low %v1476_v32, %v1480_v33  ;;  %v1531_v29 = vld [vmem:[%s7127_s8 + $0xfc0] sm:$0xff]  ;;  %v1532_v32 = vld [vmem:[%s7127_s8 + $0xfc8] sm:$0xff] }
 0x298   : > { %4296 = vmatprep.subr.bf16.mxu0 %v6147_v44  ;;  %4460 = vmatprep.subr.bf16.mxu1 %v6149_v45  ;;  %v6203_v44 = vcombine.high %v1483_v39, %v1487_v8  ;;  %v6205_v45 = vcombine.high %v1484_v40, %v1488_v41  ;;  %v1535_v30 = vld [vmem:[%s7127_s8 + $0xfe0] sm:$0xff]  ;;  %v1536_v33 = vld [vmem:[%s7127_s8 + $0xfe8] sm:$0xff] }
 0x29b   : > { %4297 = vmatpush1.bf16.msra.mxu0 %v6146_v52  ;;  %4461 = vmatpush1.bf16.msra.mxu1 %v6148_v53  ;;  %v6202_v52 = vcombine.low %v1483_v39, %v1487_v8  ;;  %v6204_v53 = vcombine.low %v1484_v40, %v1488_v41  ;;  %v1029_v39 = vld [vmem:[%s7127_s8 + $0x10] sm:$0xff]  ;;  %v1030_v40 = vld [vmem:[%s7127_s8 + $0x18] sm:$0xff] }
 0x29c   : > { %4298 = vmatprep.subr.bf16.mxu0 %v6155_v54  ;;  %4462 = vmatprep.subr.bf16.mxu1 %v6157_v55  ;;  %v6211_v54 = vcombine.high %v1491_v46, %v1495_v48  ;;  %v6213_v55 = vcombine.high %v1492_v49, %v1496_v50  ;;  %v1033_v8 = vld [vmem:[%s7127_s8 + $0x30] sm:$0xff]  ;;  %v1034_v41 = vld [vmem:[%s7127_s8 + $0x38] sm:$0xff] }
 0x29f   : > { %4299 = vmatpush1.bf16.msra.mxu0 %v6154_v60  ;;  %4463 = vmatpush1.bf16.msra.mxu1 %v6156_v61  ;;  %v6210_v60 = vcombine.low %v1491_v46, %v1495_v48  ;;  %v6212_v61 = vcombine.low %v1492_v49, %v1496_v50  ;;  %v1037_v46 = vld [vmem:[%s7127_s8 + $0x50] sm:$0xff]  ;;  %v7475_v49 = vcombine.low %v7401_v34, %v7401_v34  ;;  %v1038_v50 = vld [vmem:[%s7127_s8 + $0x58] sm:$0xff] }
 0x2a0   : > { %4300 = vmatprep.subr.bf16.mxu0 %v6163_v62  ;;  %4464 = vmatprep.subr.bf16.mxu1 %v6165_v63  ;;  %v6219_v62 = vcombine.high %v1499_v56, %v1503_v57  ;;  %v6221_v63 = vcombine.high %v1500_v58, %v1504_v59  ;;  %v1041_v48 = vld [vmem:[%s7127_s8 + $0x70] sm:$0xff]  ;;  %v1046_v34 = vld [vmem:[%s7127_s8 + $0x98] sm:$0xff] }
 0x2a3   : > { %4301 = vmatpush1.bf16.msra.mxu0 %v6162_v4  ;;  %4465 = vmatpush1.bf16.msra.mxu1 %v6164_v5  ;;  %v6218_v4 = vcombine.low %v1499_v56, %v1503_v57  ;;  %v6220_v5 = vcombine.low %v1500_v58, %v1504_v59  ;;  %v1045_v57 = vld [vmem:[%s7127_s8 + $0x90] sm:$0xff]  ;;  %v1050_v59 = vld [vmem:[%s7127_s8 + $0xb8] sm:$0xff] }
 0x2a4   : > { %4302 = vmatprep.subr.bf16.mxu0 %v6171_v7  ;;  %4466 = vmatprep.subr.bf16.mxu1 %v6173_v9  ;;  %v6227_v7 = vcombine.high %v1507_v0, %v1511_v1  ;;  %v6229_v9 = vcombine.high %v1508_v2, %v1512_v3  ;;  %v1049_v58 = vld [vmem:[%s7127_s8 + $0xb0] sm:$0xff] }
 0x2a7   : > { %4303 = vmatpush1.bf16.msra.mxu0 %v6170_v16  ;;  %4467 = vmatpush1.bf16.msra.mxu1 %v6172_v17  ;;  %v6226_v16 = vcombine.low %v1507_v0, %v1511_v1  ;;  %v6228_v17 = vcombine.low %v1508_v2, %v1512_v3  ;;  %v1053_v0 = vld [vmem:[%s7127_s8 + $0xd0] sm:$0xff]  ;;  %v1054_v2 = vld [vmem:[%s7127_s8 + $0xd8] sm:$0xff] }
 0x2a8   : > { %4304 = vmatprep.subr.bf16.mxu0 %v6179_v18  ;;  %4468 = vmatprep.subr.bf16.mxu1 %v6181_v47  ;;  %v6235_v18 = vcombine.high %v1515_v11, %v1519_v13  ;;  %v6237_v47 = vcombine.high %v1516_v14, %v1520_v15  ;;  %v1057_v1 = vld [vmem:[%s7127_s8 + $0xf0] sm:$0xff]  ;;  %v1058_v3 = vld [vmem:[%s7127_s8 + $0xf8] sm:$0xff] }
 0x2ab   : > { %4305 = vmatpush1.bf16.msra.mxu0 %v6178_v25  ;;  %4469 = vmatpush1.bf16.msra.mxu1 %v6180_v26  ;;  %v6234_v25 = vcombine.low %v1515_v11, %v1519_v13  ;;  %v6236_v26 = vcombine.low %v1516_v14, %v1520_v15  ;;  %v1061_v11 = vld [vmem:[%s7127_s8 + $0x110] sm:$0xff]  ;;  %v1062_v14 = vld [vmem:[%s7127_s8 + $0x118] sm:$0xff] }
 0x2ac   : > { %4306 = vmatprep.subr.bf16.mxu0 %v6187_v10  ;;  %4470 = vmatprep.subr.bf16.mxu1 %v6189_v28  ;;  %v6243_v10 = vcombine.high %v1523_v21, %v1527_v22  ;;  %v6245_v28 = vcombine.high %v1524_v23, %v1528_v24  ;;  %v1065_v13 = vld [vmem:[%s7127_s8 + $0x130] sm:$0xff]  ;;  %v1066_v15 = vld [vmem:[%s7127_s8 + $0x138] sm:$0xff] }
 0x2af   : > { %4307 = vmatpush1.bf16.msra.mxu0 %v6186_v35  ;;  %4471 = vmatpush1.bf16.msra.mxu1 %v6188_v36  ;;  %v6242_v35 = vcombine.low %v1523_v21, %v1527_v22  ;;  %v6244_v36 = vcombine.low %v1524_v23, %v1528_v24  ;;  %v1073_v21 = vld [vmem:[%s7127_s8 + $0x170] sm:$0xff]  ;;  %v1070_v22 = vld [vmem:[%s7127_s8 + $0x158] sm:$0xff]  ;;  %v5782_v24 = vcombine.low %v1061_v11, %v1065_v13 }
 0x2b0   : > { %4308 = vmatprep.subr.bf16.mxu0 %v6195_v37  ;;  %4472 = vmatprep.subr.bf16.mxu1 %v6197_v38  ;;  %v6251_v37 = vcombine.high %v1531_v29, %v1535_v30  ;;  %v6253_v38 = vcombine.high %v1532_v32, %v1536_v33  ;;  %v1074_v23 = vld [vmem:[%s7127_s8 + $0x178] sm:$0xff] }
 0x2b3   : > { %4309 = vmatpush1.bf16.msra.mxu0 %v6194_v42  ;;  %4473 = vmatpush1.bf16.msra.mxu1 %v6196_v43  ;;  %v6250_v42 = vcombine.low %v1531_v29, %v1535_v30  ;;  %v6252_v43 = vcombine.low %v1532_v32, %v1536_v33  ;;  %v1081_v29 = vld [vmem:[%s7127_s8 + $0x1b0] sm:$0xff]  ;;  %v1078_v30 = vld [vmem:[%s7127_s8 + $0x198] sm:$0xff] }
 0x2b4   : > { %4310 = vmatprep.subr.bf16.mxu0 %v6203_v44  ;;  %4474 = vmatprep.subr.bf16.mxu1 %v6205_v45  ;;  %v5751_v44 = vcombine.high %v1029_v39, %v1033_v8  ;;  %v5753_v45 = vcombine.high %v1030_v40, %v1034_v41  ;;  %v1082_v32 = vld [vmem:[%s7127_s8 + $0x1b8] sm:$0xff] }
 0x2b7   : > { %4311 = vmatpush1.bf16.msra.mxu0 %v6202_v52  ;;  %4475 = vmatpush1.bf16.msra.mxu1 %v6204_v53  ;;  %v1042_v52 = vld [vmem:[%s7127_s8 + $0x78] sm:$0xff]  ;;  %v5750_v53 = vcombine.low %v1029_v39, %v1033_v8  ;;  %v1089_v39 = vld [vmem:[%s7127_s8 + $0x1f0] sm:$0xff] }
 0x2b8   : > { %4312 = vmatprep.subr.bf16.mxu0 %v6211_v54  ;;  %4476 = vmatprep.subr.bf16.mxu1 %v6213_v55  ;;  %v5752_v54 = vcombine.low %v1030_v40, %v1034_v41  ;;  %v5759_v55 = vcombine.high %v1037_v46, %v1041_v48  ;;  %v5761_v56 = vcombine.high %v1038_v50, %v1042_v52  ;;  %v1086_v8 = vld [vmem:[%s7127_s8 + $0x1d8] sm:$0xff] }
 0x2b9   : > { %v1090_v40 = vld [vmem:[%s7127_s8 + $0x1f8] sm:$0xff] }
 0x2bb   : > { %4313 = vmatpush1.bf16.msra.mxu0 %v6210_v60  ;;  %4477 = vmatpush1.bf16.msra.mxu1 %v6212_v61  ;;  %v5758_v60 = vcombine.low %v1037_v46, %v1041_v48  ;;  %v5760_v61 = vcombine.low %v1038_v50, %v1042_v52  ;;  %v1097_v46 = vld [vmem:[%s7127_s8 + $0x230] sm:$0xff]  ;;  %v1094_v48 = vld [vmem:[%s7127_s8 + $0x218] sm:$0xff] }
 0x2bc   : > { %4314 = vmatprep.subr.bf16.mxu0 %v6219_v62  ;;  %4478 = vmatprep.subr.bf16.mxu1 %v6221_v63  ;;  %v5767_v62 = vcombine.high %v1045_v57, %v1049_v58  ;;  %v5769_v63 = vcombine.high %v1046_v34, %v1050_v59  ;;  %v1098_v50 = vld [vmem:[%s7127_s8 + $0x238] sm:$0xff] }
 0x2bf   : > { %4315 = vmatpush1.bf16.msra.mxu0 %v6218_v4  ;;  %4479 = vmatpush1.bf16.msra.mxu1 %v6220_v5  ;;  %v5766_v4 = vcombine.low %v1045_v57, %v1049_v58  ;;  %v5768_v5 = vcombine.low %v1046_v34, %v1050_v59  ;;  %v1105_v57 = vld [vmem:[%s7127_s8 + $0x270] sm:$0xff]  ;;  %v1102_v58 = vld [vmem:[%s7127_s8 + $0x258] sm:$0xff] }
 0x2c0   : > { %4316 = vmatprep.subr.bf16.mxu0 %v6227_v7  ;;  %4480 = vmatprep.subr.bf16.mxu1 %v6229_v9  ;;  %v5775_v7 = vcombine.high %v1053_v0, %v1057_v1  ;;  %v5777_v9 = vcombine.high %v1054_v2, %v1058_v3  ;;  %v1106_v34 = vld [vmem:[%s7127_s8 + $0x278] sm:$0xff] }
 0x2c3   : > { %4317 = vmatpush1.bf16.msra.mxu0 %v6226_v16  ;;  %4481 = vmatpush1.bf16.msra.mxu1 %v6228_v17  ;;  %v5774_v16 = vcombine.low %v1053_v0, %v1057_v1  ;;  %v5783_v17 = vcombine.high %v1061_v11, %v1065_v13  ;;  %v1113_v0 = vld [vmem:[%s7127_s8 + $0x2b0] sm:$0xff]  ;;  %v1110_v1 = vld [vmem:[%s7127_s8 + $0x298] sm:$0xff] }
 0x2c4   : > { %4318 = vmatprep.subr.bf16.mxu0 %v6235_v18  ;;  %4482 = vmatprep.subr.bf16.mxu1 %v6237_v47  ;;  %v5785_v18 = vcombine.high %v1062_v14, %v1066_v15  ;;  %v1069_v47 = vld [vmem:[%s7127_s8 + $0x150] sm:$0xff]  ;;  %v1118_v13 = vld [vmem:[%s7127_s8 + $0x2d8] sm:$0xff] }
 0x2c5   : > { %v5790_v33 = vcombine.low %v1069_v47, %v1073_v21  ;;  %v1121_v11 = vld [vmem:[%s7127_s8 + $0x2f0] sm:$0xff] }
 0x2c7   : > { %4319 = vmatpush1.bf16.msra.mxu0 %v6234_v25  ;;  %4483 = vmatpush1.bf16.msra.mxu1 %v6236_v26  ;;  %v5784_v25 = vcombine.low %v1062_v14, %v1066_v15  ;;  %v5791_v26 = vcombine.high %v1069_v47, %v1073_v21  ;;  %v1122_v14 = vld [vmem:[%s7127_s8 + $0x2f8] sm:$0xff]  ;;  %v1129_v47 = vld [vmem:[%s7127_s8 + $0x330] sm:$0xff] }
 0x2c8   : > { %4320 = vmatprep.subr.bf16.mxu0 %v6243_v10  ;;  %4484 = vmatprep.subr.bf16.mxu1 %v6245_v28  ;;  %v5793_v10 = vcombine.high %v1070_v22, %v1074_v23  ;;  %v1077_v28 = vld [vmem:[%s7127_s8 + $0x190] sm:$0xff]  ;;  %v1126_v21 = vld [vmem:[%s7127_s8 + $0x318] sm:$0xff] }
 0x2c9   : > { %v5798_v41 = vcombine.low %v1077_v28, %v1081_v29 }
 0x2cb   : > { %4321 = vmatpush1.bf16.msra.mxu0 %v6242_v35  ;;  %4485 = vmatpush1.bf16.msra.mxu1 %v6244_v36  ;;  %v5792_v35 = vcombine.low %v1070_v22, %v1074_v23  ;;  %v5799_v36 = vcombine.high %v1077_v28, %v1081_v29  ;;  %v1130_v22 = vld [vmem:[%s7127_s8 + $0x338] sm:$0xff]  ;;  %v1137_v28 = vld [vmem:[%s7127_s8 + $0x370] sm:$0xff] }
 0x2cc   : > { %4322 = vmatprep.subr.bf16.mxu0 %v6251_v37  ;;  %4486 = vmatprep.subr.bf16.mxu1 %v6253_v38  ;;  %v5801_v37 = vcombine.high %v1078_v30, %v1082_v32  ;;  %v1085_v38 = vld [vmem:[%s7127_s8 + $0x1d0] sm:$0xff]  ;;  %v1134_v29 = vld [vmem:[%s7127_s8 + $0x358] sm:$0xff] }
 0x2cd   : > { %v5806_v52 = vcombine.low %v1085_v38, %v1089_v39 }
 0x2cf   : > { %4323 = vmatpush1.bf16.msra.mxu0 %v6250_v42  ;;  %4487 = vmatpush1.bf16.msra.mxu1 %v6252_v43  ;;  %v5800_v42 = vcombine.low %v1078_v30, %v1082_v32  ;;  %v5807_v43 = vcombine.high %v1085_v38, %v1089_v39  ;;  %v1138_v30 = vld [vmem:[%s7127_s8 + $0x378] sm:$0xff]  ;;  %v1145_v38 = vld [vmem:[%s7127_s8 + $0x3b0] sm:$0xff] }
 0x2d0   : > { %4497 = vmatprep.subr.bf16.mxu0 %v5751_v44  ;;  %4661 = vmatprep.subr.bf16.mxu1 %v5753_v45  ;;  %v5809_v44 = vcombine.high %v1086_v8, %v1090_v40  ;;  %v1093_v45 = vld [vmem:[%s7127_s8 + $0x210] sm:$0xff]  ;;  %v1142_v39 = vld [vmem:[%s7127_s8 + $0x398] sm:$0xff] }
 0x2d1   : > { %v5814_v59 = vcombine.low %v1093_v45, %v1097_v46 }
 0x2d2   : > { %4325 = vmatmul.mubr.bf16.vlgmr.msra.gmra.mrb[0].mxu0 %v7475_v49  ;;  %4489 = vmatmul.mubr.bf16.vlgmr.msra.gmra.mrb[0].mxu1 %v7475_v49 }
 0x2d3   : > { %4498 = vmatpush1.bf16.msra.mxu0 %v5750_v53  ;;  %4662 = vmatpush1.bf16.msra.mxu1 %v5752_v54  ;;  %v5808_v53 = vcombine.low %v1086_v8, %v1090_v40  ;;  %v5815_v54 = vcombine.high %v1093_v45, %v1097_v46  ;;  %v1146_v8 = vld [vmem:[%s7127_s8 + $0x3b8] sm:$0xff]  ;;  %v1153_v45 = vld [vmem:[%s7127_s8 + $0x3f0] sm:$0xff] }
 0x2d4   : > { %4499 = vmatprep.subr.bf16.mxu0 %v5759_v55  ;;  %4663 = vmatprep.subr.bf16.mxu1 %v5761_v56  ;;  %v5817_v55 = vcombine.high %v1094_v48, %v1098_v50  ;;  %v1101_v56 = vld [vmem:[%s7127_s8 + $0x250] sm:$0xff]  ;;  %v1150_v46 = vld [vmem:[%s7127_s8 + $0x3d8] sm:$0xff] }
 0x2d5   : > { %4529 = vmatprep.mubr.bf16.mxu0 %v7195_v51  ;;  %4693 = vmatprep.mubr.bf16.mxu1 %v7195_v51  ;;  %v5776_v51 = vcombine.low %v1054_v2, %v1058_v3  ;;  %v1114_v2 = vld [vmem:[%s7127_s8 + $0x2b8] sm:$0xff]  ;;  %v5822_v3 = vcombine.low %v1101_v56, %v1105_v57 }
 0x2d7   : > { %4500 = vmatpush1.bf16.msra.mxu0 %v5758_v60  ;;  %4664 = vmatpush1.bf16.msra.mxu1 %v5760_v61  ;;  %v5816_v60 = vcombine.low %v1094_v48, %v1098_v50  ;;  %v5823_v61 = vcombine.high %v1101_v56, %v1105_v57  ;;  %v1154_v48 = vld [vmem:[%s7127_s8 + $0x3f8] sm:$0xff]  ;;  %v1161_v56 = vld [vmem:[%s7127_s8 + $0x430] sm:$0xff] }
 0x2d8   : > { %4501 = vmatprep.subr.bf16.mxu0 %v5767_v62  ;;  %4665 = vmatprep.subr.bf16.mxu1 %v5769_v63  ;;  %v5825_v62 = vcombine.high %v1102_v58, %v1106_v34  ;;  %v1109_v63 = vld [vmem:[%s7127_s8 + $0x290] sm:$0xff]  ;;  %v1158_v57 = vld [vmem:[%s7127_s8 + $0x418] sm:$0xff] }
 0x2d9   : > { %v5830_v15 = vcombine.low %v1109_v63, %v1113_v0 }
 0x2db   : > { %4502 = vmatpush1.bf16.msra.mxu0 %v5766_v4  ;;  %4666 = vmatpush1.bf16.msra.mxu1 %v5768_v5  ;;  %v5824_v4 = vcombine.low %v1102_v58, %v1106_v34  ;;  %v5831_v5 = vcombine.high %v1109_v63, %v1113_v0  ;;  %v1162_v58 = vld [vmem:[%s7127_s8 + $0x438] sm:$0xff]  ;;  %v1169_v63 = vld [vmem:[%s7127_s8 + $0x470] sm:$0xff] }
 0x2dc   : > { %4503 = vmatprep.subr.bf16.mxu0 %v5775_v7  ;;  %4667 = vmatprep.subr.bf16.mxu1 %v5777_v9  ;;  %v5833_v7 = vcombine.high %v1110_v1, %v1114_v2  ;;  %v1117_v9 = vld [vmem:[%s7127_s8 + $0x2d0] sm:$0xff]  ;;  %v1166_v0 = vld [vmem:[%s7127_s8 + $0x458] sm:$0xff] }
 0x2dd   : > { %v5838_v23 = vcombine.low %v1117_v9, %v1121_v11 }
 0x2df   : > { %4504 = vmatpush1.bf16.msra.mxu0 %v5774_v16  ;;  %4668 = vmatpush1.bf16.msra.mxu1 %v5776_v51  ;;  %v5832_v16 = vcombine.low %v1110_v1, %v1114_v2  ;;  %v5839_v51 = vcombine.high %v1117_v9, %v1121_v11  ;;  %v1170_v1 = vld [vmem:[%s7127_s8 + $0x478] sm:$0xff]  ;;  %v1177_v9 = vld [vmem:[%s7127_s8 + $0x4b0] sm:$0xff] }
 0x2e0   : > { %4505 = vmatprep.subr.bf16.mxu0 %v5783_v17  ;;  %4669 = vmatprep.subr.bf16.mxu1 %v5785_v18  ;;  %v5841_v17 = vcombine.high %v1118_v13, %v1122_v14  ;;  %v1125_v18 = vld [vmem:[%s7127_s8 + $0x310] sm:$0xff]  ;;  %v1174_v11 = vld [vmem:[%s7127_s8 + $0x498] sm:$0xff] }
 0x2e1   : > { %v5846_v32 = vcombine.low %v1125_v18, %v1129_v47 }
 0x2e3   : > { %4506 = vmatpush1.bf16.msra.mxu0 %v5782_v24  ;;  %4670 = vmatpush1.bf16.msra.mxu1 %v5784_v25  ;;  %v5840_v24 = vcombine.low %v1118_v13, %v1122_v14  ;;  %v5847_v25 = vcombine.high %v1125_v18, %v1129_v47  ;;  %v1178_v13 = vld [vmem:[%s7127_s8 + $0x4b8] sm:$0xff]  ;;  %v1185_v18 = vld [vmem:[%s7127_s8 + $0x4f0] sm:$0xff] }
 0x2e4   : > { %4507 = vmatprep.subr.bf16.mxu0 %v5791_v26  ;;  %4671 = vmatprep.subr.bf16.mxu1 %v5793_v10  ;;  %v5849_v26 = vcombine.high %v1126_v21, %v1130_v22  ;;  %v1133_v10 = vld [vmem:[%s7127_s8 + $0x350] sm:$0xff]  ;;  %v1182_v47 = vld [vmem:[%s7127_s8 + $0x4d8] sm:$0xff] }
 0x2e5   : > { %v5854_v40 = vcombine.low %v1133_v10, %v1137_v28 }
 0x2e7   : > { %4508 = vmatpush1.bf16.msra.mxu0 %v5790_v33  ;;  %4672 = vmatpush1.bf16.msra.mxu1 %v5792_v35  ;;  %v5848_v33 = vcombine.low %v1126_v21, %v1130_v22  ;;  %v5855_v35 = vcombine.high %v1133_v10, %v1137_v28  ;;  %v1186_v21 = vld [vmem:[%s7127_s8 + $0x4f8] sm:$0xff]  ;;  %v5896_v22 = vcombine.low %v1174_v11, %v1178_v13 }
 0x2e8   : > { %4509 = vmatprep.subr.bf16.mxu0 %v5799_v36  ;;  %4673 = vmatprep.subr.bf16.mxu1 %v5801_v37  ;;  %v5857_v36 = vcombine.high %v1134_v29, %v1138_v30  ;;  %v1141_v37 = vld [vmem:[%s7127_s8 + $0x390] sm:$0xff]  ;;  %v1190_v10 = vld [vmem:[%s7127_s8 + $0x518] sm:$0xff] }
 0x2e9   : > { %v5862_v50 = vcombine.low %v1141_v37, %v1145_v38  ;;  %v1194_v28 = vld [vmem:[%s7127_s8 + $0x538] sm:$0xff] }
 0x2eb   : > { %4510 = vmatpush1.bf16.msra.mxu0 %v5798_v41  ;;  %4674 = vmatpush1.bf16.msra.mxu1 %v5800_v42  ;;  %v5856_v41 = vcombine.low %v1134_v29, %v1138_v30  ;;  %v5863_v42 = vcombine.high %v1141_v37, %v1145_v38  ;;  %v1202_v37 = vld [vmem:[%s7127_s8 + $0x578] sm:$0xff] }
 0x2ec   : > { %4511 = vmatprep.subr.bf16.mxu0 %v5807_v43  ;;  %4675 = vmatprep.subr.bf16.mxu1 %v5809_v44  ;;  %v5865_v43 = vcombine.high %v1142_v39, %v1146_v8  ;;  %v1149_v44 = vld [vmem:[%s7127_s8 + $0x3d0] sm:$0xff] }
 0x2ed   : > { %v5870_v34 = vcombine.low %v1149_v44, %v1153_v45 }
 0x2ef   : > { %4512 = vmatpush1.bf16.msra.mxu0 %v5806_v52  ;;  %4676 = vmatpush1.bf16.msra.mxu1 %v5808_v53  ;;  %v5864_v52 = vcombine.low %v1142_v39, %v1146_v8  ;;  %v5871_v53 = vcombine.high %v1149_v44, %v1153_v45  ;;  %v5912_v39 = vcombine.low %v1190_v10, %v1194_v28  ;;  %v1210_v44 = vld [vmem:[%s7127_s8 + $0x5b8] sm:$0xff] }
 0x2f0   : > { %4513 = vmatprep.subr.bf16.mxu0 %v5815_v54  ;;  %4677 = vmatprep.subr.bf16.mxu1 %v5817_v55  ;;  %v5873_v54 = vcombine.high %v1150_v46, %v1154_v48  ;;  %v1157_v55 = vld [vmem:[%s7127_s8 + $0x410] sm:$0xff] }
 0x2f1   : > { %v5878_v2 = vcombine.low %v1157_v55, %v1161_v56 }
 0x2f3   : > { %4514 = vmatpush1.bf16.msra.mxu0 %v5814_v59  ;;  %4678 = vmatpush1.bf16.msra.mxu1 %v5816_v60  ;;  %v5872_v59 = vcombine.low %v1150_v46, %v1154_v48  ;;  %v5879_v60 = vcombine.high %v1157_v55, %v1161_v56  ;;  %v1218_v55 = vld [vmem:[%s7127_s8 + $0x5f8] sm:$0xff] }
 0x2f4   : > { %4515 = vmatprep.subr.bf16.mxu0 %v5823_v61  ;;  %4679 = vmatprep.subr.bf16.mxu1 %v5825_v62  ;;  %v5881_v61 = vcombine.high %v1158_v57, %v1162_v58  ;;  %v1165_v62 = vld [vmem:[%s7127_s8 + $0x450] sm:$0xff] }
 0x2f5   : > { %v5886_v14 = vcombine.low %v1165_v62, %v1169_v63 }
 0x2f7   : > { %4516 = vmatpush1.bf16.msra.mxu0 %v5822_v3  ;;  %4680 = vmatpush1.bf16.msra.mxu1 %v5824_v4  ;;  %v5880_v3 = vcombine.low %v1158_v57, %v1162_v58  ;;  %v5887_v4 = vcombine.high %v1165_v62, %v1169_v63  ;;  %v1226_v62 = vld [vmem:[%s7127_s8 + $0x638] sm:$0xff] }
 0x2f8   : > { %4517 = vmatprep.subr.bf16.mxu0 %v5831_v5  ;;  %4681 = vmatprep.subr.bf16.mxu1 %v5833_v7  ;;  %v5889_v5 = vcombine.high %v1166_v0, %v1170_v1  ;;  %v1173_v7 = vld [vmem:[%s7127_s8 + $0x490] sm:$0xff] }
 0x2fb   : > { %4518 = vmatpush1.bf16.msra.mxu0 %v5830_v15  ;;  %4682 = vmatpush1.bf16.msra.mxu1 %v5832_v16  ;;  %v5888_v15 = vcombine.low %v1166_v0, %v1170_v1  ;;  %v5895_v16 = vcombine.high %v1173_v7, %v1177_v9 }
 0x2fc   : > { %4519 = vmatprep.subr.bf16.mxu0 %v5839_v51  ;;  %4683 = vmatprep.subr.bf16.mxu1 %v5841_v17  ;;  %v5897_v51 = vcombine.high %v1174_v11, %v1178_v13  ;;  %v1181_v17 = vld [vmem:[%s7127_s8 + $0x4d0] sm:$0xff] }
 0x2fd   : > { %v5902_v29 = vcombine.low %v1181_v17, %v1185_v18 }
 0x2ff   : > { %4520 = vmatpush1.bf16.msra.mxu0 %v5838_v23  ;;  %4684 = vmatpush1.bf16.msra.mxu1 %v5840_v24  ;;  %v5903_v23 = vcombine.high %v1181_v17, %v1185_v18  ;;  %v5905_v24 = vcombine.high %v1182_v47, %v1186_v21  ;;  %v1242_v17 = vld [vmem:[%s7127_s8 + $0x6b8] sm:$0xff] }
 0x300   : > { %4521 = vmatprep.subr.bf16.mxu0 %v5847_v25  ;;  %4685 = vmatprep.subr.bf16.mxu1 %v5849_v26  ;;  %v1189_v25 = vld [vmem:[%s7127_s8 + $0x510] sm:$0xff] }
 0x301   : > { %v1193_v26 = vld [vmem:[%s7127_s8 + $0x530] sm:$0xff] }
 0x302   : > { %v5911_v30 = vcombine.high %v1189_v25, %v1193_v26  ;;  %v5910_v38 = vcombine.low %v1189_v25, %v1193_v26  ;;  %v1250_v25 = vld [vmem:[%s7127_s8 + $0x6f8] sm:$0xff] }
 0x303   : > { %4522 = vmatpush1.bf16.msra.mxu0 %v5846_v32  ;;  %4686 = vmatpush1.bf16.msra.mxu1 %v5848_v33  ;;  %v5913_v32 = vcombine.high %v1190_v10, %v1194_v28  ;;  %v1197_v33 = vld [vmem:[%s7127_s8 + $0x550] sm:$0xff] }
 0x304   : > { %4523 = vmatprep.subr.bf16.mxu0 %v5855_v35  ;;  %4687 = vmatprep.subr.bf16.mxu1 %v5857_v36  ;;  %v1201_v35 = vld [vmem:[%s7127_s8 + $0x570] sm:$0xff]  ;;  %v1198_v36 = vld [vmem:[%s7127_s8 + $0x558] sm:$0xff] }
 0x305   : > { %v5919_v8 = vcombine.high %v1197_v33, %v1201_v35  ;;  %v5918_v45 = vcombine.low %v1197_v33, %v1201_v35  ;;  %v5920_v46 = vcombine.low %v1198_v36, %v1202_v37  ;;  %v1258_v33 = vld [vmem:[%s7127_s8 + $0x738] sm:$0xff] }
 0x307   : > { %4524 = vmatpush1.bf16.msra.mxu0 %v5854_v40  ;;  %4688 = vmatpush1.bf16.msra.mxu1 %v5856_v41  ;;  %v5921_v40 = vcombine.high %v1198_v36, %v1202_v37  ;;  %v1205_v41 = vld [vmem:[%s7127_s8 + $0x590] sm:$0xff] }
 0x308   : > { %4525 = vmatprep.subr.bf16.mxu0 %v5863_v42  ;;  %4689 = vmatprep.subr.bf16.mxu1 %v5865_v43  ;;  %v1209_v42 = vld [vmem:[%s7127_s8 + $0x5b0] sm:$0xff]  ;;  %v1206_v43 = vld [vmem:[%s7127_s8 + $0x598] sm:$0xff] }
 0x309   : > { %v5927_v48 = vcombine.high %v1205_v41, %v1209_v42  ;;  %v5926_v56 = vcombine.low %v1205_v41, %v1209_v42  ;;  %v5928_v57 = vcombine.low %v1206_v43, %v1210_v44  ;;  %v1266_v41 = vld [vmem:[%s7127_s8 + $0x778] sm:$0xff] }
 0x30b   : > { %4526 = vmatpush1.bf16.msra.mxu0 %v5862_v50  ;;  %4690 = vmatpush1.bf16.msra.mxu1 %v5864_v52  ;;  %v5929_v50 = vcombine.high %v1206_v43, %v1210_v44  ;;  %v1213_v52 = vld [vmem:[%s7127_s8 + $0x5d0] sm:$0xff] }
 0x30c   : > { %4527 = vmatprep.subr.bf16.mxu0 %v5871_v53  ;;  %4691 = vmatprep.subr.bf16.mxu1 %v5873_v54  ;;  %v1217_v53 = vld [vmem:[%s7127_s8 + $0x5f0] sm:$0xff]  ;;  %v1214_v54 = vld [vmem:[%s7127_s8 + $0x5d8] sm:$0xff] }
 0x30d   : > { %v5935_v58 = vcombine.high %v1213_v52, %v1217_v53  ;;  %v5934_v63 = vcombine.low %v1213_v52, %v1217_v53  ;;  %v5936_v0 = vcombine.low %v1214_v54, %v1218_v55  ;;  %v1274_v52 = vld [vmem:[%s7127_s8 + $0x7b8] sm:$0xff] }
 0x30f   : > { %4528 = vmatpush1.bf16.msra.mxu0 %v5870_v34  ;;  %4692 = vmatpush1.bf16.msra.mxu1 %v5872_v59  ;;  %v5937_v34 = vcombine.high %v1214_v54, %v1218_v55  ;;  %v1221_v59 = vld [vmem:[%s7127_s8 + $0x610] sm:$0xff] }
 0x310   : > { %4538 = vmatprep.subr.bf16.mxu0 %v5879_v60  ;;  %4702 = vmatprep.subr.bf16.mxu1 %v5881_v61  ;;  %v1225_v60 = vld [vmem:[%s7127_s8 + $0x630] sm:$0xff]  ;;  %v1222_v61 = vld [vmem:[%s7127_s8 + $0x618] sm:$0xff] }
 0x311   : > { %v5943_v1 = vcombine.high %v1221_v59, %v1225_v60  ;;  %v5944_v11 = vcombine.low %v1222_v61, %v1226_v62 }
 0x312   : > { %4530 = vmatmul.mubr.bf16.vlgmr.msra.gmra.mrb[4].mxu0 %v7241_v6  ;;  %4694 = vmatmul.mubr.bf16.vlgmr.msra.gmra.mrb[4].mxu1 %v7241_v6  ;;  %v5894_v6 = vcombine.low %v1173_v7, %v1177_v9  ;;  %v1234_v7 = vld [vmem:[%s7127_s8 + $0x678] sm:$0xff]  ;;  %v5942_v9 = vcombine.low %v1221_v59, %v1225_v60 }
 0x313   : > { %4539 = vmatpush1.bf16.msra.mxu0 %v5878_v2  ;;  %4703 = vmatpush1.bf16.msra.mxu1 %v5880_v3  ;;  %v5945_v2 = vcombine.high %v1222_v61, %v1226_v62  ;;  %v1229_v3 = vld [vmem:[%s7127_s8 + $0x650] sm:$0xff]  ;;  %v1282_v59 = vld [vmem:[%s7127_s8 + $0x7f8] sm:$0xff] }
 0x314   : > { %4540 = vmatprep.subr.bf16.mxu0 %v5887_v4  ;;  %4704 = vmatprep.subr.bf16.mxu1 %v5889_v5  ;;  %v1233_v4 = vld [vmem:[%s7127_s8 + $0x670] sm:$0xff]  ;;  %v1230_v5 = vld [vmem:[%s7127_s8 + $0x658] sm:$0xff] }
 0x315   : > { %4570 = vmatprep.mubr.bf16.mxu0 %v7253_v19  ;;  %4734 = vmatprep.mubr.bf16.mxu1 %v7253_v19  ;;  %v5904_v19 = vcombine.low %v1182_v47, %v1186_v21  ;;  %v5951_v13 = vcombine.high %v1229_v3, %v1233_v4  ;;  %v5950_v18 = vcombine.low %v1229_v3, %v1233_v4  ;;  %v1290_v3 = vld [vmem:[%s7127_s8 + $0x838] sm:$0xff] }
 0x316   : > { %v5952_v47 = vcombine.low %v1230_v5, %v1234_v7 }
 0x317   : > { %4541 = vmatpush1.bf16.msra.mxu0 %v5886_v14  ;;  %4705 = vmatpush1.bf16.msra.mxu1 %v5888_v15  ;;  %v5953_v14 = vcombine.high %v1230_v5, %v1234_v7  ;;  %v1237_v15 = vld [vmem:[%s7127_s8 + $0x690] sm:$0xff] }
 0x318   : > { %4542 = vmatprep.subr.bf16.mxu0 %v5895_v16  ;;  %4706 = vmatprep.subr.bf16.mxu1 %v5897_v51  ;;  %v1241_v16 = vld [vmem:[%s7127_s8 + $0x6b0] sm:$0xff]  ;;  %v1238_v51 = vld [vmem:[%s7127_s8 + $0x698] sm:$0xff] }
 0x319   : > { %v5959_v21 = vcombine.high %v1237_v15, %v1241_v16  ;;  %v5958_v26 = vcombine.low %v1237_v15, %v1241_v16  ;;  %v5960_v10 = vcombine.low %v1238_v51, %v1242_v17  ;;  %v1298_v15 = vld [vmem:[%s7127_s8 + $0x878] sm:$0xff] }
 0x31b   : > { %4543 = vmatpush1.bf16.msra.mxu0 %v5894_v6  ;;  %4707 = vmatpush1.bf16.msra.mxu1 %v5896_v22  ;;  %v5961_v6 = vcombine.high %v1238_v51, %v1242_v17  ;;  %v1245_v22 = vld [vmem:[%s7127_s8 + $0x6d0] sm:$0xff] }
 0x31c   : > { %4544 = vmatprep.subr.bf16.mxu0 %v5903_v23  ;;  %4708 = vmatprep.subr.bf16.mxu1 %v5905_v24  ;;  %v1249_v23 = vld [vmem:[%s7127_s8 + $0x6f0] sm:$0xff]  ;;  %v1246_v24 = vld [vmem:[%s7127_s8 + $0x6d8] sm:$0xff] }
 0x31d   : > { %v5967_v28 = vcombine.high %v1245_v22, %v1249_v23  ;;  %v5966_v35 = vcombine.low %v1245_v22, %v1249_v23  ;;  %v5968_v36 = vcombine.low %v1246_v24, %v1250_v25  ;;  %v1306_v22 = vld [vmem:[%s7127_s8 + $0x8b8] sm:$0xff] }
 0x31f   : > { %4545 = vmatpush1.bf16.msra.mxu0 %v5902_v29  ;;  %4709 = vmatpush1.bf16.msra.mxu1 %v5904_v19  ;;  %v5969_v29 = vcombine.high %v1246_v24, %v1250_v25  ;;  %v1253_v19 = vld [vmem:[%s7127_s8 + $0x710] sm:$0xff] }
 0x320   : > { %4546 = vmatprep.subr.bf16.mxu0 %v5911_v30  ;;  %4710 = vmatprep.subr.bf16.mxu1 %v5913_v32  ;;  %v1257_v30 = vld [vmem:[%s7127_s8 + $0x730] sm:$0xff]  ;;  %v1254_v32 = vld [vmem:[%s7127_s8 + $0x718] sm:$0xff] }
 0x321   : > { %v5975_v37 = vcombine.high %v1253_v19, %v1257_v30  ;;  %v5974_v42 = vcombine.low %v1253_v19, %v1257_v30  ;;  %v5976_v43 = vcombine.low %v1254_v32, %v1258_v33  ;;  %v1314_v19 = vld [vmem:[%s7127_s8 + $0x8f8] sm:$0xff] }
 0x323   : > { %4547 = vmatpush1.bf16.msra.mxu0 %v5910_v38  ;;  %4711 = vmatpush1.bf16.msra.mxu1 %v5912_v39  ;;  %v5977_v38 = vcombine.high %v1254_v32, %v1258_v33  ;;  %v1261_v39 = vld [vmem:[%s7127_s8 + $0x750] sm:$0xff] }
 0x324   : > { %4548 = vmatprep.subr.bf16.mxu0 %v5919_v8  ;;  %4712 = vmatprep.subr.bf16.mxu1 %v5921_v40  ;;  %v1265_v8 = vld [vmem:[%s7127_s8 + $0x770] sm:$0xff]  ;;  %v1262_v40 = vld [vmem:[%s7127_s8 + $0x758] sm:$0xff] }
 0x325   : > { %v5983_v44 = vcombine.high %v1261_v39, %v1265_v8  ;;  %v5982_v53 = vcombine.low %v1261_v39, %v1265_v8  ;;  %v5984_v54 = vcombine.low %v1262_v40, %v1266_v41 }
 0x327   : > { %4549 = vmatpush1.bf16.msra.mxu0 %v5918_v45  ;;  %4713 = vmatpush1.bf16.msra.mxu1 %v5920_v46  ;;  %v5985_v45 = vcombine.high %v1262_v40, %v1266_v41  ;;  %v1269_v46 = vld [vmem:[%s7127_s8 + $0x790] sm:$0xff] }
 0x328   : > { %4550 = vmatprep.subr.bf16.mxu0 %v5927_v48  ;;  %4714 = vmatprep.subr.bf16.mxu1 %v5929_v50  ;;  %v1273_v48 = vld [vmem:[%s7127_s8 + $0x7b0] sm:$0xff]  ;;  %v1270_v50 = vld [vmem:[%s7127_s8 + $0x798] sm:$0xff] }
 0x329   : > { %v5991_v55 = vcombine.high %v1269_v46, %v1273_v48  ;;  %v5990_v60 = vcombine.low %v1269_v46, %v1273_v48  ;;  %v5992_v61 = vcombine.low %v1270_v50, %v1274_v52  ;;  %v1325_v41 = vld [vmem:[%s7127_s8 + $0x950] sm:$0xff] }
 0x32b   : > { %4551 = vmatpush1.bf16.msra.mxu0 %v5926_v56  ;;  %4715 = vmatpush1.bf16.msra.mxu1 %v5928_v57  ;;  %v5993_v56 = vcombine.high %v1270_v50, %v1274_v52  ;;  %v1277_v57 = vld [vmem:[%s7127_s8 + $0x7d0] sm:$0xff] }
 0x32c   : > { %4552 = vmatprep.subr.bf16.mxu0 %v5935_v58  ;;  %4716 = vmatprep.subr.bf16.mxu1 %v5937_v34  ;;  %v1281_v58 = vld [vmem:[%s7127_s8 + $0x7f0] sm:$0xff]  ;;  %v1278_v34 = vld [vmem:[%s7127_s8 + $0x7d8] sm:$0xff] }
 0x32d   : > { %v5999_v62 = vcombine.high %v1277_v57, %v1281_v58  ;;  %v5998_v4 = vcombine.low %v1277_v57, %v1281_v58  ;;  %v6000_v5 = vcombine.low %v1278_v34, %v1282_v59  ;;  %v1333_v52 = vld [vmem:[%s7127_s8 + $0x990] sm:$0xff] }
 0x32f   : > { %4553 = vmatpush1.bf16.msra.mxu0 %v5934_v63  ;;  %4717 = vmatpush1.bf16.msra.mxu1 %v5936_v0  ;;  %v6001_v63 = vcombine.high %v1278_v34, %v1282_v59  ;;  %v1285_v0 = vld [vmem:[%s7127_s8 + $0x810] sm:$0xff] }
 0x330   : > { %4554 = vmatprep.subr.bf16.mxu0 %v5943_v1  ;;  %4718 = vmatprep.subr.bf16.mxu1 %v5945_v2  ;;  %v1289_v1 = vld [vmem:[%s7127_s8 + $0x830] sm:$0xff]  ;;  %v1286_v2 = vld [vmem:[%s7127_s8 + $0x818] sm:$0xff] }
 0x331   : > { %v6007_v7 = vcombine.high %v1285_v0, %v1289_v1  ;;  %v6006_v16 = vcombine.low %v1285_v0, %v1289_v1  ;;  %v6008_v51 = vcombine.low %v1286_v2, %v1290_v3  ;;  %v1341_v59 = vld [vmem:[%s7127_s8 + $0x9d0] sm:$0xff] }
 0x333   : > { %4555 = vmatpush1.bf16.msra.mxu0 %v5942_v9  ;;  %4719 = vmatpush1.bf16.msra.mxu1 %v5944_v11  ;;  %v6009_v9 = vcombine.high %v1286_v2, %v1290_v3  ;;  %v1293_v11 = vld [vmem:[%s7127_s8 + $0x850] sm:$0xff] }
 0x334   : > { %4556 = vmatprep.subr.bf16.mxu0 %v5951_v13  ;;  %4720 = vmatprep.subr.bf16.mxu1 %v5953_v14  ;;  %v1297_v13 = vld [vmem:[%s7127_s8 + $0x870] sm:$0xff]  ;;  %v1294_v14 = vld [vmem:[%s7127_s8 + $0x858] sm:$0xff] }
 0x335   : > { %v6015_v17 = vcombine.high %v1293_v11, %v1297_v13  ;;  %v6014_v23 = vcombine.low %v1293_v11, %v1297_v13  ;;  %v6016_v24 = vcombine.low %v1294_v14, %v1298_v15  ;;  %v1349_v3 = vld [vmem:[%s7127_s8 + $0xa10] sm:$0xff] }
 0x337   : > { %4557 = vmatpush1.bf16.msra.mxu0 %v5950_v18  ;;  %4721 = vmatpush1.bf16.msra.mxu1 %v5952_v47  ;;  %v6017_v18 = vcombine.high %v1294_v14, %v1298_v15  ;;  %v1301_v47 = vld [vmem:[%s7127_s8 + $0x890] sm:$0xff] }
 0x338   : > { %4558 = vmatprep.subr.bf16.mxu0 %v5959_v21  ;;  %4722 = vmatprep.subr.bf16.mxu1 %v5961_v6  ;;  %v1305_v21 = vld [vmem:[%s7127_s8 + $0x8b0] sm:$0xff]  ;;  %v1302_v6 = vld [vmem:[%s7127_s8 + $0x898] sm:$0xff] }
 0x339   : > { %v6023_v25 = vcombine.high %v1301_v47, %v1305_v21  ;;  %v6024_v30 = vcombine.low %v1302_v6, %v1306_v22  ;;  %v1357_v15 = vld [vmem:[%s7127_s8 + $0xa50] sm:$0xff] }
 0x33b   : > { %4559 = vmatpush1.bf16.msra.mxu0 %v5958_v26  ;;  %4723 = vmatpush1.bf16.msra.mxu1 %v5960_v10  ;;  %v6025_v26 = vcombine.high %v1302_v6, %v1306_v22  ;;  %v1309_v10 = vld [vmem:[%s7127_s8 + $0x8d0] sm:$0xff] }
 0x33c   : > { %4560 = vmatprep.subr.bf16.mxu0 %v5967_v28  ;;  %4724 = vmatprep.subr.bf16.mxu1 %v5969_v29  ;;  %v1313_v28 = vld [vmem:[%s7127_s8 + $0x8f0] sm:$0xff]  ;;  %v1310_v29 = vld [vmem:[%s7127_s8 + $0x8d8] sm:$0xff] }
 0x33d   : > { %v6031_v32 = vcombine.high %v1309_v10, %v1313_v28  ;;  %v6033_v33 = vcombine.high %v1310_v29, %v1314_v19  ;;  %v6030_v39 = vcombine.low %v1309_v10, %v1313_v28  ;;  %v1365_v22 = vld [vmem:[%s7127_s8 + $0xa90] sm:$0xff] }
 0x33f   : > { %4561 = vmatpush1.bf16.msra.mxu0 %v5966_v35  ;;  %4725 = vmatpush1.bf16.msra.mxu1 %v5968_v36  ;;  %v1317_v35 = vld [vmem:[%s7127_s8 + $0x910] sm:$0xff] }
 0x340   : > { %4562 = vmatprep.subr.bf16.mxu0 %v5975_v37  ;;  %4726 = vmatprep.subr.bf16.mxu1 %v5977_v38  ;;  %v1321_v36 = vld [vmem:[%s7127_s8 + $0x930] sm:$0xff]  ;;  %v1318_v37 = vld [vmem:[%s7127_s8 + $0x918] sm:$0xff] }
 0x341   : > { %v1322_v38 = vld [vmem:[%s7127_s8 + $0x938] sm:$0xff]  ;;  %v6039_v8 = vcombine.high %v1317_v35, %v1321_v36 }
 0x342   : > { %v6041_v40 = vcombine.high %v1318_v37, %v1322_v38  ;;  %v6040_v46 = vcombine.low %v1318_v37, %v1322_v38  ;;  %v1381_v38 = vld [vmem:[%s7127_s8 + $0xb10] sm:$0xff] }
 0x343   : > { %4563 = vmatpush1.bf16.msra.mxu0 %v5974_v42  ;;  %4727 = vmatpush1.bf16.msra.mxu1 %v5976_v43  ;;  %v1329_v42 = vld [vmem:[%s7127_s8 + $0x970] sm:$0xff]  ;;  %v1326_v43 = vld [vmem:[%s7127_s8 + $0x958] sm:$0xff] }
 0x344   : > { %4564 = vmatprep.subr.bf16.mxu0 %v5983_v44  ;;  %4728 = vmatprep.subr.bf16.mxu1 %v5985_v45  ;;  %v1330_v44 = vld [vmem:[%s7127_s8 + $0x978] sm:$0xff]  ;;  %v6038_v45 = vcombine.low %v1317_v35, %v1321_v36  ;;  %v6047_v48 = vcombine.high %v1325_v41, %v1329_v42 }
 0x345   : > { %v6049_v50 = vcombine.high %v1326_v43, %v1330_v44  ;;  %v6048_v57 = vcombine.low %v1326_v43, %v1330_v44  ;;  %v1389_v44 = vld [vmem:[%s7127_s8 + $0xb50] sm:$0xff] }
 0x347   : > { %4565 = vmatpush1.bf16.msra.mxu0 %v5982_v53  ;;  %4729 = vmatpush1.bf16.msra.mxu1 %v5984_v54  ;;  %v1337_v53 = vld [vmem:[%s7127_s8 + $0x9b0] sm:$0xff]  ;;  %v1334_v54 = vld [vmem:[%s7127_s8 + $0x998] sm:$0xff] }
 0x348   : > { %4566 = vmatprep.subr.bf16.mxu0 %v5991_v55  ;;  %4730 = vmatprep.subr.bf16.mxu1 %v5993_v56  ;;  %v1338_v55 = vld [vmem:[%s7127_s8 + $0x9b8] sm:$0xff]  ;;  %v6046_v56 = vcombine.low %v1325_v41, %v1329_v42  ;;  %v6055_v58 = vcombine.high %v1333_v52, %v1337_v53 }
 0x349   : > { %v6057_v34 = vcombine.high %v1334_v54, %v1338_v55  ;;  %v6056_v0 = vcombine.low %v1334_v54, %v1338_v55  ;;  %v1397_v55 = vld [vmem:[%s7127_s8 + $0xb90] sm:$0xff] }
 0x34b   : > { %4567 = vmatpush1.bf16.msra.mxu0 %v5990_v60  ;;  %4731 = vmatpush1.bf16.msra.mxu1 %v5992_v61  ;;  %v1345_v60 = vld [vmem:[%s7127_s8 + $0x9f0] sm:$0xff]  ;;  %v1342_v61 = vld [vmem:[%s7127_s8 + $0x9d8] sm:$0xff] }
 0x34c   : > { %4568 = vmatprep.subr.bf16.mxu0 %v5999_v62  ;;  %4732 = vmatprep.subr.bf16.mxu1 %v6001_v63  ;;  %v1346_v62 = vld [vmem:[%s7127_s8 + $0x9f8] sm:$0xff]  ;;  %v6054_v63 = vcombine.low %v1333_v52, %v1337_v53  ;;  %v6063_v1 = vcombine.high %v1341_v59, %v1345_v60 }
 0x34d   : > { %v6065_v2 = vcombine.high %v1342_v61, %v1346_v62  ;;  %v6064_v11 = vcombine.low %v1342_v61, %v1346_v62  ;;  %v1405_v62 = vld [vmem:[%s7127_s8 + $0xbd0] sm:$0xff] }
 0x34f   : > { %4569 = vmatpush1.bf16.msra.mxu0 %v5998_v4  ;;  %4733 = vmatpush1.bf16.msra.mxu1 %v6000_v5  ;;  %v1353_v4 = vld [vmem:[%s7127_s8 + $0xa30] sm:$0xff]  ;;  %v1350_v5 = vld [vmem:[%s7127_s8 + $0xa18] sm:$0xff] }
 0x350   : > { %4579 = vmatprep.subr.bf16.mxu0 %v6007_v7  ;;  %4743 = vmatprep.subr.bf16.mxu1 %v6009_v9  ;;  %v1354_v7 = vld [vmem:[%s7127_s8 + $0xa38] sm:$0xff]  ;;  %v6062_v9 = vcombine.low %v1341_v59, %v1345_v60  ;;  %v6071_v13 = vcombine.high %v1349_v3, %v1353_v4 }
 0x351   : > { %v6073_v14 = vcombine.high %v1350_v5, %v1354_v7 }
 0x352   : > { %4571 = vmatmul.mubr.bf16.vlgmr.msra.gmra.mrb[4].mxu0 %v7323_v12  ;;  %4735 = vmatmul.mubr.bf16.vlgmr.msra.gmra.mrb[4].mxu1 %v7323_v12  ;;  %v6022_v12 = vcombine.low %v1301_v47, %v1305_v21  ;;  %v6072_v47 = vcombine.low %v1350_v5, %v1354_v7  ;;  %v1413_v7 = vld [vmem:[%s7127_s8 + $0xc10] sm:$0xff] }
 0x353   : > { %4580 = vmatpush1.bf16.msra.mxu0 %v6006_v16  ;;  %4744 = vmatpush1.bf16.msra.mxu1 %v6008_v51  ;;  %v1361_v16 = vld [vmem:[%s7127_s8 + $0xa70] sm:$0xff]  ;;  %v1358_v51 = vld [vmem:[%s7127_s8 + $0xa58] sm:$0xff] }
 0x354   : > { %4581 = vmatprep.subr.bf16.mxu0 %v6015_v17  ;;  %4745 = vmatprep.subr.bf16.mxu1 %v6017_v18  ;;  %v1362_v17 = vld [vmem:[%s7127_s8 + $0xa78] sm:$0xff]  ;;  %v6070_v18 = vcombine.low %v1349_v3, %v1353_v4  ;;  %v6079_v21 = vcombine.high %v1357_v15, %v1361_v16 }
 0x355   : > { %4611 = vmatprep.mubr.bf16.mxu0 %v7329_v27  ;;  %4775 = vmatprep.mubr.bf16.mxu1 %v7329_v27  ;;  %v6032_v27 = vcombine.low %v1310_v29, %v1314_v19  ;;  %v6081_v6 = vcombine.high %v1358_v51, %v1362_v17  ;;  %v6080_v10 = vcombine.low %v1358_v51, %v1362_v17  ;;  %v1373_v19 = vld [vmem:[%s7127_s8 + $0xad0] sm:$0xff] }
 0x356   : > { %v1421_v17 = vld [vmem:[%s7127_s8 + $0xc50] sm:$0xff] }
 0x357   : > { %4582 = vmatpush1.bf16.msra.mxu0 %v6014_v23  ;;  %4746 = vmatpush1.bf16.msra.mxu1 %v6016_v24  ;;  %v1369_v23 = vld [vmem:[%s7127_s8 + $0xab0] sm:$0xff]  ;;  %v1366_v24 = vld [vmem:[%s7127_s8 + $0xa98] sm:$0xff] }
 0x358   : > { %4583 = vmatprep.subr.bf16.mxu0 %v6023_v25  ;;  %4747 = vmatprep.subr.bf16.mxu1 %v6025_v26  ;;  %v1370_v25 = vld [vmem:[%s7127_s8 + $0xab8] sm:$0xff]  ;;  %v6078_v26 = vcombine.low %v1357_v15, %v1361_v16  ;;  %v6087_v28 = vcombine.high %v1365_v22, %v1369_v23 }
 0x359   : > { %v6089_v29 = vcombine.high %v1366_v24, %v1370_v25  ;;  %v6088_v35 = vcombine.low %v1366_v24, %v1370_v25  ;;  %v1429_v25 = vld [vmem:[%s7127_s8 + $0xc90] sm:$0xff] }
 0x35b   : > { %4584 = vmatpush1.bf16.msra.mxu0 %v6022_v12  ;;  %4748 = vmatpush1.bf16.msra.mxu1 %v6024_v30  ;;  %v1377_v12 = vld [vmem:[%s7127_s8 + $0xaf0] sm:$0xff]  ;;  %v1374_v30 = vld [vmem:[%s7127_s8 + $0xad8] sm:$0xff] }
 0x35c   : > { %4585 = vmatprep.subr.bf16.mxu0 %v6031_v32  ;;  %4749 = vmatprep.subr.bf16.mxu1 %v6033_v33  ;;  %v1378_v32 = vld [vmem:[%s7127_s8 + $0xaf8] sm:$0xff]  ;;  %v6086_v33 = vcombine.low %v1365_v22, %v1369_v23  ;;  %v6095_v36 = vcombine.high %v1373_v19, %v1377_v12 }
 0x35d   : > { %v6097_v37 = vcombine.high %v1374_v30, %v1378_v32  ;;  %v6096_v41 = vcombine.low %v1374_v30, %v1378_v32  ;;  %v1437_v32 = vld [vmem:[%s7127_s8 + $0xcd0] sm:$0xff] }
 0x35f   : > { %4586 = vmatpush1.bf16.msra.mxu0 %v6030_v39  ;;  %4750 = vmatpush1.bf16.msra.mxu1 %v6032_v27  ;;  %v1385_v39 = vld [vmem:[%s7127_s8 + $0xb30] sm:$0xff]  ;;  %v1382_v27 = vld [vmem:[%s7127_s8 + $0xb18] sm:$0xff] }
 0x360   : > { %4587 = vmatprep.subr.bf16.mxu0 %v6039_v8  ;;  %4751 = vmatprep.subr.bf16.mxu1 %v6041_v40  ;;  %v1386_v8 = vld [vmem:[%s7127_s8 + $0xb38] sm:$0xff]  ;;  %v6094_v40 = vcombine.low %v1373_v19, %v1377_v12  ;;  %v6103_v42 = vcombine.high %v1381_v38, %v1385_v39 }
 0x361   : > { %v6105_v43 = vcombine.high %v1382_v27, %v1386_v8  ;;  %v6104_v52 = vcombine.low %v1382_v27, %v1386_v8  ;;  %v1445_v27 = vld [vmem:[%s7127_s8 + $0xd10] sm:$0xff] }
 0x362   : > { %v1449_v8 = vld [vmem:[%s7127_s8 + $0xd30] sm:$0xff] }
 0x363   : > { %4588 = vmatpush1.bf16.msra.mxu0 %v6038_v45  ;;  %4752 = vmatpush1.bf16.msra.mxu1 %v6040_v46  ;;  %v1393_v45 = vld [vmem:[%s7127_s8 + $0xb70] sm:$0xff]  ;;  %v1390_v46 = vld [vmem:[%s7127_s8 + $0xb58] sm:$0xff] }
 0x364   : > { %4589 = vmatprep.subr.bf16.mxu0 %v6047_v48  ;;  %4753 = vmatprep.subr.bf16.mxu1 %v6049_v50  ;;  %v1394_v48 = vld [vmem:[%s7127_s8 + $0xb78] sm:$0xff]  ;;  %v6102_v50 = vcombine.low %v1381_v38, %v1385_v39  ;;  %v6111_v53 = vcombine.high %v1389_v44, %v1393_v45 }
 0x365   : > { %v6113_v54 = vcombine.high %v1390_v46, %v1394_v48  ;;  %v6112_v59 = vcombine.low %v1390_v46, %v1394_v48  ;;  %v1457_v46 = vld [vmem:[%s7127_s8 + $0xd70] sm:$0xff]  ;;  %v1454_v48 = vld [vmem:[%s7127_s8 + $0xd58] sm:$0xff] }
 0x367   : > { %4590 = vmatpush1.bf16.msra.mxu0 %v6046_v56  ;;  %4754 = vmatpush1.bf16.msra.mxu1 %v6048_v57  ;;  %v1401_v56 = vld [vmem:[%s7127_s8 + $0xbb0] sm:$0xff]  ;;  %v1398_v57 = vld [vmem:[%s7127_s8 + $0xb98] sm:$0xff] }
 0x368   : > { %4591 = vmatprep.subr.bf16.mxu0 %v6055_v58  ;;  %4755 = vmatprep.subr.bf16.mxu1 %v6057_v34  ;;  %v1402_v58 = vld [vmem:[%s7127_s8 + $0xbb8] sm:$0xff]  ;;  %v6110_v34 = vcombine.low %v1389_v44, %v1393_v45  ;;  %v6119_v60 = vcombine.high %v1397_v55, %v1401_v56  ;;  %v1453_v45 = vld [vmem:[%s7127_s8 + $0xd50] sm:$0xff] }
 0x369   : > { %v6121_v61 = vcombine.high %v1398_v57, %v1402_v58  ;;  %v6120_v3 = vcombine.low %v1398_v57, %v1402_v58  ;;  %v1465_v57 = vld [vmem:[%s7127_s8 + $0xdb0] sm:$0xff]  ;;  %v1462_v58 = vld [vmem:[%s7127_s8 + $0xd98] sm:$0xff] }
 0x36b   : > { %4592 = vmatpush1.bf16.msra.mxu0 %v6054_v63  ;;  %4756 = vmatpush1.bf16.msra.mxu1 %v6056_v0  ;;  %v1409_v63 = vld [vmem:[%s7127_s8 + $0xbf0] sm:$0xff]  ;;  %v1406_v0 = vld [vmem:[%s7127_s8 + $0xbd8] sm:$0xff] }
 0x36c   : > { %4593 = vmatprep.subr.bf16.mxu0 %v6063_v1  ;;  %4757 = vmatprep.subr.bf16.mxu1 %v6065_v2  ;;  %v1410_v1 = vld [vmem:[%s7127_s8 + $0xbf8] sm:$0xff]  ;;  %v6118_v2 = vcombine.low %v1397_v55, %v1401_v56  ;;  %v6127_v4 = vcombine.high %v1405_v62, %v1409_v63  ;;  %v1461_v56 = vld [vmem:[%s7127_s8 + $0xd90] sm:$0xff] }
 0x36d   : > { %v6129_v5 = vcombine.high %v1406_v0, %v1410_v1  ;;  %v6128_v15 = vcombine.low %v1406_v0, %v1410_v1  ;;  %v1469_v0 = vld [vmem:[%s7127_s8 + $0xdd0] sm:$0xff] }
 0x36e   : > { %v1473_v1 = vld [vmem:[%s7127_s8 + $0xdf0] sm:$0xff] }
 0x36f   : > { %4594 = vmatpush1.bf16.msra.mxu0 %v6062_v9  ;;  %4758 = vmatpush1.bf16.msra.mxu1 %v6064_v11  ;;  %v1417_v9 = vld [vmem:[%s7127_s8 + $0xc30] sm:$0xff]  ;;  %v1414_v11 = vld [vmem:[%s7127_s8 + $0xc18] sm:$0xff] }
 0x370   : > { %4595 = vmatprep.subr.bf16.mxu0 %v6071_v13  ;;  %4759 = vmatprep.subr.bf16.mxu1 %v6073_v14  ;;  %v1418_v13 = vld [vmem:[%s7127_s8 + $0xc38] sm:$0xff]  ;;  %v6126_v14 = vcombine.low %v1405_v62, %v1409_v63  ;;  %v6135_v16 = vcombine.high %v1413_v7, %v1417_v9 }
 0x371   : > { %v6137_v51 = vcombine.high %v1414_v11, %v1418_v13  ;;  %v6136_v22 = vcombine.low %v1414_v11, %v1418_v13  ;;  %v6182_v11 = vcombine.low %v1461_v56, %v1465_v57 }
 0x373   : > { %4596 = vmatpush1.bf16.msra.mxu0 %v6070_v18  ;;  %4760 = vmatpush1.bf16.msra.mxu1 %v6072_v47  ;;  %v1425_v18 = vld [vmem:[%s7127_s8 + $0xc70] sm:$0xff]  ;;  %v1422_v47 = vld [vmem:[%s7127_s8 + $0xc58] sm:$0xff] }
 0x374   : > { %4597 = vmatprep.subr.bf16.mxu0 %v6079_v21  ;;  %4761 = vmatprep.subr.bf16.mxu1 %v6081_v6  ;;  %v1426_v21 = vld [vmem:[%s7127_s8 + $0xc78] sm:$0xff]  ;;  %v6134_v6 = vcombine.low %v1413_v7, %v1417_v9  ;;  %v6143_v23 = vcombine.high %v1421_v17, %v1425_v18 }
 0x375   : > { %v6145_v24 = vcombine.high %v1422_v47, %v1426_v21  ;;  %v6144_v19 = vcombine.low %v1422_v47, %v1426_v21  ;;  %v1481_v47 = vld [vmem:[%s7127_s8 + $0xe30] sm:$0xff]  ;;  %v1478_v21 = vld [vmem:[%s7127_s8 + $0xe18] sm:$0xff] }
 0x377   : > { %4598 = vmatpush1.bf16.msra.mxu0 %v6078_v26  ;;  %4762 = vmatpush1.bf16.msra.mxu1 %v6080_v10  ;;  %v1433_v26 = vld [vmem:[%s7127_s8 + $0xcb0] sm:$0xff]  ;;  %v1430_v10 = vld [vmem:[%s7127_s8 + $0xc98] sm:$0xff] }
 0x378   : > { %4599 = vmatprep.subr.bf16.mxu0 %v6087_v28  ;;  %4763 = vmatprep.subr.bf16.mxu1 %v6089_v29  ;;  %v1434_v28 = vld [vmem:[%s7127_s8 + $0xcb8] sm:$0xff]  ;;  %v6142_v29 = vcombine.low %v1421_v17, %v1425_v18  ;;  %v6151_v12 = vcombine.high %v1429_v25, %v1433_v26  ;;  %v1477_v18 = vld [vmem:[%s7127_s8 + $0xe10] sm:$0xff] }
 0x379   : > { %v6153_v30 = vcombine.high %v1430_v10, %v1434_v28 }
 0x37b   : > { %4600 = vmatpush1.bf16.msra.mxu0 %v6086_v33  ;;  %4764 = vmatpush1.bf16.msra.mxu1 %v6088_v35  ;;  %v1441_v33 = vld [vmem:[%s7127_s8 + $0xcf0] sm:$0xff]  ;;  %v1438_v35 = vld [vmem:[%s7127_s8 + $0xcd8] sm:$0xff] }
 0x37c   : > { %4601 = vmatprep.subr.bf16.mxu0 %v6095_v36  ;;  %4765 = vmatprep.subr.bf16.mxu1 %v6097_v37  ;;  %v1442_v36 = vld [vmem:[%s7127_s8 + $0xcf8] sm:$0xff]  ;;  %v6152_v37 = vcombine.low %v1430_v10, %v1434_v28  ;;  %v6159_v38 = vcombine.high %v1437_v32, %v1441_v33  ;;  %v1489_v10 = vld [vmem:[%s7127_s8 + $0xe70] sm:$0xff] }
 0x37d   : > { %v6161_v39 = vcombine.high %v1438_v35, %v1442_v36  ;;  %v1486_v28 = vld [vmem:[%s7127_s8 + $0xe58] sm:$0xff] }
 0x37f   : > { %4602 = vmatpush1.bf16.msra.mxu0 %v6094_v40  ;;  %4766 = vmatpush1.bf16.msra.mxu1 %v6096_v41  ;;  %v1446_v40 = vld [vmem:[%s7127_s8 + $0xd18] sm:$0xff] }
 0x380   : > { %4603 = vmatprep.subr.bf16.mxu0 %v6103_v42  ;;  %4767 = vmatprep.subr.bf16.mxu1 %v6105_v43  ;;  %v1450_v41 = vld [vmem:[%s7127_s8 + $0xd38] sm:$0xff]  ;;  %v6158_v42 = vcombine.low %v1437_v32, %v1441_v33  ;;  %v6167_v43 = vcombine.high %v1445_v27, %v1449_v8  ;;  %v1493_v33 = vld [vmem:[%s7127_s8 + $0xe90] sm:$0xff] }
 0x381   : > { %v6169_v44 = vcombine.high %v1446_v40, %v1450_v41 }
 0x383   : > { %4604 = vmatpush1.bf16.msra.mxu0 %v6102_v50  ;;  %4768 = vmatpush1.bf16.msra.mxu1 %v6104_v52  ;;  %v1458_v50 = vld [vmem:[%s7127_s8 + $0xd78] sm:$0xff]  ;;  %v6166_v52 = vcombine.low %v1445_v27, %v1449_v8  ;;  %v1501_v8 = vld [vmem:[%s7127_s8 + $0xed0] sm:$0xff] }
 0x384   : > { %4605 = vmatprep.subr.bf16.mxu0 %v6111_v53  ;;  %4769 = vmatprep.subr.bf16.mxu1 %v6113_v54  ;;  %v6168_v53 = vcombine.low %v1446_v40, %v1450_v41  ;;  %v6175_v54 = vcombine.high %v1453_v45, %v1457_v46  ;;  %v6177_v55 = vcombine.high %v1454_v48, %v1458_v50  ;;  %v1505_v40 = vld [vmem:[%s7127_s8 + $0xef0] sm:$0xff]  ;;  %v1502_v41 = vld [vmem:[%s7127_s8 + $0xed8] sm:$0xff] }
 0x387   : > { %4606 = vmatpush1.bf16.msra.mxu0 %v6110_v34  ;;  %4770 = vmatpush1.bf16.msra.mxu1 %v6112_v59  ;;  %v1466_v34 = vld [vmem:[%s7127_s8 + $0xdb8] sm:$0xff]  ;;  %v6174_v59 = vcombine.low %v1453_v45, %v1457_v46  ;;  %v1509_v46 = vld [vmem:[%s7127_s8 + $0xf10] sm:$0xff] }
 0x388   : > { %4607 = vmatprep.subr.bf16.mxu0 %v6119_v60  ;;  %4771 = vmatprep.subr.bf16.mxu1 %v6121_v61  ;;  %v6176_v60 = vcombine.low %v1454_v48, %v1458_v50  ;;  %v6183_v61 = vcombine.high %v1461_v56, %v1465_v57  ;;  %v6185_v63 = vcombine.high %v1462_v58, %v1466_v34  ;;  %v1513_v48 = vld [vmem:[%s7127_s8 + $0xf30] sm:$0xff]  ;;  %v1541_v50 = vlaneseq }
 0x389   : > { %v6231_v56 = vcombine.high %v1509_v46, %v1513_v48 }
 0x38b   : > { %4608 = vmatpush1.bf16.msra.mxu0 %v6118_v2  ;;  %4772 = vmatpush1.bf16.msra.mxu1 %v6120_v3 }
 0x38c   : > { %4609 = vmatprep.subr.bf16.mxu0 %v6127_v4  ;;  %4773 = vmatprep.subr.bf16.mxu1 %v6129_v5  ;;  %v1470_v4 = vld [vmem:[%s7127_s8 + $0xdd8] sm:$0xff] }
 0x38d   : > { %v1474_v5 = vld [vmem:[%s7127_s8 + $0xdf8] sm:$0xff] }
 0x38e   : > { %v6193_v17 = vcombine.high %v1470_v4, %v1474_v5 }
 0x38f   : > { %4610 = vmatpush1.bf16.msra.mxu0 %v6126_v14  ;;  %4774 = vmatpush1.bf16.msra.mxu1 %v6128_v15  ;;  %v6184_v15 = vcombine.low %v1462_v58, %v1466_v34  ;;  %v1517_v58 = vld [vmem:[%s7127_s8 + $0xf50] sm:$0xff] }
 0x390   : > { %4620 = vmatprep.subr.bf16.mxu0 %v6135_v16  ;;  %4784 = vmatprep.subr.bf16.mxu1 %v6137_v51  ;;  %v6191_v16 = vcombine.high %v1469_v0, %v1473_v1  ;;  %v1521_v34 = vld [vmem:[%s7127_s8 + $0xf70] sm:$0xff] }
 0x392   : > { %4612 = vmatmul.mubr.bf16.vlgmr.msra.gmra.mrb[4].mxu0 %v7397_v31  ;;  %4776 = vmatmul.mubr.bf16.vlgmr.msra.gmra.mrb[4].mxu1 %v7397_v31  ;;  %v6150_v31 = vcombine.low %v1429_v25, %v1433_v26  ;;  %v1485_v26 = vld [vmem:[%s7127_s8 + $0xe50] sm:$0xff] }
 0x393   : > { %4621 = vmatpush1.bf16.msra.mxu0 %v6134_v6  ;;  %4785 = vmatpush1.bf16.msra.mxu1 %v6136_v22  ;;  %v1482_v6 = vld [vmem:[%s7127_s8 + $0xe38] sm:$0xff]  ;;  %v6190_v22 = vcombine.low %v1469_v0, %v1473_v1  ;;  %v6239_v1 = vcombine.high %v1517_v58, %v1521_v34 }
 0x394   : > { %4622 = vmatprep.subr.bf16.mxu0 %v6143_v23  ;;  %4786 = vmatprep.subr.bf16.mxu1 %v6145_v24  ;;  %v6192_v23 = vcombine.low %v1470_v4, %v1474_v5  ;;  %v6199_v24 = vcombine.high %v1477_v18, %v1481_v47  ;;  %v6201_v25 = vcombine.high %v1478_v21, %v1482_v6  ;;  %v1525_v5 = vld [vmem:[%s7127_s8 + $0xf90] sm:$0xff] }
 0x395   : > { %4652 = vmatprep.mubr.bf16.mxu0 %v7407_v20  ;;  %4816 = vmatprep.mubr.bf16.mxu1 %v7407_v20  ;;  %v6160_v20 = vcombine.low %v1438_v35, %v1442_v36  ;;  %v1497_v35 = vld [vmem:[%s7127_s8 + $0xeb0] sm:$0xff]  ;;  %v1494_v36 = vld [vmem:[%s7127_s8 + $0xe98] sm:$0xff] }
 0x397   : > { %4623 = vmatpush1.bf16.msra.mxu0 %v6142_v29  ;;  %4787 = vmatpush1.bf16.msra.mxu1 %v6144_v19  ;;  %v1490_v29 = vld [vmem:[%s7127_s8 + $0xe78] sm:$0xff]  ;;  %v6198_v19 = vcombine.low %v1477_v18, %v1481_v47 }
 0x398   : > { %4624 = vmatprep.subr.bf16.mxu0 %v6151_v12  ;;  %4788 = vmatprep.subr.bf16.mxu1 %v6153_v30  ;;  %v6200_v12 = vcombine.low %v1478_v21, %v1482_v6  ;;  %v6207_v30 = vcombine.high %v1485_v26, %v1489_v10  ;;  %v6209_v32 = vcombine.high %v1486_v28, %v1490_v29  ;;  %v1533_v21 = vld [vmem:[%s7127_s8 + $0xfd0] sm:$0xff] }
 0x399   : > { %v1537_v6 = vld [vmem:[%s7127_s8 + $0xff0] sm:$0xff] }
 0x39b   : > { %4625 = vmatpush1.bf16.msra.mxu0 %v6150_v31  ;;  %4789 = vmatpush1.bf16.msra.mxu1 %v6152_v37  ;;  %v1498_v31 = vld [vmem:[%s7127_s8 + $0xeb8] sm:$0xff]  ;;  %v6206_v37 = vcombine.low %v1485_v26, %v1489_v10 }
 0x39c   : > { %4626 = vmatprep.subr.bf16.mxu0 %v6159_v38  ;;  %4790 = vmatprep.subr.bf16.mxu1 %v6161_v39  ;;  %v6208_v38 = vcombine.low %v1486_v28, %v1490_v29  ;;  %v6215_v39 = vcombine.high %v1493_v33, %v1497_v35  ;;  %v6217_v27 = vcombine.high %v1494_v36, %v1498_v31 }
 0x39d   : > { %v6255_v28 = vcombine.high %v1533_v21, %v1537_v6 }
 0x39f   : > { %4627 = vmatpush1.bf16.msra.mxu0 %v6158_v42  ;;  %4791 = vmatpush1.bf16.msra.mxu1 %v6160_v20  ;;  %v1506_v42 = vld [vmem:[%s7127_s8 + $0xef8] sm:$0xff]  ;;  %v6214_v20 = vcombine.low %v1493_v33, %v1497_v35  ;;  %v6573_v33 = vld [vmem:[%s7144_s11 + $0x40] sm:$0xff]  }
 0x3a0   : > { %4628 = vmatprep.subr.bf16.mxu0 %v6167_v43  ;;  %4792 = vmatprep.subr.bf16.mxu1 %v6169_v44  ;;  %v6216_v43 = vcombine.low %v1494_v36, %v1498_v31  ;;  %v6223_v44 = vcombine.high %v1501_v8, %v1505_v40  ;;  %v6225_v45 = vcombine.high %v1502_v41, %v1506_v42  ;;  %v6574_v35 = vld [vmem:[%s7144_s11 + $0xc0] sm:$0xff]  }
 0x3a3   : > { %4629 = vmatpush1.bf16.msra.mxu0 %v6166_v52  ;;  %4793 = vmatpush1.bf16.msra.mxu1 %v6168_v53  ;;  %v1510_v52 = vld [vmem:[%s7127_s8 + $0xf18] sm:$0xff] }
 0x3a4   : > { %4630 = vmatprep.subr.bf16.mxu0 %v6175_v54  ;;  %4794 = vmatprep.subr.bf16.mxu1 %v6177_v55  ;;  %v1514_v53 = vld [vmem:[%s7127_s8 + $0xf38] sm:$0xff]  ;;  %v6222_v54 = vcombine.low %v1501_v8, %v1505_v40  ;;  %v6224_v55 = vcombine.low %v1502_v41, %v1506_v42  ;;  %v6579_v8 = vld [vmem:[%s7144_s11 + $0x8] sm:$0xff]  }
 0x3a5   : > { %v7707_v62 = vpop.f32.mrb[0].mxu0  ;;  %v7711_v2 = vpop.f32.mrb[0].mxu1  ;;  %v6233_v57 = vcombine.high %v1510_v52, %v1514_v53  ;;  %v6232_v0 = vcombine.low %v1510_v52, %v1514_v53  ;;  %v6580_v40 = vld [vmem:[%s7144_s11 + $0x88] sm:$0xff]   ;;  %v6581_v41 = vld [vmem:[%s7144_s11 + $0x50] sm:$0xff]   ;;  %v6591_v52 = vld [vmem:[%s7144_s11 + $0x20] sm:$0xff]  }
 0x3a6   : > { %v7713_v3 = vpop.f32.mrb[1].mxu0  ;;  %v7717_v7 = vpop.f32.mrb[1].mxu1  ;;  %v6582_v42 = vld [vmem:[%s7144_s11 + $0xd0] sm:$0xff]  }
 0x3a7   : > { %v4330_v9 = vpop.f32.mrb[2].mxu0  ;;  %4631 = vmatpush1.bf16.msra.mxu0 %v6174_v59  ;;  %v4494_v13 = vpop.f32.mrb[2].mxu1  ;;  %4795 = vmatpush1.bf16.msra.mxu1 %v6176_v60  ;;  %v7741_v59 = vshrl.u32 %v1541_v50, 7  ;;  %v1518_v60 = vld [vmem:[%s7127_s8 + $0xf58] sm:$0xff]  ;;  %v6590_v50 = vld [vmem:[%s7144_s11 + $0xe0] sm:$0xff]  }
 0x3a8   : > { %v4331_v14 = vpop.f32.mrb[3].mxu0  ;;  %4632 = vmatprep.subr.bf16.mxu0 %v6183_v61  ;;  %v4495_v51 = vpop.f32.mrb[3].mxu1  ;;  %4796 = vmatprep.subr.bf16.mxu1 %v6185_v63  ;;  %v1522_v61 = vld [vmem:[%s7127_s8 + $0xf78] sm:$0xff]  ;;  %v6230_v63 = vcombine.low %v1509_v46, %v1513_v48  ;;  %v1529_v9 = vld [vmem:[%s7127_s8 + $0xfb0] sm:$0xff]  ;;  %v6588_v46 = vld [vmem:[%s7144_s11 + $0x98] sm:$0xff]  }
 0x3a9   : > { %v6241_v4 = vcombine.high %v1518_v60, %v1522_v61  ;;  %v1526_v13 = vld [vmem:[%s7127_s8 + $0xf98] sm:$0xff]  ;;  %v6238_v51 = vcombine.low %v1517_v58, %v1521_v34  ;;  %v6247_v18 = vcombine.high %v1525_v5, %v1529_v9  ;;  %v6246_v26 = vcombine.low %v1525_v5, %v1529_v9  ;;  %v6589_v48 = vld [vmem:[%s7144_s11 + $0x60] sm:$0xff]   ;;  %v6595_v58 = vld [vmem:[%s7144_s11 + $0x28] sm:$0xff]  }
 0x3aa   : > { %v1530_v14 = vld [vmem:[%s7127_s8 + $0xfb8] sm:$0xff]  ;;  %v1543_v53 = vsub.s32 0, %v7741_v59  ;;  %v6601_v9 = vld [vmem:[%s7144_s11 + $0x78] sm:$0xff]  }
 0x3ab   : > { %4633 = vmatpush1.bf16.msra.mxu0 %v6182_v11  ;;  %4797 = vmatpush1.bf16.msra.mxu1 %v6184_v15  ;;  %v1547_v11 = vsub.s32 1, %v7741_v59  ;;  %v7752_v15 = vld [vmem:[%s333_s2] sm:$0xff]  ;;  %v6249_v47 = vcombine.high %v1526_v13, %v1530_v14  ;;  %v6248_v10 = vcombine.low %v1526_v13, %v1530_v14  ;;  %v6600_v5 = vld [vmem:[%s7144_s11 + $0xb0] sm:$0xff]  }
 0x3ac   : > { %4634 = vmatprep.subr.bf16.mxu0 %v6191_v16  ;;  %4798 = vmatprep.subr.bf16.mxu1 %v6193_v17  ;;  %v1555_v16 = vsub.s32 3, %v7741_v59  ;;  %v6240_v17 = vcombine.low %v1518_v60, %v1522_v61  ;;  %v1544_v34 = vrot.slane %v7752_v15, %v1543_v53  ;;  %v6596_v60 = vld [vmem:[%s7144_s11 + $0xa8] sm:$0xff]   ;;  %v6597_v61 = vld [vmem:[%s7144_s11 + $0x70] sm:$0xff]   ;;  %v6602_v13 = vld [vmem:[%s7144_s11 + $0xf8] sm:$0xff]  }
 0x3ad   : > { %v6603_v14 = vld [vmem:[%s7144_s11 + $0x38] sm:$0xff]  }
 0x3af   : > { %4635 = vmatpush1.bf16.msra.mxu0 %v6190_v22  ;;  %4799 = vmatpush1.bf16.msra.mxu1 %v6192_v23  ;;  %v1548_v22 = vrot.slane %v7752_v15, %v1547_v11  ;;  %v1534_v23 = vld [vmem:[%s7127_s8 + $0xfd8] sm:$0xff] }
 0x3b0   : > { %4636 = vmatprep.subr.bf16.mxu0 %v6199_v24  ;;  %4800 = vmatprep.subr.bf16.mxu1 %v6201_v25  ;;  %v1538_v24 = vld [vmem:[%s7127_s8 + $0xff8] sm:$0xff]  ;;  %v1556_v25 = vrot.slane %v7752_v15, %v1555_v16 }
 0x3b1   : > { %v6257_v29 = vcombine.high %v1534_v23, %v1538_v24 }
 0x3b3   : > { %4637 = vmatpush1.bf16.msra.mxu0 %v6198_v19  ;;  %4801 = vmatpush1.bf16.msra.mxu1 %v6200_v12  ;;  %v6423_v19 = vadd.f32 %v7713_v3, %v1548_v22  ;;  %v6425_v12 = vadd.f32 %v7717_v7, %v1556_v25  ;;  %v6576_v3 = vld [vmem:[%s7144_s11 + $0x80] sm:$0xff]   ;;  %v6577_v7 = vld [vmem:[%s7144_s11 + $0x48] sm:$0xff]  }
 0x3b4   : > { %4638 = vmatprep.subr.bf16.mxu0 %v6207_v30  ;;  %4802 = vmatprep.subr.bf16.mxu1 %v6209_v32  ;;  %v6254_v30 = vcombine.low %v1533_v21, %v1537_v6  ;;  %v6256_v32 = vcombine.low %v1534_v23, %v1538_v24  ;;  %v6608_v21 = vld [vmem:[%s7144_s11 + $0x180] sm:$0xff]   ;;  %v6609_v6 = vld [vmem:[%s7144_s11 + $0x148] sm:$0xff]  }
 0x3b5   : > { %v4826_v36 = vmax.f32 %v6423_v19, 0.0  ;;  %v4828_v31 = vmax.f32 %v6425_v12, 0.0  ;;  %v6610_v23 = vld [vmem:[%s7144_s11 + $0x1c8] sm:$0xff]   ;;  %v6617_v19 = vld [vmem:[%s7144_s11 + $0x158] sm:$0xff]  }
 0x3b6   : > { %v6611_v24 = vld [vmem:[%s7144_s11 + $0x108] sm:$0xff]   ;;  %v6618_v12 = vld [vmem:[%s7144_s11 + $0x1d8] sm:$0xff]  }
 0x3b7   : > { %4639 = vmatpush1.bf16.msra.mxu0 %v6206_v37  ;;  %4803 = vmatpush1.bf16.msra.mxu1 %v6208_v38  ;;  %v6575_v37 = vld [vmem:[%s7144_s11] sm:$0xff]   ;;  %v4834_v38 = vpack.c.bf16 %v4826_v36, %v4826_v36  ;;  %v6612_v25 = vld [vmem:[%s7144_s11 + $0x188] sm:$0xff]  }
 0x3b8   : > { %4640 = vmatprep.subr.bf16.mxu0 %v6215_v39  ;;  %4804 = vmatprep.subr.bf16.mxu1 %v6217_v27  ;;  %v6578_v39 = vld [vmem:[%s7144_s11 + $0xc8] sm:$0xff]   ;;  %v4836_v27 = vpack.c.bf16 %v4828_v31, %v4828_v31  ;;  %v6623_v36 = vld [vmem:[%s7144_s11 + $0x120] sm:$0xff]  }
 0x3b9   : > { %v6624_v31 = vld [vmem:[%s7144_s11 + $0x1a0] sm:$0xff]  }
 0x3bb   : > { %4641 = vmatpush1.bf16.msra.mxu0 %v6214_v20  ;;  %4805 = vmatpush1.bf16.msra.mxu1 %v6216_v43  ;;  %v6583_v20 = vld [vmem:[%s7144_s11 + $0x10] sm:$0xff]   ;;  %v6585_v43 = vld [vmem:[%s7144_s11 + $0x58] sm:$0xff]  }
 0x3bc   : > { %4642 = vmatprep.subr.bf16.mxu0 %v6223_v44  ;;  %4806 = vmatprep.subr.bf16.mxu1 %v6225_v45  ;;  %v6586_v44 = vld [vmem:[%s7144_s11 + $0xd8] sm:$0xff]  }
 0x3bd   : > { %v6587_v45 = vld [vmem:[%s7144_s11 + $0x18] sm:$0xff]  }
 0x3bf   : > { %4643 = vmatpush1.bf16.msra.mxu0 %v6222_v54  ;;  %4807 = vmatpush1.bf16.msra.mxu1 %v6224_v55  ;;  %v6592_v54 = vld [vmem:[%s7144_s11 + $0xa0] sm:$0xff]   ;;  %v6593_v55 = vld [vmem:[%s7144_s11 + $0x68] sm:$0xff]  }
 0x3c0   : > { %4644 = vmatprep.subr.bf16.mxu0 %v6231_v56  ;;  %4808 = vmatprep.subr.bf16.mxu1 %v6233_v57  ;;  %v1551_v56 = vsub.s32 2, %v7741_v59  ;;  %v6594_v57 = vld [vmem:[%s7144_s11 + $0xe8] sm:$0xff]  }
 0x3c3   : > { %4645 = vmatpush1.bf16.msra.mxu0 %v6230_v63  ;;  %4809 = vmatpush1.bf16.msra.mxu1 %v6232_v0  ;;  %v1552_v63 = vrot.slane %v7752_v15, %v1551_v56  ;;  %v6598_v0 = vld [vmem:[%s7144_s11 + $0xf0] sm:$0xff]  }
 0x3c4   : > { %4646 = vmatprep.subr.bf16.mxu0 %v6239_v1  ;;  %4810 = vmatprep.subr.bf16.mxu1 %v6241_v4  ;;  %v6599_v1 = vld [vmem:[%s7144_s11 + $0x30] sm:$0xff]   ;;  %v6422_v4 = vadd.f32 %v7707_v62, %v1544_v34  ;;  %v6605_v62 = vld [vmem:[%s7144_s11 + $0x140] sm:$0xff]  }
 0x3c5   : > { %v6424_v11 = vadd.f32 %v7711_v2, %v1552_v63 }
 0x3c6   : > { %v4825_v16 = vmax.f32 %v6422_v4, 0.0 }
 0x3c7   : > { %4647 = vmatpush1.bf16.msra.mxu0 %v6238_v51  ;;  %4811 = vmatpush1.bf16.msra.mxu1 %v6240_v17  ;;  %v6604_v51 = vld [vmem:[%s7144_s11 + $0xb8] sm:$0xff]   ;;  %v4827_v17 = vmax.f32 %v6424_v11, 0.0 }
 0x3c8   : > { %4648 = vmatprep.subr.bf16.mxu0 %v6247_v18  ;;  %4812 = vmatprep.subr.bf16.mxu1 %v6249_v47  ;;  %v6606_v18 = vld [vmem:[%s7144_s11 + $0x1c0] sm:$0xff]   ;;  %v4833_v2 = vpack.c.bf16 %v4825_v16, %v4825_v16 }
 0x3c9   : > { %v6607_v47 = vld [vmem:[%s7144_s11 + $0x100] sm:$0xff]   ;;  %v4835_v22 = vpack.c.bf16 %v4827_v17, %v4827_v17 }
 0x3cb   : > { %4649 = vmatpush1.bf16.msra.mxu0 %v6246_v26  ;;  %4813 = vmatpush1.bf16.msra.mxu1 %v6248_v10  ;;  %v6613_v26 = vld [vmem:[%s7144_s11 + $0x150] sm:$0xff]  }
 0x3cc   : > { %4650 = vmatprep.subr.bf16.mxu0 %v6255_v28  ;;  %4814 = vmatprep.subr.bf16.mxu1 %v6257_v29  ;;  %v6614_v10 = vld [vmem:[%s7144_s11 + $0x1d0] sm:$0xff]  }
 0x3cd   : > { %v6615_v28 = vld [vmem:[%s7144_s11 + $0x110] sm:$0xff]  }
 0x3ce   : > { %v6616_v29 = vld [vmem:[%s7144_s11 + $0x190] sm:$0xff]  }
 0x3cf   : > { %4651 = vmatpush1.bf16.msra.mxu0 %v6254_v30  ;;  %4815 = vmatpush1.bf16.msra.mxu1 %v6256_v32  ;;  %v6619_v30 = vld [vmem:[%s7144_s11 + $0x118] sm:$0xff]  }
 0x3d0   : > { %6334 = vmatprep.subr.bf16.mxu0 %v6573_v33  ;;  %6356 = vmatprep.subr.bf16.mxu1 %v6574_v35  ;;  %v6620_v32 = vld [vmem:[%s7144_s11 + $0x198] sm:$0xff]   ;;  %v6621_v33 = vld [vmem:[%s7144_s11 + $0x160] sm:$0xff]  }
 0x3d1   : > { %v6622_v35 = vld [vmem:[%s7144_s11 + $0x1e0] sm:$0xff]  }
 0x3d2   : > { %4653 = vmatmul.mubr.bf16.vlgmr.msra.gmra.mrb[4].mxu0 %v7475_v49  ;;  %4817 = vmatmul.mubr.bf16.vlgmr.msra.gmra.mrb[4].mxu1 %v7475_v49  ;;  %v6584_v49 = vld [vmem:[%s7144_s11 + $0x90] sm:$0xff]  }
 0x3d3   : > { %6335 = vmatpush3.bf16.msra.mxu0 %v6575_v37  ;;  %5386 = vmatprep.mubr.bf16.mxu0 %v4834_v38  ;;  %v6625_v37 = vld [vmem:[%s7144_s11 + $0x168] sm:$0xff]  }
 0x3d4   : > { %6357 = vmatpush3.bf16.msra.mxu1 %v6576_v3  ;;  %5426 = vmatprep.mubr.bf16.mxu1 %v4836_v27  ;;  %v6626_v3 = vld [vmem:[%s7144_s11 + $0x1e8] sm:$0xff]   ;;  %v6630_v27 = vld [vmem:[%s7144_s11 + $0x1f0] sm:$0xff]  }
 0x3d5   : > { %6336 = vmatprep.subr.bf16.mxu0 %v6577_v7  ;;  %6358 = vmatprep.subr.bf16.mxu1 %v6578_v39  ;;  %v6627_v7 = vld [vmem:[%s7144_s11 + $0x128] sm:$0xff]   ;;  %v6629_v39 = vld [vmem:[%s7144_s11 + $0x170] sm:$0xff]  }
 0x3d6   : > { %v6628_v38 = vld [vmem:[%s7144_s11 + $0x1a8] sm:$0xff]  }
 0x3d7   : > { %6337 = vmatpush3.bf16.msra.mxu0 %v6579_v8  ;;  %v6631_v8 = vld [vmem:[%s7144_s11 + $0x130] sm:$0xff]  }
 0x3d8   : > { %6359 = vmatpush3.bf16.msra.mxu1 %v6580_v40  ;;  %6338 = vmatprep.subr.bf16.mxu0 %v6581_v41  ;;  %v6632_v40 = vld [vmem:[%s7144_s11 + $0x1b0] sm:$0xff]   ;;  %v6633_v41 = vld [vmem:[%s7144_s11 + $0x178] sm:$0xff]  }
 0x3d9   : > { %6360 = vmatprep.subr.bf16.mxu1 %v6582_v42  ;;  %v6634_v42 = vld [vmem:[%s7144_s11 + $0x1f8] sm:$0xff]  }
 0x3db   : > { %6339 = vmatpush3.bf16.msra.mxu0 %v6583_v20  ;;  %v6635_v20 = vld [vmem:[%s7144_s11 + $0x138] sm:$0xff]  }
 0x3dc   : > { %6361 = vmatpush3.bf16.msra.mxu1 %v6584_v49  ;;  %6340 = vmatprep.subr.bf16.mxu0 %v6585_v43  ;;  %v6636_v49 = vld [vmem:[%s7144_s11 + $0x1b8] sm:$0xff]   ;;  %v1559_v43 = vsub.s32 4, %v7741_v59 }
 0x3dd   : > { %6362 = vmatprep.subr.bf16.mxu1 %v6586_v44  ;;  %v1567_v44 = vsub.s32 6, %v7741_v59 }
 0x3df   : > { %6341 = vmatpush3.bf16.msra.mxu0 %v6587_v45  ;;  %v1563_v45 = vsub.s32 5, %v7741_v59 }
 0x3e0   : > { %6363 = vmatpush3.bf16.msra.mxu1 %v6588_v46  ;;  %6342 = vmatprep.subr.bf16.mxu0 %v6589_v48  ;;  %v1571_v46 = vsub.s32 7, %v7741_v59  ;;  %v1560_v48 = vrot.slane %v7752_v15, %v1559_v43 }
 0x3e1   : > { %6364 = vmatprep.subr.bf16.mxu1 %v6590_v50  ;;  %v1568_v50 = vrot.slane %v7752_v15, %v1567_v44 }
 0x3e2   : > { %v1572_v53 = vrot.slane %v7752_v15, %v1571_v46 }
 0x3e3   : > { %6343 = vmatpush3.bf16.msra.mxu0 %v6591_v52  ;;  %v1564_v52 = vrot.slane %v7752_v15, %v1563_v45 }
 0x3e4   : > { %6365 = vmatpush3.bf16.msra.mxu1 %v6592_v54  ;;  %6344 = vmatprep.subr.bf16.mxu0 %v6593_v55 }
 0x3e5   : > { %6366 = vmatprep.subr.bf16.mxu1 %v6594_v57 }
 0x3e7   : > { %6345 = vmatpush3.bf16.msra.mxu0 %v6595_v58 }
 0x3e8   : > { %6367 = vmatpush3.bf16.msra.mxu1 %v6596_v60  ;;  %6346 = vmatprep.subr.bf16.mxu0 %v6597_v61 }
 0x3e9   : > { %6368 = vmatprep.subr.bf16.mxu1 %v6598_v0 }
 0x3eb   : > { %6347 = vmatpush3.bf16.msra.mxu0 %v6599_v1 }
 0x3ec   : > { %6369 = vmatpush3.bf16.msra.mxu1 %v6600_v5  ;;  %6348 = vmatprep.subr.bf16.mxu0 %v6601_v9 }
 0x3ed   : > { %6370 = vmatprep.subr.bf16.mxu1 %v6602_v13 }
 0x3ef   : > { %6349 = vmatpush3.bf16.msra.mxu0 %v6603_v14 }
 0x3f0   : > { %6371 = vmatpush3.bf16.msra.mxu1 %v6604_v51  ;;  %6378 = vmatprep.subr.bf16.mxu0 %v6605_v62 }
 0x3f1   : > { %6400 = vmatprep.subr.bf16.mxu1 %v6606_v18 }
 0x3f2   : > { %5387 = vmatmul.mubr.bf16.vlgmr.msra.gmra.mrb[8].mxu0 %v4833_v2 }
 0x3f3   : > { %5427 = vmatmul.mubr.bf16.vlgmr.msra.gmra.mrb[8].mxu1 %v4835_v22  ;;  %6379 = vmatpush3.bf16.msra.mxu0 %v6607_v47 }
 0x3f4   : > { %6401 = vmatpush3.bf16.msra.mxu1 %v6608_v21  ;;  %6380 = vmatprep.subr.bf16.mxu0 %v6609_v6 }
 0x3f5   : > { %6402 = vmatprep.subr.bf16.mxu1 %v6610_v23 }
 0x3f7   : > { %6381 = vmatpush3.bf16.msra.mxu0 %v6611_v24 }
 0x3f8   : > { %6403 = vmatpush3.bf16.msra.mxu1 %v6612_v25  ;;  %6382 = vmatprep.subr.bf16.mxu0 %v6613_v26 }
 0x3f9   : > { %6404 = vmatprep.subr.bf16.mxu1 %v6614_v10 }
 0x3fb   : > { %6383 = vmatpush3.bf16.msra.mxu0 %v6615_v28 }
 0x3fc   : > { %6405 = vmatpush3.bf16.msra.mxu1 %v6616_v29  ;;  %6384 = vmatprep.subr.bf16.mxu0 %v6617_v19 }
 0x3fd   : > { %6406 = vmatprep.subr.bf16.mxu1 %v6618_v12 }
 0x3ff   : > { %6385 = vmatpush3.bf16.msra.mxu0 %v6619_v30 }
 0x400   : > { %6407 = vmatpush3.bf16.msra.mxu1 %v6620_v32  ;;  %6386 = vmatprep.subr.bf16.mxu0 %v6621_v33 }
 0x401   : > { %6408 = vmatprep.subr.bf16.mxu1 %v6622_v35 }
 0x403   : > { %6387 = vmatpush3.bf16.msra.mxu0 %v6623_v36  ;;  %v4841_v36 = vld [vmem:[#allocation3] sm:$0xff] }
 0x404   : > { %6409 = vmatpush3.bf16.msra.mxu1 %v6624_v31  ;;  %6388 = vmatprep.subr.bf16.mxu0 %v6625_v37 }
 0x405   : > { %6410 = vmatprep.subr.bf16.mxu1 %v6626_v3 }
 0x407   : > { %6389 = vmatpush3.bf16.msra.mxu0 %v6627_v7  ;;  %v6323_v7 = vld [vmem:[#allocation11] ss:$0 sm:$0xff] (!%p6322_p9) }
 0x408   : > { %6411 = vmatpush3.bf16.msra.mxu1 %v6628_v38  ;;  %6390 = vmatprep.subr.bf16.mxu0 %v6629_v39 }
 0x409   : > { %6412 = vmatprep.subr.bf16.mxu1 %v6630_v27 }
 0x40b   : > { %6391 = vmatpush3.bf16.msra.mxu0 %v6631_v8 }
 0x40c   : > { %6413 = vmatpush3.bf16.msra.mxu1 %v6632_v40  ;;  %6392 = vmatprep.subr.bf16.mxu0 %v6633_v41 }
 0x40d   : > { %6414 = vmatprep.subr.bf16.mxu1 %v6634_v42 }
 0x40f   : > { %6393 = vmatpush3.bf16.msra.mxu0 %v6635_v20 }
 0x410   : > { %6415 = vmatpush3.bf16.msra.mxu1 %v6636_v49 }
 0x4a5   : > { %v4654_v54 = vpop.f32.mrb[4].mxu0  ;;  %v4818_v56 = vpop.f32.mrb[4].mxu1 }
 0x4a6   : > { %v6426_v55 = vadd.f32 %v4654_v54, %v1560_v48  ;;  %v4656_v57 = vpop.f32.mrb[5].mxu0  ;;  %v6428_v58 = vadd.f32 %v4818_v56, %v1568_v50  ;;  %v4820_v60 = vpop.f32.mrb[5].mxu1 }
 0x4a7   : > { %v6427_v34 = vadd.f32 %v4656_v57, %v1564_v52  ;;  %v4658_v61 = vpop.f32.mrb[6].mxu0  ;;  %v6429_v0 = vadd.f32 %v4820_v60, %v1572_v53  ;;  %v4822_v1 = vpop.f32.mrb[6].mxu1 }
 0x4a8   : > { %v4829_v63 = vmax.f32 %v6426_v55, 0.0  ;;  %v4659_v59 = vpop.f32.mrb[7].mxu0  ;;  %v4831_v4 = vmax.f32 %v6428_v58, 0.0  ;;  %v4823_v9 = vpop.f32.mrb[7].mxu1 }
 0x4a9   : > { %v4830_v5 = vmax.f32 %v6427_v34, 0.0  ;;  %v4832_v11 = vmax.f32 %v6429_v0, 0.0 }
 0x4aa   : > { %v4837_v14 = vpack.c.bf16 %v4829_v63, %v4829_v63  ;;  %v4839_v15 = vpack.c.bf16 %v4831_v4, %v4831_v4 }
 0x4ab   : > { %v4838_v13 = vpack.c.bf16 %v4830_v5, %v4830_v5  ;;  %v4840_v16 = vpack.c.bf16 %v4832_v11, %v4832_v11 }
 0x4ad   : > { %5466 = vmatprep.mubr.bf16.mxu0 %v4838_v13  ;;  %5506 = vmatprep.mubr.bf16.mxu1 %v4840_v16 }
 0x4ae   : > { %5467 = vmatmul.mubr.bf16.vlgmr.msra.gmra.mrb[12].mxu0 %v4837_v14  ;;  %5507 = vmatmul.mubr.bf16.vlgmr.msra.gmra.mrb[12].mxu1 %v4839_v15 }
 0x4c5   : > { %v6350_v51 = vpop.f32.mrb[8].mxu0 }
 0x4c6   : > { %v6372_v62 = vpop.f32.mrb[8].mxu1  ;;  %v6351_v17 = vpop.f32.mrb[9].mxu0 }
 0x4c7   : > { %v6352_v18 = vadd.f32 %v6351_v17, %v6350_v51  ;;  %v6373_v47 = vpop.f32.mrb[9].mxu1  ;;  %v6353_v2 = vpop.f32.mrb[10].mxu0 }
 0x4c8   : > { %v6374_v21 = vadd.f32 %v6373_v47, %v6372_v62  ;;  %v6375_v6 = vpop.f32.mrb[10].mxu1  ;;  %v6354_v22 = vpop.f32.mrb[11].mxu0 }
 0x4c9   : > { %v6376_v23 = vpop.f32.mrb[11].mxu1 }
 0x4ca   : > { %v5429_v24 = vadd.f32 %v6374_v21, %v6352_v18 }
 0x581   : > { %v6394_v25 = vpop.f32.mrb[12].mxu0  ;;  %v6416_v26 = vpop.f32.mrb[12].mxu1 }
 0x582   : > { %v6395_v10 = vpop.f32.mrb[13].mxu0  ;;  %v6417_v29 = vpop.f32.mrb[13].mxu1 }
 0x583   : > { %v6396_v28 = vadd.f32 %v6395_v10, %v6394_v25  ;;  %v6397_v19 = vpop.f32.mrb[14].mxu0  ;;  %v6418_v12 = vadd.f32 %v6417_v29, %v6416_v26  ;;  %v6419_v30 = vpop.f32.mrb[14].mxu1 }
 0x584   : > { %v6398_v32 = vpop.f32.mrb[15].mxu0  ;;  %v6420_v35 = vpop.f32.mrb[15].mxu1 }
 0x585   : > { %v5469_v33 = vadd.f32 %v6396_v28, %v5429_v24  ;;  %5520 = sbr.rel (%p6322_p9) target bundleno = 1432 (0x598), region = 76 }
 0x587   : > { %v5509_v31 = vadd.f32 %v6418_v12, %v5469_v33 }
 0x589   : > { %v5514_v37 = vadd.f32 %v5509_v31, %v4841_v36 }
 0x58b   : > { %5516 = vst.msk [vmem:[#allocation3] sm:$0xff] %vm5515_vm1, %v5514_v37 }
 0x592   : > { %v5521_v3 = vld [vmem:[#allocation3] sm:$0xff] }
 0x593   : > { %v5529_v38 = vadd.f32 %v6323_v7, %v5521_v3 }
 0x595   : > { %v5530_v39 = vmax.f32 %v5529_v38, 0.0 }
 0x597   : > { %5531 = vst.msk [vmem:[#allocation12] sm:$0xff] %vm5515_vm1, %v5530_v39 }
 0x598 PF: > { %p6522_p0 = scmp.eq.s32.totalorder %s6929_s28, 1  ;;  %s6869_s27 = smov [#allocation12]  }
 0x599   : > { %s5539_s14 = sshll.u32 %s6869_s27, 4  ;;  %s5540_s14 = int_to_ptr.vmem [resolvable:$true] %s5539_s14 }
 0x59a   : > { %s6781_s21 = scalar_lea.vmem %s5540_s14, 128  ;;  %p6788_p13 = scmp.lt.s32.totalorder %s5540_s14, %s5540_s14 }
 0x59b   : > { %p6782_p7 = scmp.ne.s32.totalorder %s5540_s14, %s6781_s21  ;;  %p6789_p5 = scmp.lt.s32.totalorder %s6781_s21, %s6781_s21 }
 0x59d   : > { %p6783_p11 = pnand %p6782_p7, %p6522_p0  ;;  %p6790_p10 = por %p6789_p5, %p6788_p13 }
 0x59f   : > { %p6784_p6 = pneg %p6783_p11 }
 0x5a1   : > { %p6791_p1 = pnand %p6790_p10, %p6784_p6 }
 0x5a3   : > { %6794 = shalt.err (!%p6791_p1)
}
 0x5a4   : > { %s6795_s20 = scalar_lea.hbm %s7887_s7, 128 }
 0x5a5   : > { %p6796_p8 = scmp.ne.s32.totalorder %s7887_s7, %s6795_s20  ;;  %p6801_p12 = scmp.lt.u32.totalorder %s6795_s20, %s7887_s7 }
 0x5a7   : > { %p6797_p3 = pnand %p6796_p8, %p6522_p0 }
 0x5a9   : > { %p6798_p4 = pneg %p6797_p3 }
 0x5ab   : > { %p6803_p2 = pnand %p6801_p12, %p6798_p4 }
 0x5ad   : > { %6806 = shalt.err (!%p6803_p2)
}
 0x5ae   : > { %6495 = dma.vmem_to_hbm [thread:$0]  (%p6522_p0), %s5540_s14, 128, %s7887_s7, [#allocation6]  }
 0x5af   : > { %6840 = dma.done.wait (%p6522_p0), [#allocation6], 128  }
 0x5b0   : > { %6842 = vsyncadd (%p6522_p0), [#allocation6], 4294967168 }
 0x5b1 PF: > { %s7924_s27 = sld [smem:[#allocation18_spill]]  ;;  %s7925_s8 = sld [smem:[#allocation19_spill]] }
 0x5b2   : > { %s7926_s24 = smov %s6849_s25  ;;  %s7927_s25 = smov %s6853_s26 }
 0x5b7   : > { %p17_p9 = scmp.ge.s32.totalorder %s7924_s27, 4   ;;  %s7928_s26 = smov %s7925_s8 }
 0x5b9   :  { %19 = sbr.rel (!%p17_p9) target bundleno = 7 (0x7), region = 118 }
 0x5c0   :  { %5552 = vsyncpa [#allocation5], 1 }
 0x5c1   :  { %5554 = vsyncpa [#allocation5 + $0x1], 1 }
 0x5c2   :  { %5555 = vsyncpa [#allocation8], 1 }
 0x5c3   :  { %5556 = vsyncpa [#allocation6], 1 }
 0x5c4   :  { %5558 = vsyncpa [#allocation6 + $0x1], 1 }

</bundles_post_ra>
